<compile_context>
chip_gen: v6e
topology: v6e:2x2x1
jax: 0.10.0
libtpu: 0.0.40
codegen_flags: <defaults>
</compile_context>

<pallas_src>
import jax
import jax.numpy as jnp
from jax import lax
from jax.experimental import pallas as pl
from jax.experimental.pallas import tpu as pltpu


_TAPS = tuple((dy, dx) for dy in (-1, 0, 1) for dx in (-1, 0, 1))
_CENTER = 4  # index of the (0, 0) tap in _TAPS


def _make_fused_basic_block_kernel(H, W, C):
    """Fused BasicBlock kernel for one batch element, layout (C, H*W)."""
    HW = H * W

    def conv3x3_vpu(rows, masks, w_ref):
        # rows : list of Cin rows, each (1, HW) f32.
        # w_ref: (9*Cin, Cout, 1) VMEM; row t*Cin+ci is the (Cout,1) weight
        #        column for tap t / input channel ci (BN scale folded in).
        # Returns the pre-bias conv output (Cout, HW) f32.
        acc = None
        for ci in range(C):
            row = rows[ci]
            for t, (dy, dx) in enumerate(_TAPS):
                s = dy * W + dx
                # shifted[p] = row[p + s]  (wrap-around killed by the mask)
                sh = row if s == 0 else pltpu.roll(row, (-s) % HW, 1)
                if masks[t] is not None:
                    sh = sh * masks[t]
                term = w_ref[t * C + ci] * sh        # (C,1)*(1,HW) -> (C,HW)
                acc = term if acc is None else acc + term
        return acc

    def kernel(mask_ref, x_ref, w1_ref, b1_ref, w2_ref, b2_ref, o_ref):
        x2d = x_ref[0]                               # (C, HW); also residual
        masks = [None if t == _CENTER else mask_ref[t:t + 1, :]
                 for t in range(9)]

        # ---- conv1 (BN1 scale folded into w1) + bias + relu
        x_rows = [x2d[c:c + 1, :] for c in range(C)]
        y1 = conv3x3_vpu(x_rows, masks, w1_ref) + b1_ref[...]
        y1 = jnp.maximum(y1, 0.0)

        # ---- conv2 + bias + residual + relu; y1 never leaves VMEM/vregs.
        y1_rows = [y1[c:c + 1, :] for c in range(C)]
        y2 = conv3x3_vpu(y1_rows, masks, w2_ref) + b2_ref[...]
        o_ref[0] = jnp.maximum(y2 + x2d, 0.0).astype(o_ref.dtype)

    return kernel


def _fold_bn(gamma, beta, mean, var, eps=1e-5):
    scale = gamma / jnp.sqrt(var + eps)
    bias = beta - mean * scale
    return scale.astype(jnp.float32), bias.astype(jnp.float32)


def _conv_w_to_cols(w_oihw, scale):
    """Torch OIHW (Cout,Cin,3,3) * BN scale[Cout] -> (9*Cin, Cout, 1) f32.

    Row t*Cin+ci (t = ky*3+kx) is the (Cout,1) weight column for that tap /
    input channel; the kernel loads it with one leading-index read and
    broadcasts it along lanes.
    """
    co, ci = w_oihw.shape[0], w_oihw.shape[1]
    w = (w_oihw * scale.reshape(-1, 1, 1, 1)).astype(jnp.float32)
    w = jnp.transpose(w, (2, 3, 1, 0)).reshape(9 * ci, co)   # (9*Cin, Cout)
    return w[..., None]


def _edge_masks(H, W):
    """(9, H*W) f32 multiplicative masks implementing the zero padding."""
    p = jnp.arange(H * W)
    col, row = p % W, p // W
    xvalid = {-1: col > 0, 0: None, 1: col < W - 1}
    yvalid = {-1: row > 0, 0: None, 1: row < H - 1}
    masks = []
    for dy, dx in _TAPS:
        m = jnp.ones((H * W,), jnp.bool_)
        if yvalid[dy] is not None:
            m = m & yvalid[dy]
        if xvalid[dx] is not None:
            m = m & xvalid[dx]
        masks.append(m.astype(jnp.float32))
    return jnp.stack(masks, axis=0)


def basic_block_forward(x_nchw, params, eps=1e-5):
    """BasicBlock forward (stride=1, downsample=None). x_nchw: (N, C, H, W)."""
    N, C, H, W = x_nchw.shape
    HW = H * W
    # NCHW with HW flattened onto lanes: pure reshape, no transpose/HBM pass.
    x = x_nchw.reshape(N, C, HW).astype(jnp.float32)

    s1, b1 = _fold_bn(params["bn1_gamma"], params["bn1_beta"],
                      params["bn1_mean"], params["bn1_var"], eps)
    s2, b2 = _fold_bn(params["bn2_gamma"], params["bn2_beta"],
                      params["bn2_mean"], params["bn2_var"], eps)
    w1 = _conv_w_to_cols(params["conv1_w"], s1)
    w2 = _conv_w_to_cols(params["conv2_w"], s2)
    b1 = b1.reshape(C, 1)
    b2 = b2.reshape(C, 1)
    masks = _edge_masks(H, W)

    kernel = _make_fused_basic_block_kernel(H, W, C)

    x_spec = pl.BlockSpec((1, C, HW), lambda n: (n, 0, 0))
    # Constant index_maps: DMA'd once, VMEM-resident across the batch grid.
    mask_spec = pl.BlockSpec((9, HW), lambda n: (0, 0))
    w_spec = pl.BlockSpec((9 * C, C, 1), lambda n: (0, 0, 0))
    b_spec = pl.BlockSpec((C, 1), lambda n: (0, 0))

    out = pl.pallas_call(
        kernel,
        out_shape=jax.ShapeDtypeStruct((N, C, HW), jnp.float32),
        grid_spec=pltpu.PrefetchScalarGridSpec(
            num_scalar_prefetch=0,
            grid=(N,),
            in_specs=[mask_spec, x_spec, w_spec, b_spec, w_spec, b_spec],
            out_specs=pl.BlockSpec((1, C, HW), lambda n: (n, 0, 0)),
        ),
        compiler_params=pltpu.CompilerParams(
            dimension_semantics=("parallel",)),
    )(masks, x, w1, b1, w2, b2)

    return out.reshape(N, C, H, W).astype(x_nchw.dtype)


def reference_forward(x_nchw, params, eps=1e-5):
    """Pure-JAX (lax.conv, f32) reference for verification."""
    def conv(x, w):
        return lax.conv_general_dilated(
            x, w, window_strides=(1, 1), padding=((1, 1), (1, 1)),
            dimension_numbers=("NCHW", "OIHW", "NCHW"))

    def bn(x, g, b, m, v):
        g = g.reshape(1, -1, 1, 1); b = b.reshape(1, -1, 1, 1)
        m = m.reshape(1, -1, 1, 1); v = v.reshape(1, -1, 1, 1)
        return (x - m) / jnp.sqrt(v + eps) * g + b

    out = conv(x_nchw, params["conv1_w"])
    out = bn(out, params["bn1_gamma"], params["bn1_beta"],
             params["bn1_mean"], params["bn1_var"])
    out = jnp.maximum(out, 0.0)
    out = conv(out, params["conv2_w"])
    out = bn(out, params["bn2_gamma"], params["bn2_beta"],
             params["bn2_mean"], params["bn2_var"])
    out = out + x_nchw
    return jnp.maximum(out, 0.0)


if __name__ == "__main__":
    key = jax.random.PRNGKey(0)
    N, C, H, W = 2, 4, 16, 16           # inplanes = planes = 4, stride = 1
    inplanes = planes = C

    keys = jax.random.split(key, 8)
    x = jax.random.normal(keys[0], (N, C, H, W), jnp.float32)

    params = {
        "conv1_w": 0.1 * jax.random.normal(keys[1], (planes, inplanes, 3, 3),
                                           jnp.float32),
        "conv2_w": 0.1 * jax.random.normal(keys[2], (planes, planes, 3, 3),
                                           jnp.float32),
        "bn1_gamma": 1.0 + 0.1 * jax.random.normal(keys[3], (planes,),
                                                   jnp.float32),
        "bn1_beta": 0.1 * jax.random.normal(keys[4], (planes,), jnp.float32),
        "bn1_mean": jnp.zeros((planes,), jnp.float32),
        "bn1_var": jnp.ones((planes,), jnp.float32),
        "bn2_gamma": 1.0 + 0.1 * jax.random.normal(keys[5], (planes,),
                                                   jnp.float32),
        "bn2_beta": 0.1 * jax.random.normal(keys[6], (planes,), jnp.float32),
        "bn2_mean": jnp.zeros((planes,), jnp.float32),
        "bn2_var": jnp.ones((planes,), jnp.float32),
    }

    out = jax.block_until_ready(basic_block_forward(x, params))
    ref = jax.block_until_ready(reference_forward(x, params))

    assert out.shape == (N, C, H, W)
    # f32 end-to-end now (no bf16 MXU operands) -> tight tolerance.
    max_diff = jnp.max(jnp.abs(out - ref))
    assert jnp.allclose(out, ref, atol=1e-3, rtol=1e-3), \
        f"max diff {max_diff}"
    print("KERNEL_OK")
</pallas_src>

<mosaic_0001>
module attributes {stable_mosaic.version = 11 : i64} {
  func.func @kernel(%arg0: i32, %arg1: memref<9x256xf32, #tpu.memory_space<vmem>>, %arg2: memref<1x4x256xf32, #tpu.memory_space<vmem>>, %arg3: memref<36x4x1xf32, #tpu.memory_space<vmem>>, %arg4: memref<4x1xf32, #tpu.memory_space<vmem>>, %arg5: memref<36x4x1xf32, #tpu.memory_space<vmem>>, %arg6: memref<4x1xf32, #tpu.memory_space<vmem>>, %arg7: memref<1x4x256xf32, #tpu.memory_space<vmem>>) attributes {dimension_semantics = [#tpu.dimension_semantics<parallel>], iteration_bounds = array<i64: 2>, scalar_prefetch = 0 : i64, scratch_operands = 0 : i64, tpu.core_type = #tpu.core_type<tc>, window_params = [{pipeline_mode = #tpu.pipeline_mode<synchronous>, transform_indices = @transform_0, window_bounds = array<i64: 9, 256>}, {transform_indices = @transform_1, window_bounds = array<i64: 1, 4, 256>}, {pipeline_mode = #tpu.pipeline_mode<synchronous>, transform_indices = @transform_2, window_bounds = array<i64: 36, 4, 1>}, {pipeline_mode = #tpu.pipeline_mode<synchronous>, transform_indices = @transform_3, window_bounds = array<i64: 4, 1>}, {pipeline_mode = #tpu.pipeline_mode<synchronous>, transform_indices = @transform_4, window_bounds = array<i64: 36, 4, 1>}, {pipeline_mode = #tpu.pipeline_mode<synchronous>, transform_indices = @transform_5, window_bounds = array<i64: 4, 1>}, {transform_indices = @transform_6, window_bounds = array<i64: 1, 4, 256>}]} {
    %c0 = arith.constant 0 : index
    %c0_0 = arith.constant 0 : index
    %c0_1 = arith.constant 0 : index
    %0 = vector.load %arg2[%c0, %c0_0, %c0_1] : memref<1x4x256xf32, #tpu.memory_space<vmem>>, vector<1x4x256xf32>
    %1 = vector.shape_cast %0 : vector<1x4x256xf32> to vector<4x256xf32>
    %c0_2 = arith.constant 0 : index
    %c0_3 = arith.constant 0 : index
    %2 = vector.load %arg1[%c0_2, %c0_3] : memref<9x256xf32, #tpu.memory_space<vmem>>, vector<1x256xf32>
    %c1 = arith.constant 1 : index
    %c0_4 = arith.constant 0 : index
    %3 = vector.load %arg1[%c1, %c0_4] : memref<9x256xf32, #tpu.memory_space<vmem>>, vector<1x256xf32>
    %c2 = arith.constant 2 : index
    %c0_5 = arith.constant 0 : index
    %4 = vector.load %arg1[%c2, %c0_5] : memref<9x256xf32, #tpu.memory_space<vmem>>, vector<1x256xf32>
    %c3 = arith.constant 3 : index
    %c0_6 = arith.constant 0 : index
    %5 = vector.load %arg1[%c3, %c0_6] : memref<9x256xf32, #tpu.memory_space<vmem>>, vector<1x256xf32>
    %c5 = arith.constant 5 : index
    %c0_7 = arith.constant 0 : index
    %6 = vector.load %arg1[%c5, %c0_7] : memref<9x256xf32, #tpu.memory_space<vmem>>, vector<1x256xf32>
    %c6 = arith.constant 6 : index
    %c0_8 = arith.constant 0 : index
    %7 = vector.load %arg1[%c6, %c0_8] : memref<9x256xf32, #tpu.memory_space<vmem>>, vector<1x256xf32>
    %c7 = arith.constant 7 : index
    %c0_9 = arith.constant 0 : index
    %8 = vector.load %arg1[%c7, %c0_9] : memref<9x256xf32, #tpu.memory_space<vmem>>, vector<1x256xf32>
    %c8 = arith.constant 8 : index
    %c0_10 = arith.constant 0 : index
    %9 = vector.load %arg1[%c8, %c0_10] : memref<9x256xf32, #tpu.memory_space<vmem>>, vector<1x256xf32>
    %10 = vector.extract_strided_slice %1 {offsets = [0, 0], sizes = [1, 256], strides = [1, 1]} : vector<4x256xf32> to vector<1x256xf32>
    %11 = vector.extract_strided_slice %1 {offsets = [1, 0], sizes = [1, 256], strides = [1, 1]} : vector<4x256xf32> to vector<1x256xf32>
    %12 = vector.extract_strided_slice %1 {offsets = [2, 0], sizes = [1, 256], strides = [1, 1]} : vector<4x256xf32> to vector<1x256xf32>
    %13 = vector.extract_strided_slice %1 {offsets = [3, 0], sizes = [1, 256], strides = [1, 1]} : vector<4x256xf32> to vector<1x256xf32>
    %c17_i32 = arith.constant 17 : i32
    %14 = tpu.dynamic_rotate %10 by %c17_i32 dim 1 : vector<1x256xf32>, i32 -> vector<1x256xf32>
    %15 = arith.mulf %14, %2 : vector<1x256xf32>
    %c0_11 = arith.constant 0 : index
    %c0_12 = arith.constant 0 : index
    %c0_13 = arith.constant 0 : index
    %16 = vector.load %arg3[%c0_11, %c0_12, %c0_13] : memref<36x4x1xf32, #tpu.memory_space<vmem>>, vector<1x4x1xf32>
    %17 = vector.shape_cast %16 : vector<1x4x1xf32> to vector<4x1xf32>
    %18 = vector.broadcast %17 : vector<4x1xf32> to vector<4x256xf32>
    %19 = vector.broadcast %15 : vector<1x256xf32> to vector<4x256xf32>
    %20 = arith.mulf %18, %19 : vector<4x256xf32>
    %c16_i32 = arith.constant 16 : i32
    %21 = tpu.dynamic_rotate %10 by %c16_i32 dim 1 : vector<1x256xf32>, i32 -> vector<1x256xf32>
    %22 = arith.mulf %21, %3 : vector<1x256xf32>
    %c4 = arith.constant 4 : index
    %c0_14 = arith.constant 0 : index
    %c0_15 = arith.constant 0 : index
    %23 = vector.load %arg3[%c4, %c0_14, %c0_15] : memref<36x4x1xf32, #tpu.memory_space<vmem>>, vector<1x4x1xf32>
    %24 = vector.shape_cast %23 : vector<1x4x1xf32> to vector<4x1xf32>
    %25 = vector.broadcast %24 : vector<4x1xf32> to vector<4x256xf32>
    %26 = vector.broadcast %22 : vector<1x256xf32> to vector<4x256xf32>
    %27 = arith.mulf %25, %26 : vector<4x256xf32>
    %28 = arith.addf %20, %27 : vector<4x256xf32>
    %c15_i32 = arith.constant 15 : i32
    %29 = tpu.dynamic_rotate %10 by %c15_i32 dim 1 : vector<1x256xf32>, i32 -> vector<1x256xf32>
    %30 = arith.mulf %29, %4 : vector<1x256xf32>
    %c8_16 = arith.constant 8 : index
    %c0_17 = arith.constant 0 : index
    %c0_18 = arith.constant 0 : index
    %31 = vector.load %arg3[%c8_16, %c0_17, %c0_18] : memref<36x4x1xf32, #tpu.memory_space<vmem>>, vector<1x4x1xf32>
    %32 = vector.shape_cast %31 : vector<1x4x1xf32> to vector<4x1xf32>
    %33 = vector.broadcast %32 : vector<4x1xf32> to vector<4x256xf32>
    %34 = vector.broadcast %30 : vector<1x256xf32> to vector<4x256xf32>
    %35 = arith.mulf %33, %34 : vector<4x256xf32>
    %36 = arith.addf %28, %35 : vector<4x256xf32>
    %c1_i32 = arith.constant 1 : i32
    %37 = tpu.dynamic_rotate %10 by %c1_i32 dim 1 : vector<1x256xf32>, i32 -> vector<1x256xf32>
    %38 = arith.mulf %37, %5 : vector<1x256xf32>
    %c12 = arith.constant 12 : index
    %c0_19 = arith.constant 0 : index
    %c0_20 = arith.constant 0 : index
    %39 = vector.load %arg3[%c12, %c0_19, %c0_20] : memref<36x4x1xf32, #tpu.memory_space<vmem>>, vector<1x4x1xf32>
    %40 = vector.shape_cast %39 : vector<1x4x1xf32> to vector<4x1xf32>
    %41 = vector.broadcast %40 : vector<4x1xf32> to vector<4x256xf32>
    %42 = vector.broadcast %38 : vector<1x256xf32> to vector<4x256xf32>
    %43 = arith.mulf %41, %42 : vector<4x256xf32>
    %44 = arith.addf %36, %43 : vector<4x256xf32>
    %c16 = arith.constant 16 : index
    %c0_21 = arith.constant 0 : index
    %c0_22 = arith.constant 0 : index
    %45 = vector.load %arg3[%c16, %c0_21, %c0_22] : memref<36x4x1xf32, #tpu.memory_space<vmem>>, vector<1x4x1xf32>
    %46 = vector.shape_cast %45 : vector<1x4x1xf32> to vector<4x1xf32>
    %47 = vector.broadcast %46 : vector<4x1xf32> to vector<4x256xf32>
    %48 = vector.broadcast %10 : vector<1x256xf32> to vector<4x256xf32>
    %49 = arith.mulf %47, %48 : vector<4x256xf32>
    %50 = arith.addf %44, %49 : vector<4x256xf32>
    %c255_i32 = arith.constant 255 : i32
    %51 = tpu.dynamic_rotate %10 by %c255_i32 dim 1 : vector<1x256xf32>, i32 -> vector<1x256xf32>
    %52 = arith.mulf %51, %6 : vector<1x256xf32>
    %c20 = arith.constant 20 : index
    %c0_23 = arith.constant 0 : index
    %c0_24 = arith.constant 0 : index
    %53 = vector.load %arg3[%c20, %c0_23, %c0_24] : memref<36x4x1xf32, #tpu.memory_space<vmem>>, vector<1x4x1xf32>
    %54 = vector.shape_cast %53 : vector<1x4x1xf32> to vector<4x1xf32>
    %55 = vector.broadcast %54 : vector<4x1xf32> to vector<4x256xf32>
    %56 = vector.broadcast %52 : vector<1x256xf32> to vector<4x256xf32>
    %57 = arith.mulf %55, %56 : vector<4x256xf32>
    %58 = arith.addf %50, %57 : vector<4x256xf32>
    %c241_i32 = arith.constant 241 : i32
    %59 = tpu.dynamic_rotate %10 by %c241_i32 dim 1 : vector<1x256xf32>, i32 -> vector<1x256xf32>
    %60 = arith.mulf %59, %7 : vector<1x256xf32>
    %c24 = arith.constant 24 : index
    %c0_25 = arith.constant 0 : index
    %c0_26 = arith.constant 0 : index
    %61 = vector.load %arg3[%c24, %c0_25, %c0_26] : memref<36x4x1xf32, #tpu.memory_space<vmem>>, vector<1x4x1xf32>
    %62 = vector.shape_cast %61 : vector<1x4x1xf32> to vector<4x1xf32>
    %63 = vector.broadcast %62 : vector<4x1xf32> to vector<4x256xf32>
    %64 = vector.broadcast %60 : vector<1x256xf32> to vector<4x256xf32>
    %65 = arith.mulf %63, %64 : vector<4x256xf32>
    %66 = arith.addf %58, %65 : vector<4x256xf32>
    %c240_i32 = arith.constant 240 : i32
    %67 = tpu.dynamic_rotate %10 by %c240_i32 dim 1 : vector<1x256xf32>, i32 -> vector<1x256xf32>
    %68 = arith.mulf %67, %8 : vector<1x256xf32>
    %c28 = arith.constant 28 : index
    %c0_27 = arith.constant 0 : index
    %c0_28 = arith.constant 0 : index
    %69 = vector.load %arg3[%c28, %c0_27, %c0_28] : memref<36x4x1xf32, #tpu.memory_space<vmem>>, vector<1x4x1xf32>
    %70 = vector.shape_cast %69 : vector<1x4x1xf32> to vector<4x1xf32>
    %71 = vector.broadcast %70 : vector<4x1xf32> to vector<4x256xf32>
    %72 = vector.broadcast %68 : vector<1x256xf32> to vector<4x256xf32>
    %73 = arith.mulf %71, %72 : vector<4x256xf32>
    %74 = arith.addf %66, %73 : vector<4x256xf32>
    %c239_i32 = arith.constant 239 : i32
    %75 = tpu.dynamic_rotate %10 by %c239_i32 dim 1 : vector<1x256xf32>, i32 -> vector<1x256xf32>
    %76 = arith.mulf %75, %9 : vector<1x256xf32>
    %c32 = arith.constant 32 : index
    %c0_29 = arith.constant 0 : index
    %c0_30 = arith.constant 0 : index
    %77 = vector.load %arg3[%c32, %c0_29, %c0_30] : memref<36x4x1xf32, #tpu.memory_space<vmem>>, vector<1x4x1xf32>
    %78 = vector.shape_cast %77 : vector<1x4x1xf32> to vector<4x1xf32>
    %79 = vector.broadcast %78 : vector<4x1xf32> to vector<4x256xf32>
    %80 = vector.broadcast %76 : vector<1x256xf32> to vector<4x256xf32>
    %81 = arith.mulf %79, %80 : vector<4x256xf32>
    %82 = arith.addf %74, %81 : vector<4x256xf32>
    %c17_i32_31 = arith.constant 17 : i32
    %83 = tpu.dynamic_rotate %11 by %c17_i32_31 dim 1 : vector<1x256xf32>, i32 -> vector<1x256xf32>
    %84 = arith.mulf %83, %2 : vector<1x256xf32>
    %c1_32 = arith.constant 1 : index
    %c0_33 = arith.constant 0 : index
    %c0_34 = arith.constant 0 : index
    %85 = vector.load %arg3[%c1_32, %c0_33, %c0_34] : memref<36x4x1xf32, #tpu.memory_space<vmem>>, vector<1x4x1xf32>
    %86 = vector.shape_cast %85 : vector<1x4x1xf32> to vector<4x1xf32>
    %87 = vector.broadcast %86 : vector<4x1xf32> to vector<4x256xf32>
    %88 = vector.broadcast %84 : vector<1x256xf32> to vector<4x256xf32>
    %89 = arith.mulf %87, %88 : vector<4x256xf32>
    %90 = arith.addf %82, %89 : vector<4x256xf32>
    %c16_i32_35 = arith.constant 16 : i32
    %91 = tpu.dynamic_rotate %11 by %c16_i32_35 dim 1 : vector<1x256xf32>, i32 -> vector<1x256xf32>
    %92 = arith.mulf %91, %3 : vector<1x256xf32>
    %c5_36 = arith.constant 5 : index
    %c0_37 = arith.constant 0 : index
    %c0_38 = arith.constant 0 : index
    %93 = vector.load %arg3[%c5_36, %c0_37, %c0_38] : memref<36x4x1xf32, #tpu.memory_space<vmem>>, vector<1x4x1xf32>
    %94 = vector.shape_cast %93 : vector<1x4x1xf32> to vector<4x1xf32>
    %95 = vector.broadcast %94 : vector<4x1xf32> to vector<4x256xf32>
    %96 = vector.broadcast %92 : vector<1x256xf32> to vector<4x256xf32>
    %97 = arith.mulf %95, %96 : vector<4x256xf32>
    %98 = arith.addf %90, %97 : vector<4x256xf32>
    %c15_i32_39 = arith.constant 15 : i32
    %99 = tpu.dynamic_rotate %11 by %c15_i32_39 dim 1 : vector<1x256xf32>, i32 -> vector<1x256xf32>
    %100 = arith.mulf %99, %4 : vector<1x256xf32>
    %c9 = arith.constant 9 : index
    %c0_40 = arith.constant 0 : index
    %c0_41 = arith.constant 0 : index
    %101 = vector.load %arg3[%c9, %c0_40, %c0_41] : memref<36x4x1xf32, #tpu.memory_space<vmem>>, vector<1x4x1xf32>
    %102 = vector.shape_cast %101 : vector<1x4x1xf32> to vector<4x1xf32>
    %103 = vector.broadcast %102 : vector<4x1xf32> to vector<4x256xf32>
    %104 = vector.broadcast %100 : vector<1x256xf32> to vector<4x256xf32>
    %105 = arith.mulf %103, %104 : vector<4x256xf32>
    %106 = arith.addf %98, %105 : vector<4x256xf32>
    %c1_i32_42 = arith.constant 1 : i32
    %107 = tpu.dynamic_rotate %11 by %c1_i32_42 dim 1 : vector<1x256xf32>, i32 -> vector<1x256xf32>
    %108 = arith.mulf %107, %5 : vector<1x256xf32>
    %c13 = arith.constant 13 : index
    %c0_43 = arith.constant 0 : index
    %c0_44 = arith.constant 0 : index
    %109 = vector.load %arg3[%c13, %c0_43, %c0_44] : memref<36x4x1xf32, #tpu.memory_space<vmem>>, vector<1x4x1xf32>
    %110 = vector.shape_cast %109 : vector<1x4x1xf32> to vector<4x1xf32>
    %111 = vector.broadcast %110 : vector<4x1xf32> to vector<4x256xf32>
    %112 = vector.broadcast %108 : vector<1x256xf32> to vector<4x256xf32>
    %113 = arith.mulf %111, %112 : vector<4x256xf32>
    %114 = arith.addf %106, %113 : vector<4x256xf32>
    %c17 = arith.constant 17 : index
    %c0_45 = arith.constant 0 : index
    %c0_46 = arith.constant 0 : index
    %115 = vector.load %arg3[%c17, %c0_45, %c0_46] : memref<36x4x1xf32, #tpu.memory_space<vmem>>, vector<1x4x1xf32>
    %116 = vector.shape_cast %115 : vector<1x4x1xf32> to vector<4x1xf32>
    %117 = vector.broadcast %116 : vector<4x1xf32> to vector<4x256xf32>
    %118 = vector.broadcast %11 : vector<1x256xf32> to vector<4x256xf32>
    %119 = arith.mulf %117, %118 : vector<4x256xf32>
    %120 = arith.addf %114, %119 : vector<4x256xf32>
    %c255_i32_47 = arith.constant 255 : i32
    %121 = tpu.dynamic_rotate %11 by %c255_i32_47 dim 1 : vector<1x256xf32>, i32 -> vector<1x256xf32>
    %122 = arith.mulf %121, %6 : vector<1x256xf32>
    %c21 = arith.constant 21 : index
    %c0_48 = arith.constant 0 : index
    %c0_49 = arith.constant 0 : index
    %123 = vector.load %arg3[%c21, %c0_48, %c0_49] : memref<36x4x1xf32, #tpu.memory_space<vmem>>, vector<1x4x1xf32>
    %124 = vector.shape_cast %123 : vector<1x4x1xf32> to vector<4x1xf32>
    %125 = vector.broadcast %124 : vector<4x1xf32> to vector<4x256xf32>
    %126 = vector.broadcast %122 : vector<1x256xf32> to vector<4x256xf32>
    %127 = arith.mulf %125, %126 : vector<4x256xf32>
    %128 = arith.addf %120, %127 : vector<4x256xf32>
    %c241_i32_50 = arith.constant 241 : i32
    %129 = tpu.dynamic_rotate %11 by %c241_i32_50 dim 1 : vector<1x256xf32>, i32 -> vector<1x256xf32>
    %130 = arith.mulf %129, %7 : vector<1x256xf32>
    %c25 = arith.constant 25 : index
    %c0_51 = arith.constant 0 : index
    %c0_52 = arith.constant 0 : index
    %131 = vector.load %arg3[%c25, %c0_51, %c0_52] : memref<36x4x1xf32, #tpu.memory_space<vmem>>, vector<1x4x1xf32>
    %132 = vector.shape_cast %131 : vector<1x4x1xf32> to vector<4x1xf32>
    %133 = vector.broadcast %132 : vector<4x1xf32> to vector<4x256xf32>
    %134 = vector.broadcast %130 : vector<1x256xf32> to vector<4x256xf32>
    %135 = arith.mulf %133, %134 : vector<4x256xf32>
    %136 = arith.addf %128, %135 : vector<4x256xf32>
    %c240_i32_53 = arith.constant 240 : i32
    %137 = tpu.dynamic_rotate %11 by %c240_i32_53 dim 1 : vector<1x256xf32>, i32 -> vector<1x256xf32>
    %138 = arith.mulf %137, %8 : vector<1x256xf32>
    %c29 = arith.constant 29 : index
    %c0_54 = arith.constant 0 : index
    %c0_55 = arith.constant 0 : index
    %139 = vector.load %arg3[%c29, %c0_54, %c0_55] : memref<36x4x1xf32, #tpu.memory_space<vmem>>, vector<1x4x1xf32>
    %140 = vector.shape_cast %139 : vector<1x4x1xf32> to vector<4x1xf32>
    %141 = vector.broadcast %140 : vector<4x1xf32> to vector<4x256xf32>
    %142 = vector.broadcast %138 : vector<1x256xf32> to vector<4x256xf32>
    %143 = arith.mulf %141, %142 : vector<4x256xf32>
    %144 = arith.addf %136, %143 : vector<4x256xf32>
    %c239_i32_56 = arith.constant 239 : i32
    %145 = tpu.dynamic_rotate %11 by %c239_i32_56 dim 1 : vector<1x256xf32>, i32 -> vector<1x256xf32>
    %146 = arith.mulf %145, %9 : vector<1x256xf32>
    %c33 = arith.constant 33 : index
    %c0_57 = arith.constant 0 : index
    %c0_58 = arith.constant 0 : index
    %147 = vector.load %arg3[%c33, %c0_57, %c0_58] : memref<36x4x1xf32, #tpu.memory_space<vmem>>, vector<1x4x1xf32>
    %148 = vector.shape_cast %147 : vector<1x4x1xf32> to vector<4x1xf32>
    %149 = vector.broadcast %148 : vector<4x1xf32> to vector<4x256xf32>
    %150 = vector.broadcast %146 : vector<1x256xf32> to vector<4x256xf32>
    %151 = arith.mulf %149, %150 : vector<4x256xf32>
    %152 = arith.addf %144, %151 : vector<4x256xf32>
    %c17_i32_59 = arith.constant 17 : i32
    %153 = tpu.dynamic_rotate %12 by %c17_i32_59 dim 1 : vector<1x256xf32>, i32 -> vector<1x256xf32>
    %154 = arith.mulf %153, %2 : vector<1x256xf32>
    %c2_60 = arith.constant 2 : index
    %c0_61 = arith.constant 0 : index
    %c0_62 = arith.constant 0 : index
    %155 = vector.load %arg3[%c2_60, %c0_61, %c0_62] : memref<36x4x1xf32, #tpu.memory_space<vmem>>, vector<1x4x1xf32>
    %156 = vector.shape_cast %155 : vector<1x4x1xf32> to vector<4x1xf32>
    %157 = vector.broadcast %156 : vector<4x1xf32> to vector<4x256xf32>
    %158 = vector.broadcast %154 : vector<1x256xf32> to vector<4x256xf32>
    %159 = arith.mulf %157, %158 : vector<4x256xf32>
    %160 = arith.addf %152, %159 : vector<4x256xf32>
    %c16_i32_63 = arith.constant 16 : i32
    %161 = tpu.dynamic_rotate %12 by %c16_i32_63 dim 1 : vector<1x256xf32>, i32 -> vector<1x256xf32>
    %162 = arith.mulf %161, %3 : vector<1x256xf32>
    %c6_64 = arith.constant 6 : index
    %c0_65 = arith.constant 0 : index
    %c0_66 = arith.constant 0 : index
    %163 = vector.load %arg3[%c6_64, %c0_65, %c0_66] : memref<36x4x1xf32, #tpu.memory_space<vmem>>, vector<1x4x1xf32>
    %164 = vector.shape_cast %163 : vector<1x4x1xf32> to vector<4x1xf32>
    %165 = vector.broadcast %164 : vector<4x1xf32> to vector<4x256xf32>
    %166 = vector.broadcast %162 : vector<1x256xf32> to vector<4x256xf32>
    %167 = arith.mulf %165, %166 : vector<4x256xf32>
    %168 = arith.addf %160, %167 : vector<4x256xf32>
    %c15_i32_67 = arith.constant 15 : i32
    %169 = tpu.dynamic_rotate %12 by %c15_i32_67 dim 1 : vector<1x256xf32>, i32 -> vector<1x256xf32>
    %170 = arith.mulf %169, %4 : vector<1x256xf32>
    %c10 = arith.constant 10 : index
    %c0_68 = arith.constant 0 : index
    %c0_69 = arith.constant 0 : index
    %171 = vector.load %arg3[%c10, %c0_68, %c0_69] : memref<36x4x1xf32, #tpu.memory_space<vmem>>, vector<1x4x1xf32>
    %172 = vector.shape_cast %171 : vector<1x4x1xf32> to vector<4x1xf32>
    %173 = vector.broadcast %172 : vector<4x1xf32> to vector<4x256xf32>
    %174 = vector.broadcast %170 : vector<1x256xf32> to vector<4x256xf32>
    %175 = arith.mulf %173, %174 : vector<4x256xf32>
    %176 = arith.addf %168, %175 : vector<4x256xf32>
    %c1_i32_70 = arith.constant 1 : i32
    %177 = tpu.dynamic_rotate %12 by %c1_i32_70 dim 1 : vector<1x256xf32>, i32 -> vector<1x256xf32>
    %178 = arith.mulf %177, %5 : vector<1x256xf32>
    %c14 = arith.constant 14 : index
    %c0_71 = arith.constant 0 : index
    %c0_72 = arith.constant 0 : index
    %179 = vector.load %arg3[%c14, %c0_71, %c0_72] : memref<36x4x1xf32, #tpu.memory_space<vmem>>, vector<1x4x1xf32>
    %180 = vector.shape_cast %179 : vector<1x4x1xf32> to vector<4x1xf32>
    %181 = vector.broadcast %180 : vector<4x1xf32> to vector<4x256xf32>
    %182 = vector.broadcast %178 : vector<1x256xf32> to vector<4x256xf32>
    %183 = arith.mulf %181, %182 : vector<4x256xf32>
    %184 = arith.addf %176, %183 : vector<4x256xf32>
    %c18 = arith.constant 18 : index
    %c0_73 = arith.constant 0 : index
    %c0_74 = arith.constant 0 : index
    %185 = vector.load %arg3[%c18, %c0_73, %c0_74] : memref<36x4x1xf32, #tpu.memory_space<vmem>>, vector<1x4x1xf32>
    %186 = vector.shape_cast %185 : vector<1x4x1xf32> to vector<4x1xf32>
    %187 = vector.broadcast %186 : vector<4x1xf32> to vector<4x256xf32>
    %188 = vector.broadcast %12 : vector<1x256xf32> to vector<4x256xf32>
    %189 = arith.mulf %187, %188 : vector<4x256xf32>
    %190 = arith.addf %184, %189 : vector<4x256xf32>
    %c255_i32_75 = arith.constant 255 : i32
    %191 = tpu.dynamic_rotate %12 by %c255_i32_75 dim 1 : vector<1x256xf32>, i32 -> vector<1x256xf32>
    %192 = arith.mulf %191, %6 : vector<1x256xf32>
    %c22 = arith.constant 22 : index
    %c0_76 = arith.constant 0 : index
    %c0_77 = arith.constant 0 : index
    %193 = vector.load %arg3[%c22, %c0_76, %c0_77] : memref<36x4x1xf32, #tpu.memory_space<vmem>>, vector<1x4x1xf32>
    %194 = vector.shape_cast %193 : vector<1x4x1xf32> to vector<4x1xf32>
    %195 = vector.broadcast %194 : vector<4x1xf32> to vector<4x256xf32>
    %196 = vector.broadcast %192 : vector<1x256xf32> to vector<4x256xf32>
    %197 = arith.mulf %195, %196 : vector<4x256xf32>
    %198 = arith.addf %190, %197 : vector<4x256xf32>
    %c241_i32_78 = arith.constant 241 : i32
    %199 = tpu.dynamic_rotate %12 by %c241_i32_78 dim 1 : vector<1x256xf32>, i32 -> vector<1x256xf32>
    %200 = arith.mulf %199, %7 : vector<1x256xf32>
    %c26 = arith.constant 26 : index
    %c0_79 = arith.constant 0 : index
    %c0_80 = arith.constant 0 : index
    %201 = vector.load %arg3[%c26, %c0_79, %c0_80] : memref<36x4x1xf32, #tpu.memory_space<vmem>>, vector<1x4x1xf32>
    %202 = vector.shape_cast %201 : vector<1x4x1xf32> to vector<4x1xf32>
    %203 = vector.broadcast %202 : vector<4x1xf32> to vector<4x256xf32>
    %204 = vector.broadcast %200 : vector<1x256xf32> to vector<4x256xf32>
    %205 = arith.mulf %203, %204 : vector<4x256xf32>
    %206 = arith.addf %198, %205 : vector<4x256xf32>
    %c240_i32_81 = arith.constant 240 : i32
    %207 = tpu.dynamic_rotate %12 by %c240_i32_81 dim 1 : vector<1x256xf32>, i32 -> vector<1x256xf32>
    %208 = arith.mulf %207, %8 : vector<1x256xf32>
    %c30 = arith.constant 30 : index
    %c0_82 = arith.constant 0 : index
    %c0_83 = arith.constant 0 : index
    %209 = vector.load %arg3[%c30, %c0_82, %c0_83] : memref<36x4x1xf32, #tpu.memory_space<vmem>>, vector<1x4x1xf32>
    %210 = vector.shape_cast %209 : vector<1x4x1xf32> to vector<4x1xf32>
    %211 = vector.broadcast %210 : vector<4x1xf32> to vector<4x256xf32>
    %212 = vector.broadcast %208 : vector<1x256xf32> to vector<4x256xf32>
    %213 = arith.mulf %211, %212 : vector<4x256xf32>
    %214 = arith.addf %206, %213 : vector<4x256xf32>
    %c239_i32_84 = arith.constant 239 : i32
    %215 = tpu.dynamic_rotate %12 by %c239_i32_84 dim 1 : vector<1x256xf32>, i32 -> vector<1x256xf32>
    %216 = arith.mulf %215, %9 : vector<1x256xf32>
    %c34 = arith.constant 34 : index
    %c0_85 = arith.constant 0 : index
    %c0_86 = arith.constant 0 : index
    %217 = vector.load %arg3[%c34, %c0_85, %c0_86] : memref<36x4x1xf32, #tpu.memory_space<vmem>>, vector<1x4x1xf32>
    %218 = vector.shape_cast %217 : vector<1x4x1xf32> to vector<4x1xf32>
    %219 = vector.broadcast %218 : vector<4x1xf32> to vector<4x256xf32>
    %220 = vector.broadcast %216 : vector<1x256xf32> to vector<4x256xf32>
    %221 = arith.mulf %219, %220 : vector<4x256xf32>
    %222 = arith.addf %214, %221 : vector<4x256xf32>
    %c17_i32_87 = arith.constant 17 : i32
    %223 = tpu.dynamic_rotate %13 by %c17_i32_87 dim 1 : vector<1x256xf32>, i32 -> vector<1x256xf32>
    %224 = arith.mulf %223, %2 : vector<1x256xf32>
    %c3_88 = arith.constant 3 : index
    %c0_89 = arith.constant 0 : index
    %c0_90 = arith.constant 0 : index
    %225 = vector.load %arg3[%c3_88, %c0_89, %c0_90] : memref<36x4x1xf32, #tpu.memory_space<vmem>>, vector<1x4x1xf32>
    %226 = vector.shape_cast %225 : vector<1x4x1xf32> to vector<4x1xf32>
    %227 = vector.broadcast %226 : vector<4x1xf32> to vector<4x256xf32>
    %228 = vector.broadcast %224 : vector<1x256xf32> to vector<4x256xf32>
    %229 = arith.mulf %227, %228 : vector<4x256xf32>
    %230 = arith.addf %222, %229 : vector<4x256xf32>
    %c16_i32_91 = arith.constant 16 : i32
    %231 = tpu.dynamic_rotate %13 by %c16_i32_91 dim 1 : vector<1x256xf32>, i32 -> vector<1x256xf32>
    %232 = arith.mulf %231, %3 : vector<1x256xf32>
    %c7_92 = arith.constant 7 : index
    %c0_93 = arith.constant 0 : index
    %c0_94 = arith.constant 0 : index
    %233 = vector.load %arg3[%c7_92, %c0_93, %c0_94] : memref<36x4x1xf32, #tpu.memory_space<vmem>>, vector<1x4x1xf32>
    %234 = vector.shape_cast %233 : vector<1x4x1xf32> to vector<4x1xf32>
    %235 = vector.broadcast %234 : vector<4x1xf32> to vector<4x256xf32>
    %236 = vector.broadcast %232 : vector<1x256xf32> to vector<4x256xf32>
    %237 = arith.mulf %235, %236 : vector<4x256xf32>
    %238 = arith.addf %230, %237 : vector<4x256xf32>
    %c15_i32_95 = arith.constant 15 : i32
    %239 = tpu.dynamic_rotate %13 by %c15_i32_95 dim 1 : vector<1x256xf32>, i32 -> vector<1x256xf32>
    %240 = arith.mulf %239, %4 : vector<1x256xf32>
    %c11 = arith.constant 11 : index
    %c0_96 = arith.constant 0 : index
    %c0_97 = arith.constant 0 : index
    %241 = vector.load %arg3[%c11, %c0_96, %c0_97] : memref<36x4x1xf32, #tpu.memory_space<vmem>>, vector<1x4x1xf32>
    %242 = vector.shape_cast %241 : vector<1x4x1xf32> to vector<4x1xf32>
    %243 = vector.broadcast %242 : vector<4x1xf32> to vector<4x256xf32>
    %244 = vector.broadcast %240 : vector<1x256xf32> to vector<4x256xf32>
    %245 = arith.mulf %243, %244 : vector<4x256xf32>
    %246 = arith.addf %238, %245 : vector<4x256xf32>
    %c1_i32_98 = arith.constant 1 : i32
    %247 = tpu.dynamic_rotate %13 by %c1_i32_98 dim 1 : vector<1x256xf32>, i32 -> vector<1x256xf32>
    %248 = arith.mulf %247, %5 : vector<1x256xf32>
    %c15 = arith.constant 15 : index
    %c0_99 = arith.constant 0 : index
    %c0_100 = arith.constant 0 : index
    %249 = vector.load %arg3[%c15, %c0_99, %c0_100] : memref<36x4x1xf32, #tpu.memory_space<vmem>>, vector<1x4x1xf32>
    %250 = vector.shape_cast %249 : vector<1x4x1xf32> to vector<4x1xf32>
    %251 = vector.broadcast %250 : vector<4x1xf32> to vector<4x256xf32>
    %252 = vector.broadcast %248 : vector<1x256xf32> to vector<4x256xf32>
    %253 = arith.mulf %251, %252 : vector<4x256xf32>
    %254 = arith.addf %246, %253 : vector<4x256xf32>
    %c19 = arith.constant 19 : index
    %c0_101 = arith.constant 0 : index
    %c0_102 = arith.constant 0 : index
    %255 = vector.load %arg3[%c19, %c0_101, %c0_102] : memref<36x4x1xf32, #tpu.memory_space<vmem>>, vector<1x4x1xf32>
    %256 = vector.shape_cast %255 : vector<1x4x1xf32> to vector<4x1xf32>
    %257 = vector.broadcast %256 : vector<4x1xf32> to vector<4x256xf32>
    %258 = vector.broadcast %13 : vector<1x256xf32> to vector<4x256xf32>
    %259 = arith.mulf %257, %258 : vector<4x256xf32>
    %260 = arith.addf %254, %259 : vector<4x256xf32>
    %c255_i32_103 = arith.constant 255 : i32
    %261 = tpu.dynamic_rotate %13 by %c255_i32_103 dim 1 : vector<1x256xf32>, i32 -> vector<1x256xf32>
    %262 = arith.mulf %261, %6 : vector<1x256xf32>
    %c23 = arith.constant 23 : index
    %c0_104 = arith.constant 0 : index
    %c0_105 = arith.constant 0 : index
    %263 = vector.load %arg3[%c23, %c0_104, %c0_105] : memref<36x4x1xf32, #tpu.memory_space<vmem>>, vector<1x4x1xf32>
    %264 = vector.shape_cast %263 : vector<1x4x1xf32> to vector<4x1xf32>
    %265 = vector.broadcast %264 : vector<4x1xf32> to vector<4x256xf32>
    %266 = vector.broadcast %262 : vector<1x256xf32> to vector<4x256xf32>
    %267 = arith.mulf %265, %266 : vector<4x256xf32>
    %268 = arith.addf %260, %267 : vector<4x256xf32>
    %c241_i32_106 = arith.constant 241 : i32
    %269 = tpu.dynamic_rotate %13 by %c241_i32_106 dim 1 : vector<1x256xf32>, i32 -> vector<1x256xf32>
    %270 = arith.mulf %269, %7 : vector<1x256xf32>
    %c27 = arith.constant 27 : index
    %c0_107 = arith.constant 0 : index
    %c0_108 = arith.constant 0 : index
    %271 = vector.load %arg3[%c27, %c0_107, %c0_108] : memref<36x4x1xf32, #tpu.memory_space<vmem>>, vector<1x4x1xf32>
    %272 = vector.shape_cast %271 : vector<1x4x1xf32> to vector<4x1xf32>
    %273 = vector.broadcast %272 : vector<4x1xf32> to vector<4x256xf32>
    %274 = vector.broadcast %270 : vector<1x256xf32> to vector<4x256xf32>
    %275 = arith.mulf %273, %274 : vector<4x256xf32>
    %276 = arith.addf %268, %275 : vector<4x256xf32>
    %c240_i32_109 = arith.constant 240 : i32
    %277 = tpu.dynamic_rotate %13 by %c240_i32_109 dim 1 : vector<1x256xf32>, i32 -> vector<1x256xf32>
    %278 = arith.mulf %277, %8 : vector<1x256xf32>
    %c31 = arith.constant 31 : index
    %c0_110 = arith.constant 0 : index
    %c0_111 = arith.constant 0 : index
    %279 = vector.load %arg3[%c31, %c0_110, %c0_111] : memref<36x4x1xf32, #tpu.memory_space<vmem>>, vector<1x4x1xf32>
    %280 = vector.shape_cast %279 : vector<1x4x1xf32> to vector<4x1xf32>
    %281 = vector.broadcast %280 : vector<4x1xf32> to vector<4x256xf32>
    %282 = vector.broadcast %278 : vector<1x256xf32> to vector<4x256xf32>
    %283 = arith.mulf %281, %282 : vector<4x256xf32>
    %284 = arith.addf %276, %283 : vector<4x256xf32>
    %c239_i32_112 = arith.constant 239 : i32
    %285 = tpu.dynamic_rotate %13 by %c239_i32_112 dim 1 : vector<1x256xf32>, i32 -> vector<1x256xf32>
    %286 = arith.mulf %285, %9 : vector<1x256xf32>
    %c35 = arith.constant 35 : index
    %c0_113 = arith.constant 0 : index
    %c0_114 = arith.constant 0 : index
    %287 = vector.load %arg3[%c35, %c0_113, %c0_114] : memref<36x4x1xf32, #tpu.memory_space<vmem>>, vector<1x4x1xf32>
    %288 = vector.shape_cast %287 : vector<1x4x1xf32> to vector<4x1xf32>
    %289 = vector.broadcast %288 : vector<4x1xf32> to vector<4x256xf32>
    %290 = vector.broadcast %286 : vector<1x256xf32> to vector<4x256xf32>
    %291 = arith.mulf %289, %290 : vector<4x256xf32>
    %292 = arith.addf %284, %291 : vector<4x256xf32>
    %c0_115 = arith.constant 0 : index
    %c0_116 = arith.constant 0 : index
    %293 = vector.load %arg4[%c0_115, %c0_116] : memref<4x1xf32, #tpu.memory_space<vmem>>, vector<4x1xf32>
    %294 = vector.broadcast %293 : vector<4x1xf32> to vector<4x256xf32>
    %295 = arith.addf %292, %294 : vector<4x256xf32>
    %cst = arith.constant 0.000000e+00 : f32
    %296 = vector.broadcast %cst : f32 to vector<4x256xf32>
    %297 = arith.maximumf %295, %296 : vector<4x256xf32>
    %298 = vector.extract_strided_slice %297 {offsets = [0, 0], sizes = [1, 256], strides = [1, 1]} : vector<4x256xf32> to vector<1x256xf32>
    %299 = vector.extract_strided_slice %297 {offsets = [1, 0], sizes = [1, 256], strides = [1, 1]} : vector<4x256xf32> to vector<1x256xf32>
    %300 = vector.extract_strided_slice %297 {offsets = [2, 0], sizes = [1, 256], strides = [1, 1]} : vector<4x256xf32> to vector<1x256xf32>
    %301 = vector.extract_strided_slice %297 {offsets = [3, 0], sizes = [1, 256], strides = [1, 1]} : vector<4x256xf32> to vector<1x256xf32>
    %c17_i32_117 = arith.constant 17 : i32
    %302 = tpu.dynamic_rotate %298 by %c17_i32_117 dim 1 : vector<1x256xf32>, i32 -> vector<1x256xf32>
    %303 = arith.mulf %302, %2 : vector<1x256xf32>
    %c0_118 = arith.constant 0 : index
    %c0_119 = arith.constant 0 : index
    %c0_120 = arith.constant 0 : index
    %304 = vector.load %arg5[%c0_118, %c0_119, %c0_120] : memref<36x4x1xf32, #tpu.memory_space<vmem>>, vector<1x4x1xf32>
    %305 = vector.shape_cast %304 : vector<1x4x1xf32> to vector<4x1xf32>
    %306 = vector.broadcast %305 : vector<4x1xf32> to vector<4x256xf32>
    %307 = vector.broadcast %303 : vector<1x256xf32> to vector<4x256xf32>
    %308 = arith.mulf %306, %307 : vector<4x256xf32>
    %c16_i32_121 = arith.constant 16 : i32
    %309 = tpu.dynamic_rotate %298 by %c16_i32_121 dim 1 : vector<1x256xf32>, i32 -> vector<1x256xf32>
    %310 = arith.mulf %309, %3 : vector<1x256xf32>
    %c4_122 = arith.constant 4 : index
    %c0_123 = arith.constant 0 : index
    %c0_124 = arith.constant 0 : index
    %311 = vector.load %arg5[%c4_122, %c0_123, %c0_124] : memref<36x4x1xf32, #tpu.memory_space<vmem>>, vector<1x4x1xf32>
    %312 = vector.shape_cast %311 : vector<1x4x1xf32> to vector<4x1xf32>
    %313 = vector.broadcast %312 : vector<4x1xf32> to vector<4x256xf32>
    %314 = vector.broadcast %310 : vector<1x256xf32> to vector<4x256xf32>
    %315 = arith.mulf %313, %314 : vector<4x256xf32>
    %316 = arith.addf %308, %315 : vector<4x256xf32>
    %c15_i32_125 = arith.constant 15 : i32
    %317 = tpu.dynamic_rotate %298 by %c15_i32_125 dim 1 : vector<1x256xf32>, i32 -> vector<1x256xf32>
    %318 = arith.mulf %317, %4 : vector<1x256xf32>
    %c8_126 = arith.constant 8 : index
    %c0_127 = arith.constant 0 : index
    %c0_128 = arith.constant 0 : index
    %319 = vector.load %arg5[%c8_126, %c0_127, %c0_128] : memref<36x4x1xf32, #tpu.memory_space<vmem>>, vector<1x4x1xf32>
    %320 = vector.shape_cast %319 : vector<1x4x1xf32> to vector<4x1xf32>
    %321 = vector.broadcast %320 : vector<4x1xf32> to vector<4x256xf32>
    %322 = vector.broadcast %318 : vector<1x256xf32> to vector<4x256xf32>
    %323 = arith.mulf %321, %322 : vector<4x256xf32>
    %324 = arith.addf %316, %323 : vector<4x256xf32>
    %c1_i32_129 = arith.constant 1 : i32
    %325 = tpu.dynamic_rotate %298 by %c1_i32_129 dim 1 : vector<1x256xf32>, i32 -> vector<1x256xf32>
    %326 = arith.mulf %325, %5 : vector<1x256xf32>
    %c12_130 = arith.constant 12 : index
    %c0_131 = arith.constant 0 : index
    %c0_132 = arith.constant 0 : index
    %327 = vector.load %arg5[%c12_130, %c0_131, %c0_132] : memref<36x4x1xf32, #tpu.memory_space<vmem>>, vector<1x4x1xf32>
    %328 = vector.shape_cast %327 : vector<1x4x1xf32> to vector<4x1xf32>
    %329 = vector.broadcast %328 : vector<4x1xf32> to vector<4x256xf32>
    %330 = vector.broadcast %326 : vector<1x256xf32> to vector<4x256xf32>
    %331 = arith.mulf %329, %330 : vector<4x256xf32>
    %332 = arith.addf %324, %331 : vector<4x256xf32>
    %c16_133 = arith.constant 16 : index
    %c0_134 = arith.constant 0 : index
    %c0_135 = arith.constant 0 : index
    %333 = vector.load %arg5[%c16_133, %c0_134, %c0_135] : memref<36x4x1xf32, #tpu.memory_space<vmem>>, vector<1x4x1xf32>
    %334 = vector.shape_cast %333 : vector<1x4x1xf32> to vector<4x1xf32>
    %335 = vector.broadcast %334 : vector<4x1xf32> to vector<4x256xf32>
    %336 = vector.broadcast %298 : vector<1x256xf32> to vector<4x256xf32>
    %337 = arith.mulf %335, %336 : vector<4x256xf32>
    %338 = arith.addf %332, %337 : vector<4x256xf32>
    %c255_i32_136 = arith.constant 255 : i32
    %339 = tpu.dynamic_rotate %298 by %c255_i32_136 dim 1 : vector<1x256xf32>, i32 -> vector<1x256xf32>
    %340 = arith.mulf %339, %6 : vector<1x256xf32>
    %c20_137 = arith.constant 20 : index
    %c0_138 = arith.constant 0 : index
    %c0_139 = arith.constant 0 : index
    %341 = vector.load %arg5[%c20_137, %c0_138, %c0_139] : memref<36x4x1xf32, #tpu.memory_space<vmem>>, vector<1x4x1xf32>
    %342 = vector.shape_cast %341 : vector<1x4x1xf32> to vector<4x1xf32>
    %343 = vector.broadcast %342 : vector<4x1xf32> to vector<4x256xf32>
    %344 = vector.broadcast %340 : vector<1x256xf32> to vector<4x256xf32>
    %345 = arith.mulf %343, %344 : vector<4x256xf32>
    %346 = arith.addf %338, %345 : vector<4x256xf32>
    %c241_i32_140 = arith.constant 241 : i32
    %347 = tpu.dynamic_rotate %298 by %c241_i32_140 dim 1 : vector<1x256xf32>, i32 -> vector<1x256xf32>
    %348 = arith.mulf %347, %7 : vector<1x256xf32>
    %c24_141 = arith.constant 24 : index
    %c0_142 = arith.constant 0 : index
    %c0_143 = arith.constant 0 : index
    %349 = vector.load %arg5[%c24_141, %c0_142, %c0_143] : memref<36x4x1xf32, #tpu.memory_space<vmem>>, vector<1x4x1xf32>
    %350 = vector.shape_cast %349 : vector<1x4x1xf32> to vector<4x1xf32>
    %351 = vector.broadcast %350 : vector<4x1xf32> to vector<4x256xf32>
    %352 = vector.broadcast %348 : vector<1x256xf32> to vector<4x256xf32>
    %353 = arith.mulf %351, %352 : vector<4x256xf32>
    %354 = arith.addf %346, %353 : vector<4x256xf32>
    %c240_i32_144 = arith.constant 240 : i32
    %355 = tpu.dynamic_rotate %298 by %c240_i32_144 dim 1 : vector<1x256xf32>, i32 -> vector<1x256xf32>
    %356 = arith.mulf %355, %8 : vector<1x256xf32>
    %c28_145 = arith.constant 28 : index
    %c0_146 = arith.constant 0 : index
    %c0_147 = arith.constant 0 : index
    %357 = vector.load %arg5[%c28_145, %c0_146, %c0_147] : memref<36x4x1xf32, #tpu.memory_space<vmem>>, vector<1x4x1xf32>
    %358 = vector.shape_cast %357 : vector<1x4x1xf32> to vector<4x1xf32>
    %359 = vector.broadcast %358 : vector<4x1xf32> to vector<4x256xf32>
    %360 = vector.broadcast %356 : vector<1x256xf32> to vector<4x256xf32>
    %361 = arith.mulf %359, %360 : vector<4x256xf32>
    %362 = arith.addf %354, %361 : vector<4x256xf32>
    %c239_i32_148 = arith.constant 239 : i32
    %363 = tpu.dynamic_rotate %298 by %c239_i32_148 dim 1 : vector<1x256xf32>, i32 -> vector<1x256xf32>
    %364 = arith.mulf %363, %9 : vector<1x256xf32>
    %c32_149 = arith.constant 32 : index
    %c0_150 = arith.constant 0 : index
    %c0_151 = arith.constant 0 : index
    %365 = vector.load %arg5[%c32_149, %c0_150, %c0_151] : memref<36x4x1xf32, #tpu.memory_space<vmem>>, vector<1x4x1xf32>
    %366 = vector.shape_cast %365 : vector<1x4x1xf32> to vector<4x1xf32>
    %367 = vector.broadcast %366 : vector<4x1xf32> to vector<4x256xf32>
    %368 = vector.broadcast %364 : vector<1x256xf32> to vector<4x256xf32>
    %369 = arith.mulf %367, %368 : vector<4x256xf32>
    %370 = arith.addf %362, %369 : vector<4x256xf32>
    %c17_i32_152 = arith.constant 17 : i32
    %371 = tpu.dynamic_rotate %299 by %c17_i32_152 dim 1 : vector<1x256xf32>, i32 -> vector<1x256xf32>
    %372 = arith.mulf %371, %2 : vector<1x256xf32>
    %c1_153 = arith.constant 1 : index
    %c0_154 = arith.constant 0 : index
    %c0_155 = arith.constant 0 : index
    %373 = vector.load %arg5[%c1_153, %c0_154, %c0_155] : memref<36x4x1xf32, #tpu.memory_space<vmem>>, vector<1x4x1xf32>
    %374 = vector.shape_cast %373 : vector<1x4x1xf32> to vector<4x1xf32>
    %375 = vector.broadcast %374 : vector<4x1xf32> to vector<4x256xf32>
    %376 = vector.broadcast %372 : vector<1x256xf32> to vector<4x256xf32>
    %377 = arith.mulf %375, %376 : vector<4x256xf32>
    %378 = arith.addf %370, %377 : vector<4x256xf32>
    %c16_i32_156 = arith.constant 16 : i32
    %379 = tpu.dynamic_rotate %299 by %c16_i32_156 dim 1 : vector<1x256xf32>, i32 -> vector<1x256xf32>
    %380 = arith.mulf %379, %3 : vector<1x256xf32>
    %c5_157 = arith.constant 5 : index
    %c0_158 = arith.constant 0 : index
    %c0_159 = arith.constant 0 : index
    %381 = vector.load %arg5[%c5_157, %c0_158, %c0_159] : memref<36x4x1xf32, #tpu.memory_space<vmem>>, vector<1x4x1xf32>
    %382 = vector.shape_cast %381 : vector<1x4x1xf32> to vector<4x1xf32>
    %383 = vector.broadcast %382 : vector<4x1xf32> to vector<4x256xf32>
    %384 = vector.broadcast %380 : vector<1x256xf32> to vector<4x256xf32>
    %385 = arith.mulf %383, %384 : vector<4x256xf32>
    %386 = arith.addf %378, %385 : vector<4x256xf32>
    %c15_i32_160 = arith.constant 15 : i32
    %387 = tpu.dynamic_rotate %299 by %c15_i32_160 dim 1 : vector<1x256xf32>, i32 -> vector<1x256xf32>
    %388 = arith.mulf %387, %4 : vector<1x256xf32>
    %c9_161 = arith.constant 9 : index
    %c0_162 = arith.constant 0 : index
    %c0_163 = arith.constant 0 : index
    %389 = vector.load %arg5[%c9_161, %c0_162, %c0_163] : memref<36x4x1xf32, #tpu.memory_space<vmem>>, vector<1x4x1xf32>
    %390 = vector.shape_cast %389 : vector<1x4x1xf32> to vector<4x1xf32>
    %391 = vector.broadcast %390 : vector<4x1xf32> to vector<4x256xf32>
    %392 = vector.broadcast %388 : vector<1x256xf32> to vector<4x256xf32>
    %393 = arith.mulf %391, %392 : vector<4x256xf32>
    %394 = arith.addf %386, %393 : vector<4x256xf32>
    %c1_i32_164 = arith.constant 1 : i32
    %395 = tpu.dynamic_rotate %299 by %c1_i32_164 dim 1 : vector<1x256xf32>, i32 -> vector<1x256xf32>
    %396 = arith.mulf %395, %5 : vector<1x256xf32>
    %c13_165 = arith.constant 13 : index
    %c0_166 = arith.constant 0 : index
    %c0_167 = arith.constant 0 : index
    %397 = vector.load %arg5[%c13_165, %c0_166, %c0_167] : memref<36x4x1xf32, #tpu.memory_space<vmem>>, vector<1x4x1xf32>
    %398 = vector.shape_cast %397 : vector<1x4x1xf32> to vector<4x1xf32>
    %399 = vector.broadcast %398 : vector<4x1xf32> to vector<4x256xf32>
    %400 = vector.broadcast %396 : vector<1x256xf32> to vector<4x256xf32>
    %401 = arith.mulf %399, %400 : vector<4x256xf32>
    %402 = arith.addf %394, %401 : vector<4x256xf32>
    %c17_168 = arith.constant 17 : index
    %c0_169 = arith.constant 0 : index
    %c0_170 = arith.constant 0 : index
    %403 = vector.load %arg5[%c17_168, %c0_169, %c0_170] : memref<36x4x1xf32, #tpu.memory_space<vmem>>, vector<1x4x1xf32>
    %404 = vector.shape_cast %403 : vector<1x4x1xf32> to vector<4x1xf32>
    %405 = vector.broadcast %404 : vector<4x1xf32> to vector<4x256xf32>
    %406 = vector.broadcast %299 : vector<1x256xf32> to vector<4x256xf32>
    %407 = arith.mulf %405, %406 : vector<4x256xf32>
    %408 = arith.addf %402, %407 : vector<4x256xf32>
    %c255_i32_171 = arith.constant 255 : i32
    %409 = tpu.dynamic_rotate %299 by %c255_i32_171 dim 1 : vector<1x256xf32>, i32 -> vector<1x256xf32>
    %410 = arith.mulf %409, %6 : vector<1x256xf32>
    %c21_172 = arith.constant 21 : index
    %c0_173 = arith.constant 0 : index
    %c0_174 = arith.constant 0 : index
    %411 = vector.load %arg5[%c21_172, %c0_173, %c0_174] : memref<36x4x1xf32, #tpu.memory_space<vmem>>, vector<1x4x1xf32>
    %412 = vector.shape_cast %411 : vector<1x4x1xf32> to vector<4x1xf32>
    %413 = vector.broadcast %412 : vector<4x1xf32> to vector<4x256xf32>
    %414 = vector.broadcast %410 : vector<1x256xf32> to vector<4x256xf32>
    %415 = arith.mulf %413, %414 : vector<4x256xf32>
    %416 = arith.addf %408, %415 : vector<4x256xf32>
    %c241_i32_175 = arith.constant 241 : i32
    %417 = tpu.dynamic_rotate %299 by %c241_i32_175 dim 1 : vector<1x256xf32>, i32 -> vector<1x256xf32>
    %418 = arith.mulf %417, %7 : vector<1x256xf32>
    %c25_176 = arith.constant 25 : index
    %c0_177 = arith.constant 0 : index
    %c0_178 = arith.constant 0 : index
    %419 = vector.load %arg5[%c25_176, %c0_177, %c0_178] : memref<36x4x1xf32, #tpu.memory_space<vmem>>, vector<1x4x1xf32>
    %420 = vector.shape_cast %419 : vector<1x4x1xf32> to vector<4x1xf32>
    %421 = vector.broadcast %420 : vector<4x1xf32> to vector<4x256xf32>
    %422 = vector.broadcast %418 : vector<1x256xf32> to vector<4x256xf32>
    %423 = arith.mulf %421, %422 : vector<4x256xf32>
    %424 = arith.addf %416, %423 : vector<4x256xf32>
    %c240_i32_179 = arith.constant 240 : i32
    %425 = tpu.dynamic_rotate %299 by %c240_i32_179 dim 1 : vector<1x256xf32>, i32 -> vector<1x256xf32>
    %426 = arith.mulf %425, %8 : vector<1x256xf32>
    %c29_180 = arith.constant 29 : index
    %c0_181 = arith.constant 0 : index
    %c0_182 = arith.constant 0 : index
    %427 = vector.load %arg5[%c29_180, %c0_181, %c0_182] : memref<36x4x1xf32, #tpu.memory_space<vmem>>, vector<1x4x1xf32>
    %428 = vector.shape_cast %427 : vector<1x4x1xf32> to vector<4x1xf32>
    %429 = vector.broadcast %428 : vector<4x1xf32> to vector<4x256xf32>
    %430 = vector.broadcast %426 : vector<1x256xf32> to vector<4x256xf32>
    %431 = arith.mulf %429, %430 : vector<4x256xf32>
    %432 = arith.addf %424, %431 : vector<4x256xf32>
    %c239_i32_183 = arith.constant 239 : i32
    %433 = tpu.dynamic_rotate %299 by %c239_i32_183 dim 1 : vector<1x256xf32>, i32 -> vector<1x256xf32>
    %434 = arith.mulf %433, %9 : vector<1x256xf32>
    %c33_184 = arith.constant 33 : index
    %c0_185 = arith.constant 0 : index
    %c0_186 = arith.constant 0 : index
    %435 = vector.load %arg5[%c33_184, %c0_185, %c0_186] : memref<36x4x1xf32, #tpu.memory_space<vmem>>, vector<1x4x1xf32>
    %436 = vector.shape_cast %435 : vector<1x4x1xf32> to vector<4x1xf32>
    %437 = vector.broadcast %436 : vector<4x1xf32> to vector<4x256xf32>
    %438 = vector.broadcast %434 : vector<1x256xf32> to vector<4x256xf32>
    %439 = arith.mulf %437, %438 : vector<4x256xf32>
    %440 = arith.addf %432, %439 : vector<4x256xf32>
    %c17_i32_187 = arith.constant 17 : i32
    %441 = tpu.dynamic_rotate %300 by %c17_i32_187 dim 1 : vector<1x256xf32>, i32 -> vector<1x256xf32>
    %442 = arith.mulf %441, %2 : vector<1x256xf32>
    %c2_188 = arith.constant 2 : index
    %c0_189 = arith.constant 0 : index
    %c0_190 = arith.constant 0 : index
    %443 = vector.load %arg5[%c2_188, %c0_189, %c0_190] : memref<36x4x1xf32, #tpu.memory_space<vmem>>, vector<1x4x1xf32>
    %444 = vector.shape_cast %443 : vector<1x4x1xf32> to vector<4x1xf32>
    %445 = vector.broadcast %444 : vector<4x1xf32> to vector<4x256xf32>
    %446 = vector.broadcast %442 : vector<1x256xf32> to vector<4x256xf32>
    %447 = arith.mulf %445, %446 : vector<4x256xf32>
    %448 = arith.addf %440, %447 : vector<4x256xf32>
    %c16_i32_191 = arith.constant 16 : i32
    %449 = tpu.dynamic_rotate %300 by %c16_i32_191 dim 1 : vector<1x256xf32>, i32 -> vector<1x256xf32>
    %450 = arith.mulf %449, %3 : vector<1x256xf32>
    %c6_192 = arith.constant 6 : index
    %c0_193 = arith.constant 0 : index
    %c0_194 = arith.constant 0 : index
    %451 = vector.load %arg5[%c6_192, %c0_193, %c0_194] : memref<36x4x1xf32, #tpu.memory_space<vmem>>, vector<1x4x1xf32>
    %452 = vector.shape_cast %451 : vector<1x4x1xf32> to vector<4x1xf32>
    %453 = vector.broadcast %452 : vector<4x1xf32> to vector<4x256xf32>
    %454 = vector.broadcast %450 : vector<1x256xf32> to vector<4x256xf32>
    %455 = arith.mulf %453, %454 : vector<4x256xf32>
    %456 = arith.addf %448, %455 : vector<4x256xf32>
    %c15_i32_195 = arith.constant 15 : i32
    %457 = tpu.dynamic_rotate %300 by %c15_i32_195 dim 1 : vector<1x256xf32>, i32 -> vector<1x256xf32>
    %458 = arith.mulf %457, %4 : vector<1x256xf32>
    %c10_196 = arith.constant 10 : index
    %c0_197 = arith.constant 0 : index
    %c0_198 = arith.constant 0 : index
    %459 = vector.load %arg5[%c10_196, %c0_197, %c0_198] : memref<36x4x1xf32, #tpu.memory_space<vmem>>, vector<1x4x1xf32>
    %460 = vector.shape_cast %459 : vector<1x4x1xf32> to vector<4x1xf32>
    %461 = vector.broadcast %460 : vector<4x1xf32> to vector<4x256xf32>
    %462 = vector.broadcast %458 : vector<1x256xf32> to vector<4x256xf32>
    %463 = arith.mulf %461, %462 : vector<4x256xf32>
    %464 = arith.addf %456, %463 : vector<4x256xf32>
    %c1_i32_199 = arith.constant 1 : i32
    %465 = tpu.dynamic_rotate %300 by %c1_i32_199 dim 1 : vector<1x256xf32>, i32 -> vector<1x256xf32>
    %466 = arith.mulf %465, %5 : vector<1x256xf32>
    %c14_200 = arith.constant 14 : index
    %c0_201 = arith.constant 0 : index
    %c0_202 = arith.constant 0 : index
    %467 = vector.load %arg5[%c14_200, %c0_201, %c0_202] : memref<36x4x1xf32, #tpu.memory_space<vmem>>, vector<1x4x1xf32>
    %468 = vector.shape_cast %467 : vector<1x4x1xf32> to vector<4x1xf32>
    %469 = vector.broadcast %468 : vector<4x1xf32> to vector<4x256xf32>
    %470 = vector.broadcast %466 : vector<1x256xf32> to vector<4x256xf32>
    %471 = arith.mulf %469, %470 : vector<4x256xf32>
    %472 = arith.addf %464, %471 : vector<4x256xf32>
    %c18_203 = arith.constant 18 : index
    %c0_204 = arith.constant 0 : index
    %c0_205 = arith.constant 0 : index
    %473 = vector.load %arg5[%c18_203, %c0_204, %c0_205] : memref<36x4x1xf32, #tpu.memory_space<vmem>>, vector<1x4x1xf32>
    %474 = vector.shape_cast %473 : vector<1x4x1xf32> to vector<4x1xf32>
    %475 = vector.broadcast %474 : vector<4x1xf32> to vector<4x256xf32>
    %476 = vector.broadcast %300 : vector<1x256xf32> to vector<4x256xf32>
    %477 = arith.mulf %475, %476 : vector<4x256xf32>
    %478 = arith.addf %472, %477 : vector<4x256xf32>
    %c255_i32_206 = arith.constant 255 : i32
    %479 = tpu.dynamic_rotate %300 by %c255_i32_206 dim 1 : vector<1x256xf32>, i32 -> vector<1x256xf32>
    %480 = arith.mulf %479, %6 : vector<1x256xf32>
    %c22_207 = arith.constant 22 : index
    %c0_208 = arith.constant 0 : index
    %c0_209 = arith.constant 0 : index
    %481 = vector.load %arg5[%c22_207, %c0_208, %c0_209] : memref<36x4x1xf32, #tpu.memory_space<vmem>>, vector<1x4x1xf32>
    %482 = vector.shape_cast %481 : vector<1x4x1xf32> to vector<4x1xf32>
    %483 = vector.broadcast %482 : vector<4x1xf32> to vector<4x256xf32>
    %484 = vector.broadcast %480 : vector<1x256xf32> to vector<4x256xf32>
    %485 = arith.mulf %483, %484 : vector<4x256xf32>
    %486 = arith.addf %478, %485 : vector<4x256xf32>
    %c241_i32_210 = arith.constant 241 : i32
    %487 = tpu.dynamic_rotate %300 by %c241_i32_210 dim 1 : vector<1x256xf32>, i32 -> vector<1x256xf32>
    %488 = arith.mulf %487, %7 : vector<1x256xf32>
    %c26_211 = arith.constant 26 : index
    %c0_212 = arith.constant 0 : index
    %c0_213 = arith.constant 0 : index
    %489 = vector.load %arg5[%c26_211, %c0_212, %c0_213] : memref<36x4x1xf32, #tpu.memory_space<vmem>>, vector<1x4x1xf32>
    %490 = vector.shape_cast %489 : vector<1x4x1xf32> to vector<4x1xf32>
    %491 = vector.broadcast %490 : vector<4x1xf32> to vector<4x256xf32>
    %492 = vector.broadcast %488 : vector<1x256xf32> to vector<4x256xf32>
    %493 = arith.mulf %491, %492 : vector<4x256xf32>
    %494 = arith.addf %486, %493 : vector<4x256xf32>
    %c240_i32_214 = arith.constant 240 : i32
    %495 = tpu.dynamic_rotate %300 by %c240_i32_214 dim 1 : vector<1x256xf32>, i32 -> vector<1x256xf32>
    %496 = arith.mulf %495, %8 : vector<1x256xf32>
    %c30_215 = arith.constant 30 : index
    %c0_216 = arith.constant 0 : index
    %c0_217 = arith.constant 0 : index
    %497 = vector.load %arg5[%c30_215, %c0_216, %c0_217] : memref<36x4x1xf32, #tpu.memory_space<vmem>>, vector<1x4x1xf32>
    %498 = vector.shape_cast %497 : vector<1x4x1xf32> to vector<4x1xf32>
    %499 = vector.broadcast %498 : vector<4x1xf32> to vector<4x256xf32>
    %500 = vector.broadcast %496 : vector<1x256xf32> to vector<4x256xf32>
    %501 = arith.mulf %499, %500 : vector<4x256xf32>
    %502 = arith.addf %494, %501 : vector<4x256xf32>
    %c239_i32_218 = arith.constant 239 : i32
    %503 = tpu.dynamic_rotate %300 by %c239_i32_218 dim 1 : vector<1x256xf32>, i32 -> vector<1x256xf32>
    %504 = arith.mulf %503, %9 : vector<1x256xf32>
    %c34_219 = arith.constant 34 : index
    %c0_220 = arith.constant 0 : index
    %c0_221 = arith.constant 0 : index
    %505 = vector.load %arg5[%c34_219, %c0_220, %c0_221] : memref<36x4x1xf32, #tpu.memory_space<vmem>>, vector<1x4x1xf32>
    %506 = vector.shape_cast %505 : vector<1x4x1xf32> to vector<4x1xf32>
    %507 = vector.broadcast %506 : vector<4x1xf32> to vector<4x256xf32>
    %508 = vector.broadcast %504 : vector<1x256xf32> to vector<4x256xf32>
    %509 = arith.mulf %507, %508 : vector<4x256xf32>
    %510 = arith.addf %502, %509 : vector<4x256xf32>
    %c17_i32_222 = arith.constant 17 : i32
    %511 = tpu.dynamic_rotate %301 by %c17_i32_222 dim 1 : vector<1x256xf32>, i32 -> vector<1x256xf32>
    %512 = arith.mulf %511, %2 : vector<1x256xf32>
    %c3_223 = arith.constant 3 : index
    %c0_224 = arith.constant 0 : index
    %c0_225 = arith.constant 0 : index
    %513 = vector.load %arg5[%c3_223, %c0_224, %c0_225] : memref<36x4x1xf32, #tpu.memory_space<vmem>>, vector<1x4x1xf32>
    %514 = vector.shape_cast %513 : vector<1x4x1xf32> to vector<4x1xf32>
    %515 = vector.broadcast %514 : vector<4x1xf32> to vector<4x256xf32>
    %516 = vector.broadcast %512 : vector<1x256xf32> to vector<4x256xf32>
    %517 = arith.mulf %515, %516 : vector<4x256xf32>
    %518 = arith.addf %510, %517 : vector<4x256xf32>
    %c16_i32_226 = arith.constant 16 : i32
    %519 = tpu.dynamic_rotate %301 by %c16_i32_226 dim 1 : vector<1x256xf32>, i32 -> vector<1x256xf32>
    %520 = arith.mulf %519, %3 : vector<1x256xf32>
    %c7_227 = arith.constant 7 : index
    %c0_228 = arith.constant 0 : index
    %c0_229 = arith.constant 0 : index
    %521 = vector.load %arg5[%c7_227, %c0_228, %c0_229] : memref<36x4x1xf32, #tpu.memory_space<vmem>>, vector<1x4x1xf32>
    %522 = vector.shape_cast %521 : vector<1x4x1xf32> to vector<4x1xf32>
    %523 = vector.broadcast %522 : vector<4x1xf32> to vector<4x256xf32>
    %524 = vector.broadcast %520 : vector<1x256xf32> to vector<4x256xf32>
    %525 = arith.mulf %523, %524 : vector<4x256xf32>
    %526 = arith.addf %518, %525 : vector<4x256xf32>
    %c15_i32_230 = arith.constant 15 : i32
    %527 = tpu.dynamic_rotate %301 by %c15_i32_230 dim 1 : vector<1x256xf32>, i32 -> vector<1x256xf32>
    %528 = arith.mulf %527, %4 : vector<1x256xf32>
    %c11_231 = arith.constant 11 : index
    %c0_232 = arith.constant 0 : index
    %c0_233 = arith.constant 0 : index
    %529 = vector.load %arg5[%c11_231, %c0_232, %c0_233] : memref<36x4x1xf32, #tpu.memory_space<vmem>>, vector<1x4x1xf32>
    %530 = vector.shape_cast %529 : vector<1x4x1xf32> to vector<4x1xf32>
    %531 = vector.broadcast %530 : vector<4x1xf32> to vector<4x256xf32>
    %532 = vector.broadcast %528 : vector<1x256xf32> to vector<4x256xf32>
    %533 = arith.mulf %531, %532 : vector<4x256xf32>
    %534 = arith.addf %526, %533 : vector<4x256xf32>
    %c1_i32_234 = arith.constant 1 : i32
    %535 = tpu.dynamic_rotate %301 by %c1_i32_234 dim 1 : vector<1x256xf32>, i32 -> vector<1x256xf32>
    %536 = arith.mulf %535, %5 : vector<1x256xf32>
    %c15_235 = arith.constant 15 : index
    %c0_236 = arith.constant 0 : index
    %c0_237 = arith.constant 0 : index
    %537 = vector.load %arg5[%c15_235, %c0_236, %c0_237] : memref<36x4x1xf32, #tpu.memory_space<vmem>>, vector<1x4x1xf32>
    %538 = vector.shape_cast %537 : vector<1x4x1xf32> to vector<4x1xf32>
    %539 = vector.broadcast %538 : vector<4x1xf32> to vector<4x256xf32>
    %540 = vector.broadcast %536 : vector<1x256xf32> to vector<4x256xf32>
    %541 = arith.mulf %539, %540 : vector<4x256xf32>
    %542 = arith.addf %534, %541 : vector<4x256xf32>
    %c19_238 = arith.constant 19 : index
    %c0_239 = arith.constant 0 : index
    %c0_240 = arith.constant 0 : index
    %543 = vector.load %arg5[%c19_238, %c0_239, %c0_240] : memref<36x4x1xf32, #tpu.memory_space<vmem>>, vector<1x4x1xf32>
    %544 = vector.shape_cast %543 : vector<1x4x1xf32> to vector<4x1xf32>
    %545 = vector.broadcast %544 : vector<4x1xf32> to vector<4x256xf32>
    %546 = vector.broadcast %301 : vector<1x256xf32> to vector<4x256xf32>
    %547 = arith.mulf %545, %546 : vector<4x256xf32>
    %548 = arith.addf %542, %547 : vector<4x256xf32>
    %c255_i32_241 = arith.constant 255 : i32
    %549 = tpu.dynamic_rotate %301 by %c255_i32_241 dim 1 : vector<1x256xf32>, i32 -> vector<1x256xf32>
    %550 = arith.mulf %549, %6 : vector<1x256xf32>
    %c23_242 = arith.constant 23 : index
    %c0_243 = arith.constant 0 : index
    %c0_244 = arith.constant 0 : index
    %551 = vector.load %arg5[%c23_242, %c0_243, %c0_244] : memref<36x4x1xf32, #tpu.memory_space<vmem>>, vector<1x4x1xf32>
    %552 = vector.shape_cast %551 : vector<1x4x1xf32> to vector<4x1xf32>
    %553 = vector.broadcast %552 : vector<4x1xf32> to vector<4x256xf32>
    %554 = vector.broadcast %550 : vector<1x256xf32> to vector<4x256xf32>
    %555 = arith.mulf %553, %554 : vector<4x256xf32>
    %556 = arith.addf %548, %555 : vector<4x256xf32>
    %c241_i32_245 = arith.constant 241 : i32
    %557 = tpu.dynamic_rotate %301 by %c241_i32_245 dim 1 : vector<1x256xf32>, i32 -> vector<1x256xf32>
    %558 = arith.mulf %557, %7 : vector<1x256xf32>
    %c27_246 = arith.constant 27 : index
    %c0_247 = arith.constant 0 : index
    %c0_248 = arith.constant 0 : index
    %559 = vector.load %arg5[%c27_246, %c0_247, %c0_248] : memref<36x4x1xf32, #tpu.memory_space<vmem>>, vector<1x4x1xf32>
    %560 = vector.shape_cast %559 : vector<1x4x1xf32> to vector<4x1xf32>
    %561 = vector.broadcast %560 : vector<4x1xf32> to vector<4x256xf32>
    %562 = vector.broadcast %558 : vector<1x256xf32> to vector<4x256xf32>
    %563 = arith.mulf %561, %562 : vector<4x256xf32>
    %564 = arith.addf %556, %563 : vector<4x256xf32>
    %c240_i32_249 = arith.constant 240 : i32
    %565 = tpu.dynamic_rotate %301 by %c240_i32_249 dim 1 : vector<1x256xf32>, i32 -> vector<1x256xf32>
    %566 = arith.mulf %565, %8 : vector<1x256xf32>
    %c31_250 = arith.constant 31 : index
    %c0_251 = arith.constant 0 : index
    %c0_252 = arith.constant 0 : index
    %567 = vector.load %arg5[%c31_250, %c0_251, %c0_252] : memref<36x4x1xf32, #tpu.memory_space<vmem>>, vector<1x4x1xf32>
    %568 = vector.shape_cast %567 : vector<1x4x1xf32> to vector<4x1xf32>
    %569 = vector.broadcast %568 : vector<4x1xf32> to vector<4x256xf32>
    %570 = vector.broadcast %566 : vector<1x256xf32> to vector<4x256xf32>
    %571 = arith.mulf %569, %570 : vector<4x256xf32>
    %572 = arith.addf %564, %571 : vector<4x256xf32>
    %c239_i32_253 = arith.constant 239 : i32
    %573 = tpu.dynamic_rotate %301 by %c239_i32_253 dim 1 : vector<1x256xf32>, i32 -> vector<1x256xf32>
    %574 = arith.mulf %573, %9 : vector<1x256xf32>
    %c35_254 = arith.constant 35 : index
    %c0_255 = arith.constant 0 : index
    %c0_256 = arith.constant 0 : index
    %575 = vector.load %arg5[%c35_254, %c0_255, %c0_256] : memref<36x4x1xf32, #tpu.memory_space<vmem>>, vector<1x4x1xf32>
    %576 = vector.shape_cast %575 : vector<1x4x1xf32> to vector<4x1xf32>
    %577 = vector.broadcast %576 : vector<4x1xf32> to vector<4x256xf32>
    %578 = vector.broadcast %574 : vector<1x256xf32> to vector<4x256xf32>
    %579 = arith.mulf %577, %578 : vector<4x256xf32>
    %580 = arith.addf %572, %579 : vector<4x256xf32>
    %c0_257 = arith.constant 0 : index
    %c0_258 = arith.constant 0 : index
    %581 = vector.load %arg6[%c0_257, %c0_258] : memref<4x1xf32, #tpu.memory_space<vmem>>, vector<4x1xf32>
    %582 = vector.broadcast %581 : vector<4x1xf32> to vector<4x256xf32>
    %583 = arith.addf %580, %582 : vector<4x256xf32>
    %584 = arith.addf %583, %1 : vector<4x256xf32>
    %cst_259 = arith.constant 0.000000e+00 : f32
    %585 = vector.broadcast %cst_259 : f32 to vector<4x256xf32>
    %586 = arith.maximumf %584, %585 : vector<4x256xf32>
    %c0_260 = arith.constant 0 : index
    %c0_261 = arith.constant 0 : index
    %c0_262 = arith.constant 0 : index
    %587 = vector.load %arg7[%c0_260, %c0_261, %c0_262] : memref<1x4x256xf32, #tpu.memory_space<vmem>>, vector<1x4x256xf32>
    %588 = vector.shape_cast %587 : vector<1x4x256xf32> to vector<4x256xf32>
    %589 = vector.shape_cast %586 : vector<4x256xf32> to vector<1x4x256xf32>
    tpu.vector_store %arg7[%c0_260, %c0_261, %c0_262], %589 {strides = array<i32>} : memref<1x4x256xf32, #tpu.memory_space<vmem>>, vector<1x4x256xf32>,
    return
  }
  func.func @transform_0(%arg0: i32) -> (i32, i32) {
    %c0_i32 = arith.constant 0 : i32
    %c0_i32_0 = arith.constant 0 : i32
    %c0_i32_1 = arith.constant 0 : i32
    return %c0_i32, %c0_i32_0 : i32, i32
  }
  func.func @transform_1(%arg0: i32) -> (i32, i32, i32) {
    %c0_i32 = arith.constant 0 : i32
    %c0_i32_0 = arith.constant 0 : i32
    %c0_i32_1 = arith.constant 0 : i32
    return %arg0, %c0_i32, %c0_i32_0 : i32, i32, i32
  }
  func.func @transform_2(%arg0: i32) -> (i32, i32, i32) {
    %c0_i32 = arith.constant 0 : i32
    %c0_i32_0 = arith.constant 0 : i32
    %c0_i32_1 = arith.constant 0 : i32
    %c0_i32_2 = arith.constant 0 : i32
    return %c0_i32, %c0_i32_0, %c0_i32_1 : i32, i32, i32
  }
  func.func @transform_3(%arg0: i32) -> (i32, i32) {
    %c0_i32 = arith.constant 0 : i32
    %c0_i32_0 = arith.constant 0 : i32
    %c0_i32_1 = arith.constant 0 : i32
    return %c0_i32, %c0_i32_0 : i32, i32
  }
  func.func @transform_4(%arg0: i32) -> (i32, i32, i32) {
    %c0_i32 = arith.constant 0 : i32
    %c0_i32_0 = arith.constant 0 : i32
    %c0_i32_1 = arith.constant 0 : i32
    %c0_i32_2 = arith.constant 0 : i32
    return %c0_i32, %c0_i32_0, %c0_i32_1 : i32, i32, i32
  }
  func.func @transform_5(%arg0: i32) -> (i32, i32) {
    %c0_i32 = arith.constant 0 : i32
    %c0_i32_0 = arith.constant 0 : i32
    %c0_i32_1 = arith.constant 0 : i32
    return %c0_i32, %c0_i32_0 : i32, i32
  }
  func.func @transform_6(%arg0: i32) -> (i32, i32, i32) {
    %c0_i32 = arith.constant 0 : i32
    %c0_i32_0 = arith.constant 0 : i32
    %c0_i32_1 = arith.constant 0 : i32
    return %arg0, %c0_i32, %c0_i32_0 : i32, i32, i32
  }
}

</mosaic_0001>

<bundles_post_ra>
// kernel: tpu_custom_call.1
= control target key start
LH: loop header
LB: loop body
LE: loop exit
PB: predicated region body
PF: predicated region fallthrough
CT: control target
= control target key end

     0   :  { %11 = vsyncpa [#allocation3], 0  ;;  %s3979_s0 = inlined_call_operand.vmem [shape: f32[9,256], index: 0, kind: input, shape index: {}]   ;;  %s3980_s1 = inlined_call_operand.vmem [shape: f32[2,4,256], index: 1, kind: input, shape index: {}]   ;;  %s3981_s2 = inlined_call_operand.vmem [shape: f32[36,4,1], index: 2, kind: input, shape index: {}]   ;;  %s3982_s3 = inlined_call_operand.vmem [shape: f32[4,1], index: 3, kind: input, shape index: {}]   ;;  %s3983_s4 = inlined_call_operand.vmem [shape: f32[36,4,1], index: 4, kind: input, shape index: {}]   ;;  %s3984_s5 = inlined_call_operand.vmem [shape: f32[4,1], index: 5, kind: input, shape index: {}]   ;;  %s3985_s6 = inlined_call_operand.hbm [shape: f32[2,4,256], index: 6, kind: output, shape index: {}]  }
   0x1   :  { %13 = vsyncpa [#allocation3 + $0x1], 0  ;;  %s2646_s21 = smov 0   ;;  %s2648_s22 = smov 0  }
   0x2   :  { %s2650_s23 = smov 0   ;;  %s2652_s24 = smov 0  }
   0x3 LB: > { %s2667_s25 = sadd.s32 4294967295, %s2599_s24   ;;  %s2396_s26 = sadd.s32 4294967294, %s2599_s24   ;;  %s2599_s24 = sphi %s2652_s24, %s4006_s24   ;;  %s2595_s23 = sphi %s2650_s23, %s4005_s23   ;;  %s2591_s22 = sphi %s2648_s22, %s4004_s22   ;;  %s2587_s21 = sphi %s2646_s21, %s4003_s21  }
   0x4   : > { %s2671_s27 = sadd.s32 1, %s2599_s24   ;;  %s157_s28 = sadd.s32 1, %s2595_s23 }
   0x5   : > { %s154_s29 = ssub.s32 %s2599_s24, %s2671_s27  ;;  %p167_p0 = scmp.ne.s32.totalorder %s2595_s23, %s2591_s22 }
   0x6   : > { %p155_p1 = scmp.eq.s32.totalorder %s154_s29, 0  ;;  %p168_p2 = scmp.eq.s32.totalorder %s2667_s25, 1 }
   0x7   : > { %p173_p3 = scmp.ne.s32.totalorder %s2591_s22, %s2587_s21  ;;  %p174_p4 = scmp.eq.s32.totalorder %s2396_s26, 1 }
   0x8   : > { %s2682_s30 = scalar_select %p155_p1, %s2595_s23, %s157_s28  }
   0x9   : > { %p2684_p5 = por %p168_p2, %p167_p0  ;;  %p2688_p6 = por %p174_p4, %p173_p3 }
   0xa   : > { %p2399_p7 = scmp.ge.s32.totalorder %s2599_s24, 1  ;;  %p215_p8 = scmp.lt.s32.totalorder %s2599_s24, 3 }
   0xc   : > { %p216_p9 = pnand %p2399_p7, %p215_p8 }
   0xd   : > { %p245_p10 = scmp.lt.s32.totalorder (!%p216_p9), %s2667_s25, 1  ;;  %s3990_s18 = smov (!%p216_p9), 17  }
   0xe   : > { %219 = sbr.rel (%p216_p9) target bundleno = 706 (0x2c2), region = 44  ;;  %s3988_s19 = smov (!%p216_p9), 16  }
   0xf   : > { %s3986_s20 = smov (!%p216_p9), 15   ;;  %s3994_s26 = smov (!%p216_p9), 1  }
  0x10   : > { %s2606_s13 = smov (!%p216_p9), 127   ;;  %s2608_s9 = smov (!%p216_p9), 112  }
  0x11   : > { %s3992_s10 = smov (!%p216_p9), 111   ;;  %s3998_s15 = smov (!%p216_p9), 16  }
  0x12   : > { %s3999_s16 = smov (!%p216_p9), 15   ;;  %s4002_s12 = smov (!%p216_p9), 1  }
  0x13   : > { %v299_v0 = vld [vmem:[%s3981_s2] sm:$0xf]  ;;  %v267_v1 = vlaneseq  ;;  %v2601_v2 = vmov 0   ;;  %s246_s11 = scalar_select %p245_p10, %s2667_s25, 1  ;;  %v2410_v4 = vld [vmem:[%s3981_s2 + $0x10] sm:$0xf] }
  0x14   : > { %2535 = vset.pattern.permute.xlu1 %v2601_v2  ;;  %2536 = vset.pattern.permute.xlu0 %v2601_v2  ;;  %v2411_v10 = vld [vmem:[%s3981_s2 + $0x20] sm:$0xf]  ;;  %v2412_v12 = vld [vmem:[%s3981_s2 + $0x30] sm:$0xf]  ;;  %v2418_v21 = vld [vmem:[%s3981_s2 + $0x4] sm:$0xf] }
  0x15   : > { %302 = vperm.xlu1 %2535, %v299_v0   ;;  %v2700_v3 = vshrl.u32 %v267_v1, 7  ;;  %s2485_s14 = sshll.u32 %s246_s11, 3  ;;  %v2413_v11 = vld [vmem:[%s3981_s2 + $0x40] sm:$0xf]  ;;  %v2414_v13 = vld [vmem:[%s3981_s2 + $0x50] sm:$0xf] }
  0x16   : > { %s2711_s17 = scalar_lea.vmem %s3980_s1, %s2485_s14  ;;  %s2607_s14 = smov 113   ;;  %v2415_v14 = vld [vmem:[%s3981_s2 + $0x60] sm:$0xf]  ;;  %v2416_v15 = vld [vmem:[%s3981_s2 + $0x70] sm:$0xf]  ;;  %v2955_v63 = vand.u32 127, %v267_v1 }
  0x17   : > { %v2706_v5 = vsub.s32 0, %v2700_v3  ;;  %v273_v6 = vsub.s32 4, %v2700_v3  ;;  %v2715_v7 = vld [vmem:[%s2711_s17] sm:$0xff]  ;;  %v613_v16 = vsub.s32 5, %v2700_v3  ;;  %v2777_v18 = vsub.s32 1, %v2700_v3  ;;  %s2486_s11 = sshll.u32 %s2667_s25, 7 }
  0x18   : > { %v2417_v17 = vld [vmem:[%s3981_s2 + $0x80] sm:$0xf]  ;;  %v2419_v22 = vld [vmem:[%s3981_s2 + $0x14] sm:$0xf]  ;;  %v2420_v23 = vld [vmem:[%s3981_s2 + $0x24] sm:$0xf] }
  0x19   : > { %339 = vperm.xlu1 %2535, %v2410_v4   ;;  %v2719_v8 = vrot.slane %v2715_v7, %v2706_v5  ;;  %v2724_v9 = vrot.slane %v2715_v7, %v273_v6  ;;  %v2780_v19 = vrot.slane %v2715_v7, %v613_v16  ;;  %v2786_v20 = vrot.slane %v2715_v7, %v2777_v18  ;;  %v2421_v24 = vld [vmem:[%s3981_s2 + $0x34] sm:$0xf]  ;;  %v2422_v25 = vld [vmem:[%s3981_s2 + $0x44] sm:$0xf]  ;;  %v2427_v33 = vld [vmem:[%s3981_s2 + $0x8] sm:$0xf] }
  0x1a   : > { %v2423_v26 = vld [vmem:[%s3981_s2 + $0x54] sm:$0xf]  ;;  %v2424_v27 = vld [vmem:[%s3981_s2 + $0x64] sm:$0xf]  ;;  %v2839_v29 = vsub.s32 2, %v2700_v3  ;;  %v858_v31 = vsub.s32 6, %v2700_v3 }
  0x1b   : > { %277 = vrot.lane.b32.xlu0 %v2719_v8, %s3990_s18  ;;  %v2425_v28 = vld [vmem:[%s3981_s2 + $0x74] sm:$0xf]  ;;  %v2426_v32 = vld [vmem:[%s3981_s2 + $0x84] sm:$0xf]  ;;  %v2428_v35 = vld [vmem:[%s3981_s2 + $0x18] sm:$0xf] }
  0x1c   : > { %v2847_v30 = vrot.slane %v2715_v7, %v2839_v29  ;;  %v2861_v34 = vrot.slane %v2715_v7, %v858_v31  ;;  %v2429_v36 = vld [vmem:[%s3981_s2 + $0x28] sm:$0xf]  ;;  %v2430_v40 = vld [vmem:[%s3981_s2 + $0x38] sm:$0xf]  ;;  %v1103_v52 = vsub.s32 7, %v2700_v3  ;;  %v2931_v56 = vsub.s32 3, %v2700_v3 }
  0x1d   : > { %315 = vrot.lane.b32.xlu1 %v2719_v8, %s3988_s19  ;;  %v2431_v37 = vld [vmem:[%s3981_s2 + $0x48] sm:$0xf]  ;;  %v2432_v44 = vld [vmem:[%s3981_s2 + $0x58] sm:$0xf]  ;;  %v2436_v0 = vld [vmem:[%s3981_s2 + $0xc] sm:$0xf] }
  0x1e   : > { %v2433_v45 = vld [vmem:[%s3981_s2 + $0x68] sm:$0xf]  ;;  %v2434_v51 = vld [vmem:[%s3981_s2 + $0x78] sm:$0xf]  ;;  %v2934_v57 = vrot.slane %v2715_v7, %v1103_v52  ;;  %v2944_v60 = vrot.slane %v2715_v7, %v2931_v56  ;;  %v2437_v3 = vld [vmem:[%s3981_s2 + $0x1c] sm:$0xf]  ;;  %v446_v52 = vrot.slane %v2724_v9, %v2706_v5 }
  0x1f   : > { %279 = vrot.lane.b32.xlu0 %v2724_v9, %s3990_s18  ;;  %v2435_v53 = vld [vmem:[%s3981_s2 + $0x88] sm:$0xf]  ;;  %vm319_vm0 = vcmp.lt.s32.totalorder %v2955_v63, 16  ;;  %vm283_vm1 = vcmp.lt.s32.totalorder %v2955_v63, 17  ;;  %vm358_vm2 = vcmp.lt.s32.totalorder %v2955_v63, 15  ;;  %vm397_vm3 = vcmp.lt.s32.totalorder %v2955_v63, 1 }
  0x20   : > { %v2403_v2 = vld [vmem:[%s3979_s0 + $0x1] ss:$8 sm:$0x3]  ;;  %v251_v1 = vld [vmem:[%s3979_s0] ss:$8 sm:$0x3] }
  0x21   : > { %356 = vrot.lane.b32.xlu1 %v2724_v9, %s3986_s20  ;;  %v2978_v7 = vrot.slane %v2403_v2, %v2706_v5  ;;  %vm455_vm4 = vcmp.lt.s32.totalorder %v2955_v63, 127  ;;  %vm494_vm5 = vcmp.lt.s32.totalorder %v2955_v63, 113  ;;  %vm533_vm6 = vcmp.lt.s32.totalorder %v2955_v63, 112  ;;  %s2610_s28 = smov [#allocation2]  }
  0x22   : > { %vm572_vm7 = vcmp.lt.s32.totalorder %v2955_v63, 111 }
  0x23   : > { %317 = vrot.lane.b32.xlu0 %v2724_v9, %s3988_s19 }
  0x25   : > { %393 = vrot.lane.b32.xlu1 %v2719_v8, %s3994_s26 }
  0x27   : > { %354 = vrot.lane.b32.xlu0 %v2719_v8, %s3986_s20 }
  0x29   : > { %395 = vrot.lane.b32.xlu1 %v2724_v9, %s3994_s26 }
  0x2b   : > { %378 = vperm.xlu0 %2536, %v2411_v10   ;;  %v2981_v10 = vrot.slane %v2403_v2, %v2777_v18 }
  0x2d   : > { %436 = vperm.xlu1 %2535, %v2413_v11  }
  0x2f   : > { %417 = vperm.xlu0 %2536, %v2412_v12  }
  0x31   : > { %453 = vrot.lane.b32.xlu1 %v2724_v9, %s2606_s13 }
  0x33   : > { %451 = vrot.lane.b32.xlu0 %v2719_v8, %s2606_s13 }
  0x35   : > { %490 = vrot.lane.b32.xlu1 %v2719_v8, %s2607_s14 }
  0x37   : > { %475 = vperm.xlu0 %2536, %v2414_v13   ;;  %v2988_v13 = vrot.slane %v251_v1, %v2706_v5 }
  0x39   : > { %514 = vperm.xlu1 %2535, %v2415_v14   ;;  %v2991_v14 = vrot.slane %v251_v1, %v2777_v18 }
  0x3b   : > { %492 = vrot.lane.b32.xlu0 %v2724_v9, %s2607_s14 }
  0x3d   : > { %531 = vrot.lane.b32.xlu1 %v2724_v9, %s2608_s9 }
  0x3f   : > { %529 = vrot.lane.b32.xlu0 %v2719_v8, %s2608_s9 }
  0x41   : > { %568 = vrot.lane.b32.xlu1 %v2719_v8, %s3992_s10 }
  0x43   : > { %553 = vperm.xlu0 %2536, %v2416_v15   ;;  %v2404_v15 = vld [vmem:[%s3979_s0 + $0x2] ss:$8 sm:$0x3] }
  0x45   : > { %592 = vperm.xlu1 %2535, %v2417_v17  }
  0x47   : > { %570 = vrot.lane.b32.xlu0 %v2724_v9, %s3992_s10 }
  0x49   : > { %619 = vrot.lane.b32.xlu1 %v2780_v19, %s3990_s18 }
  0x4b   : > { %617 = vrot.lane.b32.xlu0 %v2786_v20, %s3990_s18 }
  0x4d   : > { %644 = vrot.lane.b32.xlu1 %v2786_v20, %s3988_s19 }
  0x4f   : > { %629 = vperm.xlu0 %2536, %v2418_v21  }
  0x51   : > { %656 = vperm.xlu1 %2535, %v2419_v22  }
  0x53   : > { %646 = vrot.lane.b32.xlu0 %v2780_v19, %s3988_s19 }
  0x55   : > { %673 = vrot.lane.b32.xlu1 %v2780_v19, %s3986_s20 }
  0x57   : > { %671 = vrot.lane.b32.xlu0 %v2786_v20, %s3986_s20  ;;  %s4001_s20 = smov 17  }
  0x59   : > { %698 = vrot.lane.b32.xlu1 %v2786_v20, %s3994_s26 }
  0x5b   : > { %683 = vperm.xlu0 %2536, %v2420_v23  }
  0x5d   : > { %710 = vperm.xlu1 %2535, %v2421_v24  }
  0x5f   : > { %700 = vrot.lane.b32.xlu0 %v2780_v19, %s3994_s26 }
  0x61   : > { %744 = vrot.lane.b32.xlu1 %v2786_v20, %s2606_s13 }
  0x63   : > { %729 = vperm.xlu0 %2536, %v2422_v25   ;;  %v2405_v25 = vld [vmem:[%s3979_s0 + $0x3] ss:$8 sm:$0x3] }
  0x65   : > { %756 = vperm.xlu1 %2535, %v2423_v26   ;;  %v3015_v26 = vrot.slane %v2404_v15, %v2706_v5 }
  0x67   : > { %746 = vrot.lane.b32.xlu0 %v2780_v19, %s2606_s13 }
  0x69   : > { %773 = vrot.lane.b32.xlu1 %v2780_v19, %s2607_s14 }
  0x6b   : > { %771 = vrot.lane.b32.xlu0 %v2786_v20, %s2607_s14 }
  0x6d   : > { %798 = vrot.lane.b32.xlu1 %v2786_v20, %s2608_s9 }
  0x6f   : > { %783 = vperm.xlu0 %2536, %v2424_v27   ;;  %v3018_v27 = vrot.slane %v2404_v15, %v2777_v18 }
  0x71   : > { %810 = vperm.xlu1 %2535, %v2425_v28  }
  0x73   : > { %800 = vrot.lane.b32.xlu0 %v2780_v19, %s2608_s9 }
  0x75   : > { %827 = vrot.lane.b32.xlu1 %v2780_v19, %s3992_s10 }
  0x77   : > { %825 = vrot.lane.b32.xlu0 %v2786_v20, %s3992_s10 }
  0x79   : > { %862 = vrot.lane.b32.xlu1 %v2847_v30, %s3990_s18 }
  0x7b   : > { %837 = vperm.xlu0 %2536, %v2426_v32  }
  0x7d   : > { %874 = vperm.xlu1 %2535, %v2427_v33  }
  0x7f   : > { %864 = vrot.lane.b32.xlu0 %v2861_v34, %s3990_s18 }
  0x81   : > { %891 = vrot.lane.b32.xlu1 %v2861_v34, %s3998_s15 }
  0x83   : > { %889 = vrot.lane.b32.xlu0 %v2847_v30, %s3998_s15 }
  0x85   : > { %916 = vrot.lane.b32.xlu1 %v2847_v30, %s3999_s16 }
  0x87   : > { %901 = vperm.xlu0 %2536, %v2428_v35  }
  0x89   : > { %928 = vperm.xlu1 %2535, %v2429_v36   ;;  %v3032_v36 = vrot.slane %v2405_v25, %v2706_v5 }
  0x8b   : > { %918 = vrot.lane.b32.xlu0 %v2861_v34, %s3999_s16 }
  0x8d   : > { %945 = vrot.lane.b32.xlu1 %v2861_v34, %s3994_s26  ;;  %v278_v39 = vpop.permute.xlu0 %277 }
  0x8f   : > { %943 = vrot.lane.b32.xlu0 %v2847_v30, %s3994_s26 }
  0x90   : > { %v2884_v38 = vpop.permute.xlu1 %302 }
  0x91   : > { %974 = vperm.xlu1 %2535, %v2431_v37   ;;  %v280_v42 = vpop.permute.xlu0 %279  ;;  %v3035_v37 = vrot.slane %v2405_v25, %v2777_v18 }
  0x92   : > { %v284_v17 = vsel %vm283_vm1, %v278_v39, %v280_v42  ;;  %v285_v21 = vsel %vm283_vm1, %v280_v42, %v278_v39 }
  0x93   : > { %955 = vperm.xlu0 %2536, %v2430_v40   ;;  %v297_v28 = vmul.f32 %v2988_v13, %v285_v21  ;;  %v298_v31 = vmul.f32 %v2991_v14, %v284_v17 }
  0x94   : > { %v2891_v41 = vpop.permute.xlu1 %339 }
  0x95   : > { %991 = vrot.lane.b32.xlu1 %v2861_v34, %s2606_s13  ;;  %v318_v47 = vpop.permute.xlu0 %317 }
  0x97   : > { %989 = vrot.lane.b32.xlu0 %v2847_v30, %s2606_s13 }
  0x98   : > { %v316_v43 = vpop.permute.xlu1 %315 }
  0x99   : > { %1016 = vrot.lane.b32.xlu1 %v2847_v30, %s2607_s14  ;;  %v355_v49 = vpop.permute.xlu0 %354  ;;  %v320_v11 = vsel %vm319_vm0, %v316_v43, %v318_v47  ;;  %v321_v12 = vsel %vm319_vm0, %v318_v47, %v316_v43 }
  0x9a   : > { %v333_v23 = vmul.f32 %v2978_v7, %v321_v12  ;;  %v334_v24 = vmul.f32 %v2981_v10, %v320_v11  ;;  %v2407_v11 = vld [vmem:[%s3979_s0 + $0x6] ss:$8 sm:$0x3] }
  0x9b   : > { %1001 = vperm.xlu0 %2536, %v2432_v44  }
  0x9c   : > { %v2905_v46 = vpop.permute.xlu1 %356  ;;  %v345_v40 = vrot.slane %v333_v23, %v2706_v5  ;;  %v349_v42 = vrot.slane %v334_v24, %v2706_v5 }
  0x9d   : > { %1028 = vperm.xlu1 %2535, %v2433_v45   ;;  %v359_v32 = vsel %vm358_vm2, %v355_v49, %v2905_v46  ;;  %v360_v33 = vsel %vm358_vm2, %v2905_v46, %v355_v49  ;;  %v2406_v45 = vld [vmem:[%s3979_s0 + $0x5] ss:$8 sm:$0x3] }
  0x9e   : > { %v2438_v46 = vld [vmem:[%s3981_s2 + $0x2c] sm:$0xf]  ;;  %v372_v47 = vmul.f32 %v3015_v26, %v360_v33  ;;  %v373_v49 = vmul.f32 %v3018_v27, %v359_v32  ;;  %v3076_v1 = vrot.slane %v2406_v45, %v2706_v5  ;;  %v350_v15 = vmul.f32 %v345_v40, %v2891_v41 }
  0x9f   : > { %1018 = vrot.lane.b32.xlu0 %v2861_v34, %s2607_s14  ;;  %v351_v17 = vmul.f32 %v349_v42, %v2891_v41  ;;  %v3086_v21 = vrot.slane %v2406_v45, %v2777_v18  ;;  %v3105_v33 = vrot.slane %v2407_v11, %v2706_v5  ;;  %v3108_v40 = vrot.slane %v2407_v11, %v2777_v18 }
  0xa0   : > { %v2907_v48 = vpop.permute.xlu1 %393  ;;  %v384_v23 = vrot.slane %v372_v47, %v2706_v5  ;;  %v388_v24 = vrot.slane %v373_v49, %v2706_v5 }
  0xa1   : > { %1045 = vrot.lane.b32.xlu1 %v2861_v34, %s2608_s9 }
  0xa3   : > { %1043 = vrot.lane.b32.xlu0 %v2847_v30, %s2608_s9 }
  0xa4   : > { %v2913_v50 = vpop.permute.xlu1 %395 }
  0xa5   : > { %1070 = vrot.lane.b32.xlu1 %v2847_v30, %s3992_s10  ;;  %v398_v43 = vsel %vm397_vm3, %v2907_v48, %v2913_v50  ;;  %v399_v44 = vsel %vm397_vm3, %v2913_v50, %v2907_v48  ;;  %v308_v48 = vrot.slane %v297_v28, %v2706_v5  ;;  %v312_v50 = vrot.slane %v298_v31, %v2706_v5  ;;  %v2408_v28 = vld [vmem:[%s3979_s0 + $0x7] ss:$8 sm:$0x3] }
  0xa6   : > { %v2926_v54 = vpop.permute.xlu0 %378  ;;  %v412_v2 = vmul.f32 %v3035_v37, %v398_v43  ;;  %v3120_v47 = vrot.slane %v2408_v28, %v2706_v5 }
  0xa7   : > { %1055 = vperm.xlu0 %2536, %v2434_v51   ;;  %v2439_v51 = vld [vmem:[%s3981_s2 + $0x3c] sm:$0xf]  ;;  %v313_v31 = vmul.f32 %v308_v48, %v2884_v38  ;;  %v314_v32 = vmul.f32 %v312_v50, %v2884_v38  ;;  %v389_v43 = vmul.f32 %v384_v23, %v2926_v54 }
  0xa8   : > { %v2928_v55 = vpop.permute.xlu1 %436 }
  0xa9   : > { %1082 = vperm.xlu1 %2535, %v2435_v53   ;;  %v352_v49 = vadd.f32 %v350_v15, %v313_v31 }
  0xaa   : > { %v2936_v58 = vpop.permute.xlu0 %417 }
  0xab   : > { %1072 = vrot.lane.b32.xlu0 %v2861_v34, %s3992_s10  ;;  %v391_v23 = vadd.f32 %v389_v43, %v352_v49 }
  0xac   : > { %v2938_v59 = vpop.permute.xlu1 %453 }
  0xad   : > { %1109 = vrot.lane.b32.xlu1 %v2934_v57, %s3990_s18 }
  0xae   : > { %v2948_v61 = vpop.permute.xlu0 %451 }
  0xaf   : > { %1107 = vrot.lane.b32.xlu0 %v2944_v60, %s3990_s18  ;;  %v456_v25 = vsel %vm455_vm4, %v2948_v61, %v2938_v59  ;;  %v457_v41 = vsel %vm455_vm4, %v2938_v59, %v2948_v61  ;;  %v427_v61 = vrot.slane %v412_v2, %v2706_v5  ;;  %v2441_v2 = vld [vmem:[%s3981_s2 + $0x5c] sm:$0xf]  ;;  %s4000_s18 = smov 111  }
  0xb0   : > { %v2950_v62 = vpop.permute.xlu1 %490  ;;  %v469_v38 = vmul.f32 %v3076_v1, %v456_v25 }
  0xb1   : > { %1134 = vrot.lane.b32.xlu1 %v2944_v60, %s3998_s15  ;;  %v429_v50 = vmul.f32 %v427_v61, %v2936_v58 }
  0xb2   : > { %v2969_v4 = vpop.permute.xlu0 %475 }
  0xb3   : > { %1119 = vperm.xlu0 %2536, %v2436_v0   ;;  %v411_v0 = vmul.f32 %v3032_v36, %v399_v44  ;;  %v390_v44 = vmul.f32 %v388_v24, %v2926_v54  ;;  %v2440_v54 = vld [vmem:[%s3981_s2 + $0x4c] sm:$0xf] }
  0xb4   : > { %v2974_v6 = vpop.permute.xlu1 %514 }
  0xb5   : > { %1146 = vperm.xlu1 %2535, %v2437_v3   ;;  %v442_v3 = vrot.slane %v2719_v8, %v2706_v5  ;;  %v423_v59 = vrot.slane %v411_v0, %v2706_v5  ;;  %v2409_v0 = vld [vmem:[%s3979_s0 + $0x10] ss:$8 sm:$0x3] }
  0xb6   : > { %v2996_v16 = vpop.permute.xlu0 %492 }
  0xb7   : > { %1136 = vrot.lane.b32.xlu0 %v2934_v57, %s3998_s15  ;;  %v428_v48 = vmul.f32 %v423_v59, %v2936_v58  ;;  %v495_v11 = vsel %vm494_vm5, %v2950_v62, %v2996_v16  ;;  %v496_v15 = vsel %vm494_vm5, %v2996_v16, %v2950_v62  ;;  %v3144_v58 = vrot.slane %v2408_v28, %v2777_v18 }
  0xb8   : > { %v3003_v22 = vpop.permute.xlu1 %531  ;;  %v481_v62 = vrot.slane %v469_v38, %v2706_v5  ;;  %v3158_v28 = vrot.slane %v2409_v0, %v2706_v5  ;;  %v508_v59 = vmul.f32 %v3105_v33, %v495_v11  ;;  %v509_v61 = vmul.f32 %v3108_v40, %v496_v15 }
  0xb9   : > { %1163 = vrot.lane.b32.xlu1 %v2934_v57, %s3999_s16  ;;  %v430_v43 = vadd.f32 %v428_v48, %v391_v23  ;;  %v447_v49 = vmul.f32 %v442_v3, %v2928_v55 }
  0xba   : > { %v3029_v35 = vpop.permute.xlu0 %529  ;;  %v520_v9 = vrot.slane %v508_v59, %v2706_v5 }
  0xbb   : > { %1161 = vrot.lane.b32.xlu0 %v2944_v60, %s3999_s16  ;;  %v534_v25 = vsel %vm533_vm6, %v3029_v35, %v3003_v22 }
  0xbc   : > { %v3037_v39 = vpop.permute.xlu1 %568 }
  0xbd   : > { %1188 = vrot.lane.b32.xlu1 %v2944_v60, %s3994_s26 }
  0xbe   : > { %v3069_v53 = vpop.permute.xlu0 %553 }
  0xbf   : > { %1173 = vperm.xlu0 %2536, %v2438_v46   ;;  %v470_v46 = vmul.f32 %v3086_v21, %v457_v41  ;;  %v535_v41 = vsel %vm533_vm6, %v3003_v22, %v3029_v35  ;;  %v547_v22 = vmul.f32 %v3120_v47, %v534_v25 }
  0xc0   : > { %v3081_v12 = vpop.permute.xlu1 %592  ;;  %v548_v35 = vmul.f32 %v3144_v58, %v535_v41 }
  0xc1   : > { %1200 = vperm.xlu1 %2535, %v2439_v51   ;;  %v353_v51 = vadd.f32 %v351_v17, %v314_v32  ;;  %v485_v16 = vrot.slane %v470_v46, %v2706_v5  ;;  %v3161_v32 = vrot.slane %v2409_v0, %v2777_v18 }
  0xc2   : > { %v571_v42 = vpop.permute.xlu0 %570  ;;  %v563_v11 = vrot.slane %v548_v35, %v2706_v5 }
  0xc3   : > { %1190 = vrot.lane.b32.xlu0 %v2934_v57, %s3994_s26  ;;  %v392_v24 = vadd.f32 %v390_v44, %v353_v51  ;;  %v573_v38 = vsel %vm572_vm7, %v3037_v39, %v571_v42  ;;  %v574_v46 = vsel %vm572_vm7, %v571_v42, %v3037_v39  ;;  %v448_v51 = vmul.f32 %v446_v52, %v2928_v55 }
  0xc4   : > { %v620_v45 = vpop.permute.xlu1 %619  ;;  %v487_v39 = vmul.f32 %v485_v16, %v2969_v4  ;;  %v524_v55 = vrot.slane %v509_v61, %v2706_v5  ;;  %v586_v52 = vmul.f32 %v3158_v28, %v573_v38  ;;  %v587_v3 = vmul.f32 %v3161_v32, %v574_v46  ;;  %v2442_v16 = vld [vmem:[%s3981_s2 + $0x6c] sm:$0xf]  ;;  %v2443_v61 = vld [vmem:[%s3981_s2 + $0x7c] sm:$0xf] }
  0xc5   : > { %1234 = vrot.lane.b32.xlu1 %v2944_v60, %s2606_s13  ;;  %v431_v44 = vadd.f32 %v429_v50, %v392_v24  ;;  %v486_v50 = vmul.f32 %v481_v62, %v2969_v4  ;;  %v559_v4 = vrot.slane %v547_v22, %v2706_v5  ;;  %v565_v35 = vmul.f32 %v563_v11, %v3069_v53 }
  0xc6   : > { %v618_v17 = vpop.permute.xlu0 %617  ;;  %v598_v59 = vrot.slane %v586_v52, %v2706_v5 }
  0xc7   : > { %1219 = vperm.xlu0 %2536, %v2440_v54   ;;  %v621_v42 = vsel %vm283_vm1, %v618_v17, %v620_v45  ;;  %v622_v8 = vsel %vm283_vm1, %v620_v45, %v618_v17  ;;  %v450_v0 = vadd.f32 %v448_v51, %v431_v44  ;;  %v526_v44 = vmul.f32 %v524_v55, %v2974_v6 }
  0xc8   : > { %v645_v31 = vpop.permute.xlu1 %644  ;;  %v623_v45 = vmul.f32 %v622_v8, %v2988_v13  ;;  %v624_v17 = vmul.f32 %v621_v42, %v2991_v14  ;;  %v564_v22 = vmul.f32 %v559_v4, %v3069_v53  ;;  %v603_v52 = vmul.f32 %v598_v59, %v3081_v12 }
  0xc9   : > { %1246 = vperm.xlu1 %2535, %v2441_v2   ;;  %v449_v2 = vadd.f32 %v447_v49, %v430_v43  ;;  %v489_v62 = vadd.f32 %v487_v39, %v450_v0  ;;  %v525_v43 = vmul.f32 %v520_v9, %v2974_v6 }
  0xca   : > { %v630_v54 = vpop.permute.xlu0 %629  ;;  %v635_v51 = vrot.slane %v623_v45, %v2706_v5  ;;  %v639_v6 = vrot.slane %v624_v17, %v2706_v5 }
  0xcb   : > { %1236 = vrot.lane.b32.xlu0 %v2934_v57, %s2606_s13  ;;  %v488_v41 = vadd.f32 %v486_v50, %v449_v2  ;;  %v528_v9 = vadd.f32 %v526_v44, %v489_v62  ;;  %v1342_v62 = vld [vmem:[%s3982_s3] sm:$0xf] }
  0xcc   : > { %v3181_v48 = vpop.permute.xlu1 %656  ;;  %v640_v45 = vmul.f32 %v635_v51, %v630_v54  ;;  %v641_v17 = vmul.f32 %v639_v6, %v630_v54  ;;  %v735_v51 = vrot.slane %v2786_v20, %v2777_v18  ;;  %v739_v6 = vrot.slane %v2780_v19, %v2777_v18 }
  0xcd   : > { %1263 = vrot.lane.b32.xlu1 %v2934_v57, %s2607_s14  ;;  %v527_v55 = vadd.f32 %v525_v43, %v488_v41 }
  0xce   : > { %v647_v15 = vpop.permute.xlu0 %646 }
  0xcf   : > { %v648_v23 = vsel %vm319_vm0, %v645_v31, %v647_v15  ;;  %v649_v24 = vsel %vm319_vm0, %v647_v15, %v645_v31  ;;  %1261 = vrot.lane.b32.xlu0 %v2944_v60, %s2607_s14  ;;  %v602_v31 = vrot.slane %v587_v3, %v2706_v5  ;;  %v566_v11 = vadd.f32 %v564_v22, %v527_v55 }
  0xd0   : > { %v674_v25 = vpop.permute.xlu1 %673  ;;  %v650_v38 = vmul.f32 %v649_v24, %v2978_v7  ;;  %v651_v46 = vmul.f32 %v648_v23, %v2981_v10  ;;  %v567_v15 = vadd.f32 %v565_v35, %v528_v9 }
  0xd1   : > { %1288 = vrot.lane.b32.xlu1 %v2944_v60, %s2608_s9  ;;  %v604_v3 = vmul.f32 %v602_v31, %v3081_v12  ;;  %v605_v41 = vadd.f32 %v603_v52, %v566_v11 }
  0xd2   : > { %v672_v49 = vpop.permute.xlu0 %671  ;;  %v662_v0 = vrot.slane %v650_v38, %v2706_v5  ;;  %v666_v2 = vrot.slane %v651_v46, %v2706_v5 }
  0xd3   : > { %v675_v50 = vsel %vm358_vm2, %v672_v49, %v674_v25  ;;  %v676_v39 = vsel %vm358_vm2, %v674_v25, %v672_v49  ;;  %1273 = vperm.xlu0 %2536, %v2442_v16   ;;  %v606_v12 = vadd.f32 %v604_v3, %v567_v15  ;;  %v642_v44 = vadd.f32 %v640_v45, %v605_v41 }
  0xd4   : > { %v699_v42 = vpop.permute.xlu1 %698  ;;  %v677_v8 = vmul.f32 %v676_v39, %v3015_v26  ;;  %v678_v53 = vmul.f32 %v675_v50, %v3018_v27  ;;  %v667_v16 = vmul.f32 %v662_v0, %v3181_v48  ;;  %v668_v54 = vmul.f32 %v666_v2, %v3181_v48  ;;  %v2444_v48 = vld [vmem:[%s3981_s2 + $0x8c] sm:$0xf] }
  0xd5   : > { %1300 = vperm.xlu1 %2535, %v2443_v61   ;;  %v643_v59 = vadd.f32 %v641_v17, %v606_v12 }
  0xd6   : > { %v684_v4 = vpop.permute.xlu0 %683  ;;  %v689_v24 = vrot.slane %v677_v8, %v2706_v5  ;;  %v693_v25 = vrot.slane %v678_v53, %v2706_v5  ;;  %v669_v39 = vadd.f32 %v667_v16, %v642_v44 }
  0xd7   : > { %1290 = vrot.lane.b32.xlu0 %v2934_v57, %s2608_s9  ;;  %v670_v50 = vadd.f32 %v668_v54, %v643_v59 }
  0xd8   : > { %v711_v23 = vpop.permute.xlu1 %710  ;;  %v694_v35 = vmul.f32 %v689_v24, %v684_v4  ;;  %v695_v38 = vmul.f32 %v693_v25, %v684_v4 }
  0xd9   : > { %1317 = vrot.lane.b32.xlu1 %v2934_v57, %s4000_s18 }
  0xda   : > { %v701_v43 = vpop.permute.xlu0 %700  ;;  %v696_v55 = vadd.f32 %v694_v35, %v669_v39  ;;  %v697_v52 = vadd.f32 %v695_v38, %v670_v50 }
  0xdb   : > { %v702_v31 = vsel %vm397_vm3, %v699_v42, %v701_v43  ;;  %v703_v61 = vsel %vm397_vm3, %v701_v43, %v699_v42  ;;  %1315 = vrot.lane.b32.xlu0 %v2944_v60, %s4000_s18 }
  0xdc   : > { %v745_v22 = vpop.permute.xlu1 %744  ;;  %v704_v46 = vmul.f32 %v703_v61, %v3032_v36  ;;  %v705_v49 = vmul.f32 %v702_v31, %v3035_v37 }
  0xdd   : > { %1345 = vperm.xlu1 %2535, %v1342_v62  }
  0xde   : > { %v716_v42 = vrot.slane %v704_v46, %v2706_v5  ;;  %v720_v8 = vrot.slane %v705_v49, %v2706_v5  ;;  %v730_v53 = vpop.permute.xlu0 %729 }
  0xdf   : > { %1327 = vperm.xlu0 %2536, %v2444_v48   ;;  %v740_v11 = vmul.f32 %v735_v51, %v730_v53  ;;  %v741_v20 = vmul.f32 %v739_v6, %v730_v53 }
  0xe0   : > { %v757_v9 = vpop.permute.xlu1 %756  ;;  %v721_v3 = vmul.f32 %v716_v42, %v711_v23  ;;  %v722_v0 = vmul.f32 %v720_v8, %v711_v23 }
  0xe2   : > { %v724_v2 = vadd.f32 %v722_v0, %v697_v52  ;;  %v723_v4 = vadd.f32 %v721_v3, %v696_v55  ;;  %v747_v15 = vpop.permute.xlu0 %746 }
  0xe3   : > { %v748_v54 = vsel %vm455_vm4, %v745_v22, %v747_v15  ;;  %v749_v23 = vsel %vm455_vm4, %v747_v15, %v745_v22 }
  0xe4   : > { %v774_v45 = vpop.permute.xlu1 %773  ;;  %v742_v19 = vadd.f32 %v740_v11, %v723_v4  ;;  %v743_v17 = vadd.f32 %v741_v20, %v724_v2  ;;  %v750_v59 = vmul.f32 %v748_v54, %v3076_v1  ;;  %v751_v31 = vmul.f32 %v749_v23, %v3086_v21 }
  0xe6   : > { %v772_v24 = vpop.permute.xlu0 %771  ;;  %v762_v6 = vrot.slane %v750_v59, %v2706_v5  ;;  %v766_v50 = vrot.slane %v751_v31, %v2706_v5 }
  0xe7   : > { %v775_v61 = vsel %vm494_vm5, %v772_v24, %v774_v45  ;;  %v776_v35 = vsel %vm494_vm5, %v774_v45, %v772_v24 }
  0xe8   : > { %v799_v25 = vpop.permute.xlu1 %798  ;;  %v777_v48 = vmul.f32 %v775_v61, %v3105_v33  ;;  %v778_v51 = vmul.f32 %v776_v35, %v3108_v40  ;;  %v767_v11 = vmul.f32 %v762_v6, %v757_v9  ;;  %v768_v20 = vmul.f32 %v766_v50, %v757_v9 }
  0xea   : > { %v784_v12 = vpop.permute.xlu0 %783  ;;  %v789_v3 = vrot.slane %v777_v48, %v2706_v5  ;;  %v793_v0 = vrot.slane %v778_v51, %v2706_v5  ;;  %v770_v31 = vadd.f32 %v768_v20, %v743_v17  ;;  %v769_v61 = vadd.f32 %v767_v11, %v742_v19 }
  0xec   : > { %v811_v41 = vpop.permute.xlu1 %810  ;;  %v795_v59 = vmul.f32 %v793_v0, %v784_v12 }
  0xee   : > { %v801_v62 = vpop.permute.xlu0 %800 }
  0xef   : > { %v802_v46 = vsel %vm533_vm6, %v799_v25, %v801_v62  ;;  %v803_v49 = vsel %vm533_vm6, %v801_v62, %v799_v25 }
  0xf0   : > { %v828_v16 = vpop.permute.xlu1 %827  ;;  %v804_v39 = vmul.f32 %v802_v46, %v3120_v47  ;;  %v805_v42 = vmul.f32 %v803_v49, %v3144_v58 }
  0xf2   : > { %v826_v43 = vpop.permute.xlu0 %825  ;;  %v816_v24 = vrot.slane %v804_v39, %v2706_v5  ;;  %v820_v25 = vrot.slane %v805_v42, %v2706_v5 }
  0xf3   : > { %v829_v8 = vsel %vm572_vm7, %v826_v43, %v828_v16  ;;  %v830_v53 = vsel %vm572_vm7, %v828_v16, %v826_v43 }
  0xf4   : > { %v863_v44 = vpop.permute.xlu1 %862  ;;  %v831_v15 = vmul.f32 %v829_v8, %v3158_v28  ;;  %v832_v45 = vmul.f32 %v830_v53, %v3161_v32  ;;  %v821_v49 = vmul.f32 %v816_v24, %v811_v41  ;;  %v822_v48 = vmul.f32 %v820_v25, %v811_v41 }
  0xf6   : > { %v838_v38 = vpop.permute.xlu0 %837  ;;  %v843_v35 = vrot.slane %v831_v15, %v2706_v5  ;;  %v847_v46 = vrot.slane %v832_v45, %v2706_v5 }
  0xf8   : > { %v875_v22 = vpop.permute.xlu1 %874  ;;  %v848_v17 = vmul.f32 %v843_v35, %v838_v38  ;;  %v849_v19 = vmul.f32 %v847_v46, %v838_v38 }
  0xfa   : > { %v865_v55 = vpop.permute.xlu0 %864 }
  0xfb   : > { %v866_v2 = vsel %vm283_vm1, %v863_v44, %v865_v55  ;;  %v867_v4 = vsel %vm283_vm1, %v865_v55, %v863_v44  ;;  %v794_v44 = vmul.f32 %v789_v3, %v784_v12  ;;  %v797_v12 = vadd.f32 %v795_v59, %v770_v31 }
  0xfc   : > { %v892_v52 = vpop.permute.xlu1 %891  ;;  %v868_v16 = vmul.f32 %v867_v4, %v2988_v13  ;;  %v869_v54 = vmul.f32 %v866_v2, %v2991_v14 }
  0xfd   : > { %v796_v53 = vadd.f32 %v794_v44, %v769_v61  ;;  %v824_v55 = vadd.f32 %v822_v48, %v797_v12  ;;  %v980_v48 = vrot.slane %v2847_v30, %v2839_v29 }
  0xfe   : > { %v890_v62 = vpop.permute.xlu0 %889  ;;  %v880_v39 = vrot.slane %v868_v16, %v2706_v5  ;;  %v884_v42 = vrot.slane %v869_v54, %v2706_v5 }
  0xff   : > { %v893_v23 = vsel %vm319_vm0, %v890_v62, %v892_v52  ;;  %v894_v43 = vsel %vm319_vm0, %v892_v52, %v890_v62  ;;  %v823_v52 = vadd.f32 %v821_v49, %v796_v53  ;;  %v851_v25 = vadd.f32 %v849_v19, %v824_v55 }
 0x100   : > { %v917_v9 = vpop.permute.xlu1 %916  ;;  %v895_v51 = vmul.f32 %v894_v43, %v2978_v7  ;;  %v896_v6 = vmul.f32 %v893_v23, %v2981_v10  ;;  %v885_v2 = vmul.f32 %v880_v39, %v875_v22  ;;  %v886_v4 = vmul.f32 %v884_v42, %v875_v22 }
 0x101   : > { %v850_v24 = vadd.f32 %v848_v17, %v823_v52 }
 0x102   : > { %v902_v50 = vpop.permute.xlu0 %901  ;;  %v907_v3 = vrot.slane %v895_v51, %v2706_v5  ;;  %v911_v41 = vrot.slane %v896_v6, %v2706_v5  ;;  %v888_v43 = vadd.f32 %v886_v4, %v851_v25  ;;  %v984_v51 = vrot.slane %v2861_v34, %v2839_v29 }
 0x103   : > { %v887_v44 = vadd.f32 %v885_v2, %v850_v24 }
 0x104   : > { %v929_v8 = vpop.permute.xlu1 %928  ;;  %v912_v62 = vmul.f32 %v907_v3, %v902_v50  ;;  %v913_v16 = vmul.f32 %v911_v41, %v902_v50 }
 0x106   : > { %v919_v0 = vpop.permute.xlu0 %918  ;;  %v914_v6 = vadd.f32 %v912_v62, %v887_v44  ;;  %v915_v50 = vadd.f32 %v913_v16, %v888_v43 }
 0x107   : > { %v920_v11 = vsel %vm358_vm2, %v917_v9, %v919_v0  ;;  %v921_v20 = vsel %vm358_vm2, %v919_v0, %v917_v9 }
 0x108   : > { %v946_v15 = vpop.permute.xlu1 %945  ;;  %v922_v45 = vmul.f32 %v921_v20, %v3015_v26  ;;  %v923_v38 = vmul.f32 %v920_v11, %v3018_v27 }
 0x10a   : > { %v934_v54 = vrot.slane %v922_v45, %v2706_v5  ;;  %v938_v23 = vrot.slane %v923_v38, %v2706_v5  ;;  %v944_v22 = vpop.permute.xlu0 %943 }
 0x10b   : > { %v947_v59 = vsel %vm397_vm3, %v944_v22, %v946_v15  ;;  %v948_v9 = vsel %vm397_vm3, %v946_v15, %v944_v22 }
 0x10c   : > { %v975_v31 = vpop.permute.xlu1 %974  ;;  %v939_v61 = vmul.f32 %v934_v54, %v929_v8  ;;  %v940_v35 = vmul.f32 %v938_v23, %v929_v8  ;;  %v949_v46 = vmul.f32 %v948_v9, %v3032_v36  ;;  %v950_v49 = vmul.f32 %v947_v59, %v3035_v37 }
 0x10d   : > { %v985_v52 = vmul.f32 %v980_v48, %v975_v31  ;;  %v986_v3 = vmul.f32 %v984_v51, %v975_v31 }
 0x10e   : > { %v961_v39 = vrot.slane %v949_v46, %v2706_v5  ;;  %v965_v42 = vrot.slane %v950_v49, %v2706_v5  ;;  %v956_v53 = vpop.permute.xlu0 %955  ;;  %v942_v17 = vadd.f32 %v940_v35, %v915_v50  ;;  %v941_v8 = vadd.f32 %v939_v61, %v914_v6 }
 0x110   : > { %v992_v12 = vpop.permute.xlu1 %991  ;;  %v966_v19 = vmul.f32 %v961_v39, %v956_v53  ;;  %v967_v55 = vmul.f32 %v965_v42, %v956_v53 }
 0x112   : > { %v968_v41 = vadd.f32 %v966_v19, %v941_v8  ;;  %v969_v0 = vadd.f32 %v967_v55, %v942_v17  ;;  %v990_v30 = vpop.permute.xlu0 %989 }
 0x113   : > { %v993_v16 = vsel %vm455_vm4, %v990_v30, %v992_v12  ;;  %v994_v54 = vsel %vm455_vm4, %v992_v12, %v990_v30 }
 0x114   : > { %v1017_v2 = vpop.permute.xlu1 %1016  ;;  %v988_v4 = vadd.f32 %v986_v3, %v969_v0  ;;  %v987_v34 = vadd.f32 %v985_v52, %v968_v41  ;;  %v995_v43 = vmul.f32 %v993_v16, %v3076_v1  ;;  %v996_v44 = vmul.f32 %v994_v54, %v3086_v21 }
 0x116   : > { %v1002_v11 = vpop.permute.xlu0 %1001  ;;  %v1007_v49 = vrot.slane %v995_v43, %v2706_v5  ;;  %v1011_v48 = vrot.slane %v996_v44, %v2706_v5 }
 0x118   : > { %v1029_v20 = vpop.permute.xlu1 %1028  ;;  %v1012_v8 = vmul.f32 %v1007_v49, %v1002_v11  ;;  %v1013_v19 = vmul.f32 %v1011_v48, %v1002_v11 }
 0x11a   : > { %v1019_v15 = vpop.permute.xlu0 %1018 }
 0x11b   : > { %v1020_v59 = vsel %vm494_vm5, %v1017_v2, %v1019_v15  ;;  %v1021_v9 = vsel %vm494_vm5, %v1019_v15, %v1017_v2 }
 0x11c   : > { %v1046_v45 = vpop.permute.xlu1 %1045  ;;  %v1022_v51 = vmul.f32 %v1020_v59, %v3105_v33  ;;  %v1023_v6 = vmul.f32 %v1021_v9, %v3108_v40 }
 0x11e   : > { %v1044_v38 = vpop.permute.xlu0 %1043  ;;  %v1034_v3 = vrot.slane %v1022_v51, %v2706_v5  ;;  %v1038_v41 = vrot.slane %v1023_v6, %v2706_v5 }
 0x11f   : > { %v1047_v61 = vsel %vm533_vm6, %v1044_v38, %v1046_v45  ;;  %v1048_v35 = vsel %vm533_vm6, %v1046_v45, %v1044_v38 }
 0x120   : > { %v1071_v24 = vpop.permute.xlu1 %1070  ;;  %v1049_v50 = vmul.f32 %v1047_v61, %v3120_v47  ;;  %v1050_v39 = vmul.f32 %v1048_v35, %v3144_v58  ;;  %v1039_v43 = vmul.f32 %v1034_v3, %v1029_v20  ;;  %v1040_v44 = vmul.f32 %v1038_v41, %v1029_v20 }
 0x122   : > { %v1056_v25 = vpop.permute.xlu0 %1055  ;;  %v1061_v2 = vrot.slane %v1049_v50, %v2706_v5  ;;  %v1065_v15 = vrot.slane %v1050_v39, %v2706_v5 }
 0x124   : > { %v1083_v62 = vpop.permute.xlu1 %1082  ;;  %v1067_v61 = vmul.f32 %v1065_v15, %v1056_v25 }
 0x126   : > { %v1073_v23 = vpop.permute.xlu0 %1072 }
 0x127   : > { %v1074_v42 = vsel %vm572_vm7, %v1071_v24, %v1073_v23  ;;  %v1075_v53 = vsel %vm572_vm7, %v1073_v23, %v1071_v24  ;;  %v1014_v23 = vadd.f32 %v1012_v8, %v987_v34 }
 0x128   : > { %v1110_v22 = vpop.permute.xlu1 %1109  ;;  %v1076_v0 = vmul.f32 %v1074_v42, %v3158_v28  ;;  %v1077_v30 = vmul.f32 %v1075_v53, %v3161_v32 }
 0x129   : > { %v1041_v39 = vadd.f32 %v1039_v43, %v1014_v23 }
 0x12a   : > { %v1108_v31 = vpop.permute.xlu0 %1107  ;;  %v1088_v59 = vrot.slane %v1076_v0, %v2706_v5  ;;  %v1092_v9 = vrot.slane %v1077_v30, %v2706_v5 }
 0x12b   : > { %v1111_v55 = vsel %vm283_vm1, %v1108_v31, %v1110_v22  ;;  %v1112_v52 = vsel %vm283_vm1, %v1110_v22, %v1108_v31  ;;  %v1015_v22 = vadd.f32 %v1013_v19, %v988_v4  ;;  %v1066_v31 = vmul.f32 %v1061_v2, %v1056_v25 }
 0x12c   : > { %v1135_v46 = vpop.permute.xlu1 %1134  ;;  %v1113_v11 = vmul.f32 %v1112_v52, %v2988_v13  ;;  %v1114_v38 = vmul.f32 %v1111_v55, %v2991_v14  ;;  %v1093_v42 = vmul.f32 %v1088_v59, %v1083_v62  ;;  %v1094_v53 = vmul.f32 %v1092_v9, %v1083_v62 }
 0x12d   : > { %v1042_v50 = vadd.f32 %v1040_v44, %v1015_v22  ;;  %v1068_v52 = vadd.f32 %v1066_v31, %v1041_v39  ;;  %v1225_v31 = vrot.slane %v2944_v60, %v2931_v56 }
 0x12e   : > { %v1120_v12 = vpop.permute.xlu0 %1119  ;;  %v1125_v51 = vrot.slane %v1113_v11, %v2706_v5 }
 0x12f   : > { %v1069_v3 = vadd.f32 %v1067_v61, %v1042_v50  ;;  %v1095_v11 = vadd.f32 %v1093_v42, %v1068_v52 }
 0x130   : > { %v1147_v17 = vpop.permute.xlu1 %1146  ;;  %v1130_v41 = vmul.f32 %v1125_v51, %v1120_v12 }
 0x132   : > { %v1137_v45 = vpop.permute.xlu0 %1136  ;;  %v1132_v62 = vadd.f32 %v1130_v41, %v1095_v11 }
 0x133   : > { %v1138_v24 = vsel %vm319_vm0, %v1135_v46, %v1137_v45  ;;  %v1139_v16 = vsel %vm319_vm0, %v1137_v45, %v1135_v46  ;;  %v1129_v46 = vrot.slane %v1114_v38, %v2706_v5  ;;  %v1096_v45 = vadd.f32 %v1094_v53, %v1069_v3 }
 0x134   : > { %v1164_v54 = vpop.permute.xlu1 %1163  ;;  %v1140_v35 = vmul.f32 %v1139_v16, %v2978_v7  ;;  %v1141_v49 = vmul.f32 %v1138_v24, %v2981_v10 }
 0x135   : > { %v1131_v0 = vmul.f32 %v1129_v46, %v1120_v12 }
 0x136   : > { %v1162_v48 = vpop.permute.xlu0 %1161  ;;  %v1152_v8 = vrot.slane %v1140_v35, %v2706_v5  ;;  %v1156_v19 = vrot.slane %v1141_v49, %v2706_v5 }
 0x137   : > { %v1165_v4 = vsel %vm358_vm2, %v1162_v48, %v1164_v54  ;;  %v1166_v34 = vsel %vm358_vm2, %v1164_v54, %v1162_v48  ;;  %v1133_v54 = vadd.f32 %v1131_v0, %v1096_v45 }
 0x138   : > { %v1189_v20 = vpop.permute.xlu1 %1188  ;;  %v1167_v6 = vmul.f32 %v1166_v34, %v3015_v26  ;;  %v1168_v25 = vmul.f32 %v1165_v4, %v3018_v27  ;;  %v1157_v38 = vmul.f32 %v1152_v8, %v1147_v17  ;;  %v1158_v24 = vmul.f32 %v1156_v19, %v1147_v17 }
 0x139   : > { %v1229_v17 = vrot.slane %v2934_v57, %v2931_v56 }
 0x13a   : > { %v1174_v55 = vpop.permute.xlu0 %1173  ;;  %v1179_v2 = vrot.slane %v1167_v6, %v2706_v5  ;;  %v1183_v15 = vrot.slane %v1168_v25, %v2706_v5  ;;  %v1160_v61 = vadd.f32 %v1158_v24, %v1133_v54  ;;  %v1159_v35 = vadd.f32 %v1157_v38, %v1132_v62 }
 0x13c   : > { %v1201_v30 = vpop.permute.xlu1 %1200  ;;  %v1184_v12 = vmul.f32 %v1179_v2, %v1174_v55  ;;  %v1185_v44 = vmul.f32 %v1183_v15, %v1174_v55 }
 0x13e   : > { %v1191_v16 = vpop.permute.xlu0 %1190  ;;  %v1186_v4 = vadd.f32 %v1184_v12, %v1159_v35  ;;  %v1187_v34 = vadd.f32 %v1185_v44, %v1160_v61 }
 0x13f   : > { %v1192_v23 = vsel %vm397_vm3, %v1189_v20, %v1191_v16  ;;  %v1193_v22 = vsel %vm397_vm3, %v1191_v16, %v1189_v20 }
 0x140   : > { %v1235_v43 = vpop.permute.xlu1 %1234  ;;  %v1194_v59 = vmul.f32 %v1193_v22, %v3032_v36  ;;  %v1195_v9 = vmul.f32 %v1192_v23, %v3035_v37 }
 0x142   : > { %v1206_v49 = vrot.slane %v1194_v59, %v2706_v5  ;;  %v1210_v48 = vrot.slane %v1195_v9, %v2706_v5  ;;  %v1220_v51 = vpop.permute.xlu0 %1219 }
 0x143   : > { %v1230_v39 = vmul.f32 %v1225_v31, %v1220_v51  ;;  %v1231_v42 = vmul.f32 %v1229_v17, %v1220_v51 }
 0x144   : > { %v1247_v46 = vpop.permute.xlu1 %1246  ;;  %v1211_v20 = vmul.f32 %v1206_v49, %v1201_v30  ;;  %v1212_v6 = vmul.f32 %v1210_v48, %v1201_v30 }
 0x146   : > { %v1214_v25 = vadd.f32 %v1212_v6, %v1187_v34  ;;  %v1213_v50 = vadd.f32 %v1211_v20, %v1186_v4  ;;  %v1237_v60 = vpop.permute.xlu0 %1236 }
 0x147   : > { %v1238_v19 = vsel %vm455_vm4, %v1235_v43, %v1237_v60  ;;  %v1239_v55 = vsel %vm455_vm4, %v1237_v60, %v1235_v43 }
 0x148   : > { %v1264_v53 = vpop.permute.xlu1 %1263  ;;  %v1232_v8 = vadd.f32 %v1230_v39, %v1213_v50  ;;  %v1233_v57 = vadd.f32 %v1231_v42, %v1214_v25  ;;  %v1240_v3 = vmul.f32 %v1238_v19, %v3076_v1  ;;  %v1241_v41 = vmul.f32 %v1239_v55, %v3086_v21 }
 0x14a   : > { %v1262_v52 = vpop.permute.xlu0 %1261  ;;  %v1252_v38 = vrot.slane %v1240_v3, %v2706_v5  ;;  %v1256_v24 = vrot.slane %v1241_v41, %v2706_v5 }
 0x14b   : > { %v1265_v0 = vsel %vm494_vm5, %v1262_v52, %v1264_v53  ;;  %v1266_v30 = vsel %vm494_vm5, %v1264_v53, %v1262_v52 }
 0x14c   : > { %v1289_v2 = vpop.permute.xlu1 %1288  ;;  %v1267_v15 = vmul.f32 %v1265_v0, %v3105_v33  ;;  %v1268_v45 = vmul.f32 %v1266_v30, %v3108_v40  ;;  %v1257_v22 = vmul.f32 %v1252_v38, %v1247_v46  ;;  %v1258_v43 = vmul.f32 %v1256_v24, %v1247_v46  ;;  %v2445_v38 = vld [vmem:[%s3983_s4 + $0x10] sm:$0xf]  ;;  %v2446_v24 = vld [vmem:[%s3983_s4 + $0x20] sm:$0xf] }
 0x14e   : > { %v1274_v11 = vpop.permute.xlu0 %1273  ;;  %v1279_v62 = vrot.slane %v1267_v15, %v2706_v5  ;;  %v1283_v54 = vrot.slane %v1268_v45, %v2706_v5  ;;  %v1260_v51 = vadd.f32 %v1258_v43, %v1233_v57  ;;  %v1259_v46 = vadd.f32 %v1257_v22, %v1232_v8  ;;  %v2451_v22 = vld [vmem:[%s3983_s4 + $0x70] sm:$0xf]  ;;  %v2452_v43 = vld [vmem:[%s3983_s4 + $0x80] sm:$0xf] }
 0x150   : > { %v1301_v16 = vpop.permute.xlu1 %1300  ;;  %v1284_v31 = vmul.f32 %v1279_v62, %v1274_v11  ;;  %v1285_v17 = vmul.f32 %v1283_v54, %v1274_v11  ;;  %v1360_v11 = vld [vmem:[%s3983_s4] sm:$0xf]  ;;  %v2449_v54 = vld [vmem:[%s3983_s4 + $0x50] sm:$0xf] }
 0x151   : > { %v2448_v62 = vld [vmem:[%s3983_s4 + $0x40] sm:$0xf] }
 0x152   : > { %v1291_v23 = vpop.permute.xlu0 %1290  ;;  %v1286_v39 = vadd.f32 %v1284_v31, %v1259_v46  ;;  %v1287_v42 = vadd.f32 %v1285_v17, %v1260_v51  ;;  %v2455_v31 = vld [vmem:[%s3983_s4 + $0x24] sm:$0xf]  ;;  %v2456_v17 = vld [vmem:[%s3983_s4 + $0x34] sm:$0xf] }
 0x153   : > { %v1292_v12 = vsel %vm533_vm6, %v1289_v2, %v1291_v23  ;;  %v1293_v44 = vsel %vm533_vm6, %v1291_v23, %v1289_v2  ;;  %v2450_v23 = vld [vmem:[%s3983_s4 + $0x60] sm:$0xf]  ;;  %v2461_v51 = vld [vmem:[%s3983_s4 + $0x84] sm:$0xf] }
 0x154   : > { %v1294_v59 = vmul.f32 %v1292_v12, %v3120_v47  ;;  %v1295_v9 = vmul.f32 %v1293_v44, %v3144_v58  ;;  %v1318_v49 = vpop.permute.xlu1 %1317  ;;  %v2453_v44 = vld [vmem:[%s3983_s4 + $0x4] sm:$0xf] }
 0x156   : > { %v1306_v61 = vrot.slane %v1294_v59, %v2706_v5  ;;  %v1310_v35 = vrot.slane %v1295_v9, %v2706_v5  ;;  %v1316_v48 = vpop.permute.xlu0 %1315  ;;  %v2454_v9 = vld [vmem:[%s3983_s4 + $0x14] sm:$0xf] }
 0x157   : > { %v1319_v4 = vsel %vm572_vm7, %v1316_v48, %v1318_v49  ;;  %v1320_v34 = vsel %vm572_vm7, %v1318_v49, %v1316_v48  ;;  %v2459_v49 = vld [vmem:[%s3983_s4 + $0x64] sm:$0xf]  ;;  %v2460_v48 = vld [vmem:[%s3983_s4 + $0x74] sm:$0xf] }
 0x158   : > { %v1311_v20 = vmul.f32 %v1306_v61, %v1301_v16  ;;  %v1312_v6 = vmul.f32 %v1310_v35, %v1301_v16  ;;  %v1321_v25 = vmul.f32 %v1319_v4, %v3158_v28  ;;  %v1322_v50 = vmul.f32 %v1320_v34, %v3161_v32  ;;  %v1346_v0 = vpop.permute.xlu1 %1345  ;;  %v2447_v16 = vld [vmem:[%s3983_s4 + $0x30] sm:$0xf]  ;;  %v2457_v61 = vld [vmem:[%s3983_s4 + $0x44] sm:$0xf]  ;;  %v2458_v35 = vld [vmem:[%s3983_s4 + $0x54] sm:$0xf] }
 0x159   : > { %v2462_v34 = vld [vmem:[%s3983_s4 + $0x8] sm:$0xf] }
 0x15a   : > { %v1333_v60 = vrot.slane %v1321_v25, %v2706_v5  ;;  %v1337_v53 = vrot.slane %v1322_v50, %v2706_v5  ;;  %v1328_v57 = vpop.permute.xlu0 %1327  ;;  %v1314_v8 = vadd.f32 %v1312_v6, %v1287_v42  ;;  %v1313_v19 = vadd.f32 %v1311_v20, %v1286_v39  ;;  %v2463_v20 = vld [vmem:[%s3983_s4 + $0x18] sm:$0xf]  ;;  %v2464_v6 = vld [vmem:[%s3983_s4 + $0x28] sm:$0xf] }
 0x15b   : > { %v2465_v25 = vld [vmem:[%s3983_s4 + $0x38] sm:$0xf]  ;;  %v2466_v39 = vld [vmem:[%s3983_s4 + $0x48] sm:$0xf] }
 0x15c   : > { %v1338_v55 = vmul.f32 %v1333_v60, %v1328_v57  ;;  %v1339_v52 = vmul.f32 %v1337_v53, %v1328_v57  ;;  %v2467_v60 = vld [vmem:[%s3983_s4 + $0x58] sm:$0xf] }
 0x15e   : > { %v1340_v3 = vadd.f32 %v1338_v55, %v1313_v19  ;;  %v1341_v41 = vadd.f32 %v1339_v52, %v1314_v8 }
 0x160   : > { %v1348_v30 = vadd.f32 %v1346_v0, %v1340_v3  ;;  %v1349_v2 = vadd.f32 %v1346_v0, %v1341_v41 }
 0x162   : > { %v3431_v15 = vmax.f32 %v1348_v30, 0.0  ;;  %v3433_v45 = vmax.f32 %v1349_v2, 0.0 }
 0x164   : > { %1354 = vrot.lane.b32.xlu1 %v3433_v45, %s4001_s20  ;;  %1352 = vrot.lane.b32.xlu0 %v3431_v15, %s4001_s20  ;;  %v1586_v12 = vrot.slane %v3431_v15, 1  ;;  %v1587_v59 = vrot.slane %v3433_v45, 1  ;;  %v3540_v46 = vrot.slane %v3431_v15, 2  ;;  %v3543_v4 = vrot.slane %v3433_v45, 2 }
 0x168   : > { %1376 = vrot.lane.b32.xlu1 %v3431_v15, %s3998_s15  ;;  %1363 = vperm.xlu0 %2536, %v1360_v11  }
 0x16c   : > { %1388 = vperm.xlu1 %2535, %v2445_v38   ;;  %1378 = vrot.lane.b32.xlu0 %v3433_v45, %s3998_s15  ;;  %v2468_v38 = vld [vmem:[%s3983_s4 + $0x68] sm:$0xf] }
 0x170   : > { %1405 = vrot.lane.b32.xlu1 %v3433_v45, %s3999_s16  ;;  %1403 = vrot.lane.b32.xlu0 %v3431_v15, %s3999_s16 }
 0x174   : > { %1430 = vrot.lane.b32.xlu1 %v3431_v15, %s3994_s26  ;;  %1415 = vperm.xlu0 %2536, %v2446_v24  }
 0x178   : > { %1442 = vperm.xlu1 %2535, %v2447_v16   ;;  %1432 = vrot.lane.b32.xlu0 %v3433_v45, %s3994_s26 }
 0x17c   : > { %1476 = vrot.lane.b32.xlu1 %v3431_v15, %s2606_s13  ;;  %1461 = vperm.xlu0 %2536, %v2448_v62  }
 0x180   : > { %1488 = vperm.xlu1 %2535, %v2449_v54   ;;  %1478 = vrot.lane.b32.xlu0 %v3433_v45, %s2606_s13 }
 0x184   : > { %1505 = vrot.lane.b32.xlu1 %v3433_v45, %s2607_s14  ;;  %1503 = vrot.lane.b32.xlu0 %v3431_v15, %s2607_s14 }
 0x188   : > { %1530 = vrot.lane.b32.xlu1 %v3431_v15, %s2608_s9  ;;  %1515 = vperm.xlu0 %2536, %v2450_v23  }
 0x18c   : > { %1542 = vperm.xlu1 %2535, %v2451_v22   ;;  %1532 = vrot.lane.b32.xlu0 %v3433_v45, %s2608_s9 }
 0x190   : > { %1559 = vrot.lane.b32.xlu1 %v3433_v45, %s4000_s18  ;;  %1557 = vrot.lane.b32.xlu0 %v3431_v15, %s4000_s18 }
 0x194   : > { %1569 = vperm.xlu0 %2536, %v2452_v43   ;;  %1590 = vrot.lane.b32.xlu1 %v1586_v12, %s4001_s20 }
 0x198   : > { %1592 = vrot.lane.b32.xlu0 %v1587_v59, %s4001_s20  ;;  %1602 = vperm.xlu1 %2535, %v2453_v44  }
 0x19c   : > { %1617 = vrot.lane.b32.xlu0 %v1586_v12, %s3998_s15  ;;  %1619 = vrot.lane.b32.xlu1 %v1587_v59, %s3998_s15 }
 0x1a0   : > { %1629 = vperm.xlu0 %2536, %v2454_v9   ;;  %1644 = vrot.lane.b32.xlu1 %v1586_v12, %s3999_s16 }
 0x1a4   : > { %1646 = vrot.lane.b32.xlu0 %v1587_v59, %s3999_s16  ;;  %1656 = vperm.xlu1 %2535, %v2455_v31  }
 0x1a8   : > { %1671 = vrot.lane.b32.xlu0 %v1586_v12, %s3994_s26  ;;  %1673 = vrot.lane.b32.xlu1 %v1587_v59, %s3994_s26 }
 0x1ac   : > { %1683 = vperm.xlu0 %2536, %v2456_v17   ;;  %1702 = vperm.xlu1 %2535, %v2457_v61   ;;  %v2469_v17 = vld [vmem:[%s3983_s4 + $0x78] sm:$0xf] }
 0x1b0   : > { %1717 = vrot.lane.b32.xlu0 %v1586_v12, %s2606_s13  ;;  %1719 = vrot.lane.b32.xlu1 %v1587_v59, %s2606_s13 }
 0x1b4   : > { %1729 = vperm.xlu0 %2536, %v2458_v35   ;;  %1744 = vrot.lane.b32.xlu1 %v1586_v12, %s2607_s14 }
 0x1b8   : > { %1746 = vrot.lane.b32.xlu0 %v1587_v59, %s2607_s14  ;;  %1756 = vperm.xlu1 %2535, %v2459_v49  }
 0x1bc   : > { %1771 = vrot.lane.b32.xlu0 %v1586_v12, %s2608_s9  ;;  %1773 = vrot.lane.b32.xlu1 %v1587_v59, %s2608_s9 }
 0x1c0   : > { %1783 = vperm.xlu0 %2536, %v2460_v48   ;;  %1798 = vrot.lane.b32.xlu1 %v1586_v12, %s4000_s18 }
 0x1c4   : > { %1800 = vrot.lane.b32.xlu0 %v1587_v59, %s4000_s18  ;;  %1810 = vperm.xlu1 %2535, %v2461_v51  }
 0x1c8   : > { %1829 = vrot.lane.b32.xlu0 %v3540_v46, %s4001_s20  ;;  %1831 = vrot.lane.b32.xlu1 %v3543_v4, %s4001_s20 }
 0x1cc   : > { %1841 = vperm.xlu0 %2536, %v2462_v34   ;;  %1856 = vrot.lane.b32.xlu1 %v3540_v46, %s3998_s15 }
 0x1d0   : > { %1858 = vrot.lane.b32.xlu0 %v3543_v4, %s3998_s15  ;;  %1868 = vperm.xlu1 %2535, %v2463_v20  }
 0x1d4   : > { %1883 = vrot.lane.b32.xlu0 %v3540_v46, %s3999_s16  ;;  %1885 = vrot.lane.b32.xlu1 %v3543_v4, %s3999_s16 }
 0x1d6   : > { %v1355_v50 = vpop.permute.xlu1 %1354  ;;  %v1353_v42 = vpop.permute.xlu0 %1352 }
 0x1d7   : > { %v1357_v8 = vsel %vm283_vm1, %v1355_v50, %v1353_v42  ;;  %v1356_v19 = vsel %vm283_vm1, %v1353_v42, %v1355_v50 }
 0x1d8   : > { %1895 = vperm.xlu0 %2536, %v2464_v6   ;;  %1910 = vrot.lane.b32.xlu1 %v3540_v46, %s4002_s12  ;;  %v1358_v55 = vmul.f32 %v1357_v8, %v2988_v13  ;;  %v1359_v41 = vmul.f32 %v1356_v19, %v2991_v14 }
 0x1da   : > { %v1377_v53 = vpop.permute.xlu1 %1376  ;;  %v1369_v24 = vrot.slane %v1358_v55, %v2706_v5  ;;  %v1373_v22 = vrot.slane %v1359_v41, %v2706_v5  ;;  %v1467_v41 = vrot.slane %v3431_v15, %v2706_v5 }
 0x1dc   : > { %1912 = vrot.lane.b32.xlu0 %v3543_v4, %s4002_s12  ;;  %1922 = vperm.xlu1 %2535, %v2465_v25  }
 0x1e0   : > { %1941 = vperm.xlu0 %2536, %v2466_v39   ;;  %1956 = vrot.lane.b32.xlu1 %v3540_v46, %s2606_s13 }
 0x1e3   : > { %v1364_v57 = vpop.permute.xlu0 %1363 }
 0x1e4   : > { %1958 = vrot.lane.b32.xlu0 %v3543_v4, %s2606_s13  ;;  %1968 = vperm.xlu1 %2535, %v2467_v60   ;;  %v1374_v61 = vmul.f32 %v1369_v24, %v1364_v57  ;;  %v1375_v35 = vmul.f32 %v1373_v22, %v1364_v57 }
 0x1e7   : > { %v1389_v52 = vpop.permute.xlu1 %1388  ;;  %v1379_v3 = vpop.permute.xlu0 %1378 }
 0x1e8   : > { %v1380_v0 = vsel %vm319_vm0, %v1377_v53, %v1379_v3  ;;  %v1381_v30 = vsel %vm319_vm0, %v1379_v3, %v1377_v53  ;;  %1983 = vrot.lane.b32.xlu0 %v3540_v46, %s2607_s14  ;;  %1985 = vrot.lane.b32.xlu1 %v3543_v4, %s2607_s14  ;;  %v1471_v3 = vrot.slane %v3433_v45, %v2706_v5 }
 0x1e9   : > { %v1382_v2 = vmul.f32 %v1381_v30, %v2978_v7  ;;  %v1383_v11 = vmul.f32 %v1380_v0, %v2981_v10  ;;  %v3639_v0 = vrot.slane %v3431_v15, 3 }
 0x1eb   : > { %v1394_v16 = vrot.slane %v1382_v2, %v2706_v5  ;;  %v1398_v62 = vrot.slane %v1383_v11, %v2706_v5  ;;  %v1406_v54 = vpop.permute.xlu1 %1405  ;;  %v1404_v23 = vpop.permute.xlu0 %1403 }
 0x1ec   : > { %v1407_v43 = vsel %vm358_vm2, %v1404_v23, %v1406_v54  ;;  %v1408_v12 = vsel %vm358_vm2, %v1406_v54, %v1404_v23  ;;  %1995 = vperm.xlu0 %2536, %v2468_v38   ;;  %2010 = vrot.lane.b32.xlu1 %v3540_v46, %s2608_s9  ;;  %v3649_v54 = vrot.slane %v3433_v45, 3 }
 0x1ed   : > { %v1399_v44 = vmul.f32 %v1394_v16, %v1389_v52  ;;  %v1400_v59 = vmul.f32 %v1398_v62, %v1389_v52  ;;  %v1409_v9 = vmul.f32 %v1408_v12, %v3015_v26  ;;  %v1410_v31 = vmul.f32 %v1407_v43, %v3018_v27  ;;  %v2470_v52 = vld [vmem:[%s3983_s4 + $0x88] sm:$0xf]  ;;  %v2471_v62 = vld [vmem:[%s3983_s4 + $0xc] sm:$0xf] }
 0x1ef   : > { %v1431_v49 = vpop.permute.xlu1 %1430  ;;  %v1421_v48 = vrot.slane %v1409_v9, %v2706_v5  ;;  %v1425_v51 = vrot.slane %v1410_v31, %v2706_v5  ;;  %v1416_v34 = vpop.permute.xlu0 %1415  ;;  %v1401_v20 = vadd.f32 %v1399_v44, %v1374_v61  ;;  %v1402_v6 = vadd.f32 %v1400_v59, %v1375_v35 }
 0x1f0   : > { %2012 = vrot.lane.b32.xlu0 %v3543_v4, %s2608_s9  ;;  %2022 = vperm.xlu1 %2535, %v2469_v17  }
 0x1f1   : > { %v1426_v25 = vmul.f32 %v1421_v48, %v1416_v34  ;;  %v1427_v50 = vmul.f32 %v1425_v51, %v1416_v34 }
 0x1f3   : > { %v1428_v39 = vadd.f32 %v1426_v25, %v1401_v20  ;;  %v1429_v42 = vadd.f32 %v1427_v50, %v1402_v6  ;;  %v1443_v60 = vpop.permute.xlu1 %1442  ;;  %v1433_v53 = vpop.permute.xlu0 %1432 }
 0x1f4   : > { %v1434_v57 = vsel %vm397_vm3, %v1431_v49, %v1433_v53  ;;  %v1435_v8 = vsel %vm397_vm3, %v1433_v53, %v1431_v49  ;;  %2037 = vrot.lane.b32.xlu0 %v3540_v46, %s4000_s18  ;;  %2039 = vrot.lane.b32.xlu1 %v3543_v4, %s4000_s18 }
 0x1f5   : > { %v1436_v19 = vmul.f32 %v1435_v8, %v3032_v36  ;;  %v1437_v55 = vmul.f32 %v1434_v57, %v3035_v37 }
 0x1f7   : > { %v1448_v46 = vrot.slane %v1436_v19, %v2706_v5  ;;  %v1452_v4 = vrot.slane %v1437_v55, %v2706_v5  ;;  %v1477_v30 = vpop.permute.xlu1 %1476  ;;  %v1462_v2 = vpop.permute.xlu0 %1461 }
 0x1f8   : > { %v1472_v11 = vmul.f32 %v1467_v41, %v1462_v2  ;;  %v1473_v38 = vmul.f32 %v1471_v3, %v1462_v2  ;;  %2049 = vperm.xlu0 %2536, %v2470_v52   ;;  %2068 = vrot.lane.b32.xlu1 %v3639_v0, %s4001_s20  ;;  %v2473_v41 = vld [vmem:[%s3983_s4 + $0x2c] sm:$0xf] }
 0x1f9   : > { %v1453_v24 = vmul.f32 %v1448_v46, %v1443_v60  ;;  %v1454_v16 = vmul.f32 %v1452_v4, %v1443_v60 }
 0x1fb   : > { %v1455_v23 = vadd.f32 %v1453_v24, %v1428_v39  ;;  %v1456_v22 = vadd.f32 %v1454_v16, %v1429_v42  ;;  %v1489_v43 = vpop.permute.xlu1 %1488  ;;  %v1479_v12 = vpop.permute.xlu0 %1478  ;;  %v2472_v42 = vld [vmem:[%s3983_s4 + $0x1c] sm:$0xf] }
 0x1fc   : > { %v1480_v44 = vsel %vm455_vm4, %v1477_v30, %v1479_v12  ;;  %v1481_v59 = vsel %vm455_vm4, %v1479_v12, %v1477_v30  ;;  %2070 = vrot.lane.b32.xlu0 %v3649_v54, %s4001_s20  ;;  %2080 = vperm.xlu1 %2535, %v2471_v62   ;;  %s2335_s20 = scalar_lea.hbm %s3985_s6, %s2486_s11 }
 0x1fd   : > { %v1474_v9 = vadd.f32 %v1472_v11, %v1455_v23  ;;  %v1475_v31 = vadd.f32 %v1473_v38, %v1456_v22  ;;  %v1482_v17 = vmul.f32 %v1480_v44, %v3076_v1  ;;  %v1483_v61 = vmul.f32 %v1481_v59, %v3086_v21 }
 0x1ff   : > { %v1494_v35 = vrot.slane %v1482_v17, %v2706_v5  ;;  %v1498_v49 = vrot.slane %v1483_v61, %v2706_v5  ;;  %v1506_v48 = vpop.permute.xlu1 %1505  ;;  %v1504_v51 = vpop.permute.xlu0 %1503  ;;  %v2474_v61 = vld [vmem:[%s3983_s4 + $0x3c] sm:$0xf] }
 0x200   : > { %v1507_v34 = vsel %vm494_vm5, %v1504_v51, %v1506_v48  ;;  %v1508_v20 = vsel %vm494_vm5, %v1506_v48, %v1504_v51  ;;  %2095 = vrot.lane.b32.xlu0 %v3639_v0, %s3998_s15  ;;  %2097 = vrot.lane.b32.xlu1 %v3649_v54, %s3998_s15 }
 0x201   : > { %v1499_v6 = vmul.f32 %v1494_v35, %v1489_v43  ;;  %v1500_v25 = vmul.f32 %v1498_v49, %v1489_v43  ;;  %v1509_v50 = vmul.f32 %v1507_v34, %v3105_v33  ;;  %v1510_v39 = vmul.f32 %v1508_v20, %v3108_v40  ;;  %v2475_v35 = vld [vmem:[%s3983_s4 + $0x4c] sm:$0xf] }
 0x203   : > { %v1531_v60 = vpop.permute.xlu1 %1530  ;;  %v1502_v53 = vadd.f32 %v1500_v25, %v1475_v31  ;;  %v1521_v57 = vrot.slane %v1509_v50, %v2706_v5  ;;  %v1525_v8 = vrot.slane %v1510_v39, %v2706_v5  ;;  %v1516_v19 = vpop.permute.xlu0 %1515  ;;  %v1501_v55 = vadd.f32 %v1499_v6, %v1474_v9 }
 0x204   : > { %2107 = vperm.xlu0 %2536, %v2472_v42   ;;  %2122 = vrot.lane.b32.xlu1 %v3639_v0, %s3999_s16 }
 0x205   : > { %v1526_v52 = vmul.f32 %v1521_v57, %v1516_v19  ;;  %v1527_v3 = vmul.f32 %v1525_v8, %v1516_v19 }
 0x207   : > { %v1528_v46 = vadd.f32 %v1526_v52, %v1501_v55  ;;  %v1529_v4 = vadd.f32 %v1527_v3, %v1502_v53  ;;  %v1543_v30 = vpop.permute.xlu1 %1542  ;;  %v1533_v2 = vpop.permute.xlu0 %1532  ;;  %v2476_v52 = vld [vmem:[%s3983_s4 + $0x5c] sm:$0xf] }
 0x208   : > { %v1534_v11 = vsel %vm533_vm6, %v1531_v60, %v1533_v2  ;;  %v1535_v38 = vsel %vm533_vm6, %v1533_v2, %v1531_v60  ;;  %2124 = vrot.lane.b32.xlu0 %v3649_v54, %s3999_s16  ;;  %2134 = vperm.xlu1 %2535, %v2473_v41  }
 0x209   : > { %v1536_v24 = vmul.f32 %v1534_v11, %v3120_v47  ;;  %v1537_v16 = vmul.f32 %v1535_v38, %v3144_v58 }
 0x20b   : > { %v1548_v62 = vrot.slane %v1536_v24, %v2706_v5  ;;  %v1552_v23 = vrot.slane %v1537_v16, %v2706_v5  ;;  %v1560_v22 = vpop.permute.xlu1 %1559  ;;  %v1558_v43 = vpop.permute.xlu0 %1557 }
 0x20c   : > { %v1561_v12 = vsel %vm572_vm7, %v1558_v43, %v1560_v22  ;;  %v1562_v44 = vsel %vm572_vm7, %v1560_v22, %v1558_v43  ;;  %2149 = vrot.lane.b32.xlu0 %v3639_v0, %s4002_s12  ;;  %2151 = vrot.lane.b32.xlu1 %v3649_v54, %s4002_s12 }
 0x20d   : > { %v1553_v59 = vmul.f32 %v1548_v62, %v1543_v30  ;;  %v1554_v9 = vmul.f32 %v1552_v23, %v1543_v30  ;;  %v1563_v31 = vmul.f32 %v1561_v12, %v3158_v28  ;;  %v1564_v17 = vmul.f32 %v1562_v44, %v3161_v32  ;;  %v2477_v62 = vld [vmem:[%s3983_s4 + $0x6c] sm:$0xf] }
 0x20f   : > { %v1556_v49 = vadd.f32 %v1554_v9, %v1529_v4  ;;  %v1575_v48 = vrot.slane %v1563_v31, %v2706_v5  ;;  %v1579_v51 = vrot.slane %v1564_v17, %v2706_v5  ;;  %v1570_v34 = vpop.permute.xlu0 %1569  ;;  %v1555_v20 = vadd.f32 %v1553_v59, %v1528_v46  ;;  %v1591_v6 = vpop.permute.xlu1 %1590 }
 0x210   : > { %2161 = vperm.xlu0 %2536, %v2474_v61   ;;  %2180 = vperm.xlu1 %2535, %v2475_v35  }
 0x211   : > { %v1580_v25 = vmul.f32 %v1575_v48, %v1570_v34  ;;  %v1581_v50 = vmul.f32 %v1579_v51, %v1570_v34 }
 0x213   : > { %v1582_v39 = vadd.f32 %v1580_v25, %v1555_v20  ;;  %v1583_v42 = vadd.f32 %v1581_v50, %v1556_v49  ;;  %v1593_v60 = vpop.permute.xlu0 %1592  ;;  %v1603_v53 = vpop.permute.xlu1 %1602 }
 0x214   : > { %v1594_v57 = vsel %vm283_vm1, %v1591_v6, %v1593_v60  ;;  %v1595_v8 = vsel %vm283_vm1, %v1593_v60, %v1591_v6  ;;  %2195 = vrot.lane.b32.xlu0 %v3639_v0, %s2606_s13  ;;  %2197 = vrot.lane.b32.xlu1 %v3649_v54, %s2606_s13  ;;  %v2478_v6 = vld [vmem:[%s3983_s4 + $0x7c] sm:$0xf] }
 0x215   : > { %v1596_v19 = vmul.f32 %v1595_v8, %v2988_v13  ;;  %v1597_v55 = vmul.f32 %v1594_v57, %v2991_v14 }
 0x217   : > { %v1608_v3 = vrot.slane %v1596_v19, %v2706_v5  ;;  %v1612_v41 = vrot.slane %v1597_v55, %v2706_v5  ;;  %v1618_v46 = vpop.permute.xlu0 %1617  ;;  %v1620_v4 = vpop.permute.xlu1 %1619 }
 0x218   : > { %v1621_v30 = vsel %vm319_vm0, %v1618_v46, %v1620_v4  ;;  %v1622_v2 = vsel %vm319_vm0, %v1620_v4, %v1618_v46  ;;  %2207 = vperm.xlu0 %2536, %v2476_v52   ;;  %2222 = vrot.lane.b32.xlu1 %v3639_v0, %s2607_s14  ;;  %v2479_v52 = vld [vmem:[%s3983_s4 + $0x8c] sm:$0xf] }
 0x219   : > { %v1613_v11 = vmul.f32 %v1608_v3, %v1603_v53  ;;  %v1614_v38 = vmul.f32 %v1612_v41, %v1603_v53  ;;  %v1623_v24 = vmul.f32 %v1622_v2, %v2978_v7  ;;  %v1624_v16 = vmul.f32 %v1621_v30, %v2981_v10 }
 0x21a   : > { %v1708_v3 = vrot.slane %v3431_v15, %v2777_v18  ;;  %v1712_v41 = vrot.slane %v3433_v45, %v2777_v18  ;;  %v2303_v18 = vld [vmem:[%s3984_s5] sm:$0xf] }
 0x21b   : > { %v1615_v23 = vadd.f32 %v1613_v11, %v1582_v39  ;;  %v1616_v22 = vadd.f32 %v1614_v38, %v1583_v42  ;;  %v1630_v43 = vpop.permute.xlu0 %1629  ;;  %v1635_v12 = vrot.slane %v1623_v24, %v2706_v5  ;;  %v1639_v44 = vrot.slane %v1624_v16, %v2706_v5  ;;  %v1645_v59 = vpop.permute.xlu1 %1644 }
 0x21c   : > { %2224 = vrot.lane.b32.xlu0 %v3649_v54, %s2607_s14  ;;  %2234 = vperm.xlu1 %2535, %v2477_v62  }
 0x21d   : > { %v1640_v9 = vmul.f32 %v1635_v12, %v1630_v43  ;;  %v1641_v31 = vmul.f32 %v1639_v44, %v1630_v43 }
 0x21f   : > { %v1642_v17 = vadd.f32 %v1640_v9, %v1615_v23  ;;  %v1643_v61 = vadd.f32 %v1641_v31, %v1616_v22  ;;  %v1647_v35 = vpop.permute.xlu0 %1646  ;;  %v1657_v49 = vpop.permute.xlu1 %1656 }
 0x220   : > { %v1648_v48 = vsel %vm358_vm2, %v1645_v59, %v1647_v35  ;;  %v1649_v51 = vsel %vm358_vm2, %v1647_v35, %v1645_v59  ;;  %2249 = vrot.lane.b32.xlu0 %v3639_v0, %s2608_s9  ;;  %2251 = vrot.lane.b32.xlu1 %v3649_v54, %s2608_s9  ;;  %s2543_s9 = sshll.u32 %s2610_s28, 4  ;;  %s2544_s9 = int_to_ptr.vmem [resolvable:$false] %s2543_s9 }
 0x221   : > { %v1650_v34 = vmul.f32 %v1649_v51, %v3015_v26  ;;  %v1651_v20 = vmul.f32 %v1648_v48, %v3018_v27  ;;  %s2545_s25 = scalar_lea.vmem %s2544_s9, 256 }
 0x223   : > { %v1662_v25 = vrot.slane %v1650_v34, %v2706_v5  ;;  %v1666_v50 = vrot.slane %v1651_v20, %v2706_v5  ;;  %v1672_v39 = vpop.permute.xlu0 %1671  ;;  %v1674_v42 = vpop.permute.xlu1 %1673 }
 0x224   : > { %v1675_v60 = vsel %vm397_vm3, %v1672_v39, %v1674_v42  ;;  %v1676_v53 = vsel %vm397_vm3, %v1674_v42, %v1672_v39  ;;  %2261 = vperm.xlu0 %2536, %v2478_v6   ;;  %2276 = vrot.lane.b32.xlu1 %v3639_v0, %s4000_s18 }
 0x225   : > { %v1667_v57 = vmul.f32 %v1662_v25, %v1657_v49  ;;  %v1668_v8 = vmul.f32 %v1666_v50, %v1657_v49  ;;  %v1677_v19 = vmul.f32 %v1676_v53, %v3032_v36  ;;  %v1678_v55 = vmul.f32 %v1675_v60, %v3035_v37 }
 0x227   : > { %v1669_v46 = vadd.f32 %v1667_v57, %v1642_v17  ;;  %v1670_v4 = vadd.f32 %v1668_v8, %v1643_v61  ;;  %v1684_v30 = vpop.permute.xlu0 %1683  ;;  %v1689_v0 = vrot.slane %v1677_v19, %v2706_v5  ;;  %v1693_v2 = vrot.slane %v1678_v55, %v2706_v5  ;;  %v1703_v11 = vpop.permute.xlu1 %1702 }
 0x228   : > { %v1713_v38 = vmul.f32 %v1708_v3, %v1703_v11  ;;  %v1714_v24 = vmul.f32 %v1712_v41, %v1703_v11  ;;  %2278 = vrot.lane.b32.xlu0 %v3649_v54, %s4000_s18  ;;  %2288 = vperm.xlu1 %2535, %v2479_v52   ;;  %s242_s18 = sand.u32 1, %s2591_s22  }
 0x229   : > { %v1694_v16 = vmul.f32 %v1689_v0, %v1684_v30  ;;  %v1695_v62 = vmul.f32 %v1693_v2, %v1684_v30  ;;  %s2400_s10 = sshll.u32 %s242_s18, 3 }
 0x22a   : > { %s244_s26 = scalar_lea.vmem [#allocation2], %s2400_s10 }
 0x22b   : > { %v1696_v23 = vadd.f32 %v1694_v16, %v1669_v46  ;;  %v1697_v22 = vadd.f32 %v1695_v62, %v1670_v4  ;;  %v1718_v43 = vpop.permute.xlu0 %1717  ;;  %v1720_v12 = vpop.permute.xlu1 %1719  ;;  %s2337_s12 = sshll.u32 %s244_s26, 4  ;;  %s2338_s12 = int_to_ptr.vmem [resolvable:$true] %s2337_s12 }
 0x22c   : > { %v1721_v44 = vsel %vm455_vm4, %v1718_v43, %v1720_v12  ;;  %v1722_v59 = vsel %vm455_vm4, %v1720_v12, %v1718_v43  ;;  %2306 = vperm.xlu0 %2536, %v2303_v18   ;;  %s2539_s14 = scalar_lea.vmem %s2338_s12, 128  ;;  %p2546_p0 = scmp.lt.s32.totalorder %s2338_s12, %s2544_s9 }
 0x22d   : > { %v1715_v9 = vadd.f32 %v1713_v38, %v1696_v23  ;;  %v1716_v54 = vadd.f32 %v1714_v24, %v1697_v22  ;;  %v1723_v31 = vmul.f32 %v1721_v44, %v3076_v1  ;;  %v1724_v17 = vmul.f32 %v1722_v59, %v3086_v21  ;;  %p2540_p11 = scmp.ne.s32.totalorder %s2338_s12, %s2539_s14  ;;  %p2547_p1 = scmp.lt.s32.totalorder %s2545_s25, %s2539_s14 }
 0x22f   : > { %v1730_v61 = vpop.permute.xlu0 %1729  ;;  %v1735_v35 = vrot.slane %v1723_v31, %v2706_v5  ;;  %v1739_v49 = vrot.slane %v1724_v17, %v2706_v5  ;;  %v1745_v48 = vpop.permute.xlu1 %1744  ;;  %p2541_p12 = pnand %p2540_p11, %p2684_p5  ;;  %p2548_p2 = por %p2547_p1, %p2546_p0 }
 0x231   : > { %v1740_v51 = vmul.f32 %v1735_v35, %v1730_v61  ;;  %v1741_v34 = vmul.f32 %v1739_v49, %v1730_v61  ;;  %p2542_p13 = pneg %p2541_p12 }
 0x233   : > { %v1742_v20 = vadd.f32 %v1740_v51, %v1715_v9  ;;  %v1743_v6 = vadd.f32 %v1741_v34, %v1716_v54  ;;  %v1747_v25 = vpop.permute.xlu0 %1746  ;;  %v1757_v50 = vpop.permute.xlu1 %1756  ;;  %p2549_p3 = pnand %p2548_p2, %p2542_p13 }
 0x234   : > { %v1748_v39 = vsel %vm494_vm5, %v1745_v48, %v1747_v25  ;;  %v1749_v42 = vsel %vm494_vm5, %v1747_v25, %v1745_v48 }
 0x235   : > { %v1750_v60 = vmul.f32 %v1748_v39, %v3105_v33  ;;  %v1751_v53 = vmul.f32 %v1749_v42, %v3108_v40 }
 0x237   : > { %v1762_v57 = vrot.slane %v1750_v60, %v2706_v5  ;;  %v1766_v8 = vrot.slane %v1751_v53, %v2706_v5  ;;  %v1772_v19 = vpop.permute.xlu0 %1771  ;;  %v1774_v55 = vpop.permute.xlu1 %1773 }
 0x238   : > { %v1775_v52 = vsel %vm533_vm6, %v1772_v19, %v1774_v55  ;;  %v1776_v3 = vsel %vm533_vm6, %v1774_v55, %v1772_v19 }
 0x239   : > { %v1767_v41 = vmul.f32 %v1762_v57, %v1757_v50  ;;  %v1768_v46 = vmul.f32 %v1766_v8, %v1757_v50  ;;  %v1777_v4 = vmul.f32 %v1775_v52, %v3120_v47  ;;  %v1778_v30 = vmul.f32 %v1776_v3, %v3144_v58 }
 0x23b   : > { %v1769_v0 = vadd.f32 %v1767_v41, %v1742_v20  ;;  %v1770_v2 = vadd.f32 %v1768_v46, %v1743_v6  ;;  %v1784_v11 = vpop.permute.xlu0 %1783  ;;  %v1789_v38 = vrot.slane %v1777_v4, %v2706_v5  ;;  %v1793_v24 = vrot.slane %v1778_v30, %v2706_v5  ;;  %v1799_v16 = vpop.permute.xlu1 %1798 }
 0x23d   : > { %v1794_v62 = vmul.f32 %v1789_v38, %v1784_v11  ;;  %v1795_v18 = vmul.f32 %v1793_v24, %v1784_v11 }
 0x23f   : > { %v1796_v23 = vadd.f32 %v1794_v62, %v1769_v0  ;;  %v1797_v22 = vadd.f32 %v1795_v18, %v1770_v2  ;;  %v1801_v43 = vpop.permute.xlu0 %1800  ;;  %v1811_v12 = vpop.permute.xlu1 %1810 }
 0x240   : > { %v1802_v44 = vsel %vm572_vm7, %v1799_v16, %v1801_v43  ;;  %v1803_v59 = vsel %vm572_vm7, %v1801_v43, %v1799_v16 }
 0x241   : > { %v1804_v9 = vmul.f32 %v1802_v44, %v3158_v28  ;;  %v1805_v54 = vmul.f32 %v1803_v59, %v3161_v32 }
 0x243   : > { %v1816_v31 = vrot.slane %v1804_v9, %v2706_v5  ;;  %v1820_v17 = vrot.slane %v1805_v54, %v2706_v5  ;;  %v1830_v61 = vpop.permute.xlu0 %1829  ;;  %v1832_v35 = vpop.permute.xlu1 %1831 }
 0x244   : > { %v1833_v25 = vsel %vm283_vm1, %v1830_v61, %v1832_v35  ;;  %v1834_v50 = vsel %vm283_vm1, %v1832_v35, %v1830_v61 }
 0x245   : > { %v1821_v49 = vmul.f32 %v1816_v31, %v1811_v12  ;;  %v1822_v48 = vmul.f32 %v1820_v17, %v1811_v12  ;;  %v1835_v60 = vmul.f32 %v1834_v50, %v2988_v13  ;;  %v1836_v53 = vmul.f32 %v1833_v25, %v2991_v14 }
 0x247   : > { %v1823_v51 = vadd.f32 %v1821_v49, %v1796_v23  ;;  %v1824_v34 = vadd.f32 %v1822_v48, %v1797_v22  ;;  %v1842_v20 = vpop.permute.xlu0 %1841  ;;  %v1857_v6 = vpop.permute.xlu1 %1856  ;;  %v1847_v41 = vrot.slane %v1835_v60, %v2706_v5  ;;  %v1851_v46 = vrot.slane %v1836_v53, %v2706_v5 }
 0x249   : > { %v1852_v62 = vmul.f32 %v1847_v41, %v1842_v20  ;;  %v1853_v18 = vmul.f32 %v1851_v46, %v1842_v20 }
 0x24b   : > { %v1859_v39 = vpop.permute.xlu0 %1858  ;;  %v1869_v42 = vpop.permute.xlu1 %1868  ;;  %v1854_v9 = vadd.f32 %v1852_v62, %v1823_v51  ;;  %v1855_v54 = vadd.f32 %v1853_v18, %v1824_v34 }
 0x24c   : > { %v1860_v57 = vsel %vm319_vm0, %v1857_v6, %v1859_v39  ;;  %v1861_v8 = vsel %vm319_vm0, %v1859_v39, %v1857_v6  ;;  %v1947_v39 = vrot.slane %v3431_v15, %v2839_v29 }
 0x24d   : > { %v1862_v19 = vmul.f32 %v1861_v8, %v2978_v7  ;;  %v1863_v55 = vmul.f32 %v1860_v57, %v2981_v10 }
 0x24f   : > { %v1884_v52 = vpop.permute.xlu0 %1883  ;;  %v1886_v3 = vpop.permute.xlu1 %1885  ;;  %v1874_v11 = vrot.slane %v1862_v19, %v2706_v5  ;;  %v1878_v38 = vrot.slane %v1863_v55, %v2706_v5 }
 0x250   : > { %v1887_v4 = vsel %vm358_vm2, %v1884_v52, %v1886_v3  ;;  %v1888_v30 = vsel %vm358_vm2, %v1886_v3, %v1884_v52 }
 0x251   : > { %v1889_v0 = vmul.f32 %v1888_v30, %v3015_v26  ;;  %v1890_v2 = vmul.f32 %v1887_v4, %v3018_v27  ;;  %v1879_v43 = vmul.f32 %v1874_v11, %v1869_v42  ;;  %v1880_v12 = vmul.f32 %v1878_v38, %v1869_v42 }
 0x252   : > { %v1951_v42 = vrot.slane %v3433_v45, %v2839_v29 }
 0x253   : > { %v1896_v24 = vpop.permute.xlu0 %1895  ;;  %v1911_v16 = vpop.permute.xlu1 %1910  ;;  %v1901_v23 = vrot.slane %v1889_v0, %v2706_v5  ;;  %v1905_v22 = vrot.slane %v1890_v2, %v2706_v5  ;;  %v1881_v20 = vadd.f32 %v1879_v43, %v1854_v9  ;;  %v1882_v6 = vadd.f32 %v1880_v12, %v1855_v54 }
 0x255   : > { %v1906_v61 = vmul.f32 %v1901_v23, %v1896_v24  ;;  %v1907_v35 = vmul.f32 %v1905_v22, %v1896_v24 }
 0x257   : > { %v1913_v44 = vpop.permute.xlu0 %1912  ;;  %v1923_v59 = vpop.permute.xlu1 %1922  ;;  %v1908_v60 = vadd.f32 %v1906_v61, %v1881_v20  ;;  %v1909_v53 = vadd.f32 %v1907_v35, %v1882_v6 }
 0x258   : > { %v1914_v31 = vsel %vm397_vm3, %v1911_v16, %v1913_v44  ;;  %v1915_v17 = vsel %vm397_vm3, %v1913_v44, %v1911_v16 }
 0x259   : > { %v1916_v49 = vmul.f32 %v1915_v17, %v3032_v36  ;;  %v1917_v48 = vmul.f32 %v1914_v31, %v3035_v37 }
 0x25b   : > { %v1928_v25 = vrot.slane %v1916_v49, %v2706_v5  ;;  %v1932_v50 = vrot.slane %v1917_v48, %v2706_v5  ;;  %v1942_v51 = vpop.permute.xlu0 %1941  ;;  %v1957_v34 = vpop.permute.xlu1 %1956 }
 0x25c   : > { %v1952_v52 = vmul.f32 %v1947_v39, %v1942_v51  ;;  %v1953_v3 = vmul.f32 %v1951_v42, %v1942_v51 }
 0x25d   : > { %v1933_v57 = vmul.f32 %v1928_v25, %v1923_v59  ;;  %v1934_v8 = vmul.f32 %v1932_v50, %v1923_v59 }
 0x25f   : > { %v1935_v19 = vadd.f32 %v1933_v57, %v1908_v60  ;;  %v1936_v55 = vadd.f32 %v1934_v8, %v1909_v53  ;;  %v1959_v41 = vpop.permute.xlu0 %1958  ;;  %v1969_v46 = vpop.permute.xlu1 %1968 }
 0x260   : > { %v1960_v29 = vsel %vm455_vm4, %v1957_v34, %v1959_v41  ;;  %v1961_v62 = vsel %vm455_vm4, %v1959_v41, %v1957_v34 }
 0x261   : > { %v1954_v4 = vadd.f32 %v1952_v52, %v1935_v19  ;;  %v1955_v30 = vadd.f32 %v1953_v3, %v1936_v55  ;;  %v1962_v22 = vmul.f32 %v1960_v29, %v3076_v1  ;;  %v1963_v43 = vmul.f32 %v1961_v62, %v3086_v21 }
 0x263   : > { %v1984_v0 = vpop.permute.xlu0 %1983  ;;  %v1986_v2 = vpop.permute.xlu1 %1985  ;;  %v1974_v35 = vrot.slane %v1962_v22, %v2706_v5  ;;  %v1978_v49 = vrot.slane %v1963_v43, %v2706_v5 }
 0x264   : > { %v1987_v12 = vsel %vm494_vm5, %v1984_v0, %v1986_v2  ;;  %v1988_v44 = vsel %vm494_vm5, %v1986_v2, %v1984_v0 }
 0x265   : > { %v1989_v17 = vmul.f32 %v1987_v12, %v3105_v33  ;;  %v1990_v61 = vmul.f32 %v1988_v44, %v3108_v40  ;;  %v1979_v53 = vmul.f32 %v1974_v35, %v1969_v46  ;;  %v1980_v57 = vmul.f32 %v1978_v49, %v1969_v46 }
 0x267   : > { %v1996_v11 = vpop.permute.xlu0 %1995  ;;  %v2011_v38 = vpop.permute.xlu1 %2010  ;;  %v2001_v34 = vrot.slane %v1989_v17, %v2706_v5  ;;  %v2005_v39 = vrot.slane %v1990_v61, %v2706_v5  ;;  %v1981_v62 = vadd.f32 %v1979_v53, %v1954_v4 }
 0x269   : > { %v2007_v29 = vmul.f32 %v2005_v39, %v1996_v11 }
 0x26b   : > { %v2013_v24 = vpop.permute.xlu0 %2012  ;;  %v2023_v16 = vpop.permute.xlu1 %2022 }
 0x26c   : > { %v2014_v54 = vsel %vm533_vm6, %v2011_v38, %v2013_v24  ;;  %v2015_v31 = vsel %vm533_vm6, %v2013_v24, %v2011_v38  ;;  %v2006_v24 = vmul.f32 %v2001_v34, %v1996_v11 }
 0x26d   : > { %v2016_v48 = vmul.f32 %v2014_v54, %v3120_v47  ;;  %v2017_v20 = vmul.f32 %v2015_v31, %v3144_v58 }
 0x26e   : > { %v2008_v17 = vadd.f32 %v2006_v24, %v1981_v62 }
 0x26f   : > { %v2038_v18 = vpop.permute.xlu0 %2037  ;;  %v2040_v23 = vpop.permute.xlu1 %2039  ;;  %v2028_v55 = vrot.slane %v2016_v48, %v2706_v5  ;;  %v2032_v52 = vrot.slane %v2017_v20, %v2706_v5 }
 0x270   : > { %v2041_v6 = vsel %vm572_vm7, %v2038_v18, %v2040_v23  ;;  %v2042_v25 = vsel %vm572_vm7, %v2040_v23, %v2038_v18  ;;  %v1982_v18 = vadd.f32 %v1980_v57, %v1955_v30 }
 0x271   : > { %v2043_v8 = vmul.f32 %v2041_v6, %v3158_v28  ;;  %v2044_v19 = vmul.f32 %v2042_v25, %v3161_v32  ;;  %v2033_v43 = vmul.f32 %v2028_v55, %v2023_v16  ;;  %v2034_v12 = vmul.f32 %v2032_v52, %v2023_v16 }
 0x272   : > { %v2009_v11 = vadd.f32 %v2007_v29, %v1982_v18  ;;  %v2186_v18 = vrot.slane %v3431_v15, %v2931_v56 }
 0x273   : > { %v2050_v59 = vpop.permute.xlu0 %2049  ;;  %v2069_v9 = vpop.permute.xlu1 %2068  ;;  %v2055_v23 = vrot.slane %v2043_v8, %v2706_v5  ;;  %v2059_v22 = vrot.slane %v2044_v19, %v2706_v5  ;;  %v2035_v61 = vadd.f32 %v2033_v43, %v2008_v17 }
 0x274   : > { %v2036_v35 = vadd.f32 %v2034_v12, %v2009_v11 }
 0x275   : > { %v2060_v4 = vmul.f32 %v2055_v23, %v2050_v59  ;;  %v2061_v30 = vmul.f32 %v2059_v22, %v2050_v59  ;;  %v2190_v23 = vrot.slane %v3433_v45, %v2931_v56 }
 0x277   : > { %v2071_v50 = vpop.permute.xlu0 %2070  ;;  %v2081_v51 = vpop.permute.xlu1 %2080  ;;  %v2062_v34 = vadd.f32 %v2060_v4, %v2035_v61  ;;  %v2063_v39 = vadd.f32 %v2061_v30, %v2036_v35 }
 0x278   : > { %v2072_v42 = vsel %vm283_vm1, %v2069_v9, %v2071_v50  ;;  %v2073_v60 = vsel %vm283_vm1, %v2071_v50, %v2069_v9 }
 0x279   : > { %v2074_v0 = vmul.f32 %v2073_v60, %v2988_v13  ;;  %v2075_v2 = vmul.f32 %v2072_v42, %v2991_v14 }
 0x27b   : > { %v2096_v3 = vpop.permute.xlu0 %2095  ;;  %v2098_v41 = vpop.permute.xlu1 %2097  ;;  %v2086_v54 = vrot.slane %v2074_v0, %v2706_v5  ;;  %v2090_v31 = vrot.slane %v2075_v2, %v2706_v5 }
 0x27c   : > { %v2099_v38 = vsel %vm319_vm0, %v2096_v3, %v2098_v41  ;;  %v2100_v46 = vsel %vm319_vm0, %v2098_v41, %v2096_v3 }
 0x27d   : > { %v2101_v13 = vmul.f32 %v2100_v46, %v2978_v7  ;;  %v2102_v14 = vmul.f32 %v2099_v38, %v2981_v10  ;;  %v2091_v20 = vmul.f32 %v2086_v54, %v2081_v51  ;;  %v2092_v10 = vmul.f32 %v2090_v31, %v2081_v51 }
 0x27f   : > { %v2108_v44 = vpop.permute.xlu0 %2107  ;;  %v2123_v9 = vpop.permute.xlu1 %2122  ;;  %v2113_v49 = vrot.slane %v2101_v13, %v2706_v5  ;;  %v2117_v16 = vrot.slane %v2102_v14, %v2706_v5  ;;  %v2093_v19 = vadd.f32 %v2091_v20, %v2062_v34  ;;  %v2094_v55 = vadd.f32 %v2092_v10, %v2063_v39 }
 0x281   : > { %v2118_v42 = vmul.f32 %v2113_v49, %v2108_v44  ;;  %v2119_v60 = vmul.f32 %v2117_v16, %v2108_v44 }
 0x283   : > { %v2125_v48 = vpop.permute.xlu0 %2124  ;;  %v2135_v7 = vpop.permute.xlu1 %2134  ;;  %v2120_v2 = vadd.f32 %v2118_v42, %v2093_v19  ;;  %v2121_v38 = vadd.f32 %v2119_v60, %v2094_v55 }
 0x284   : > { %v2126_v6 = vsel %vm358_vm2, %v2123_v9, %v2125_v48  ;;  %v2127_v25 = vsel %vm358_vm2, %v2125_v48, %v2123_v9 }
 0x285   : > { %v2128_v50 = vmul.f32 %v2127_v25, %v3015_v26  ;;  %v2129_v59 = vmul.f32 %v2126_v6, %v3018_v27 }
 0x287   : > { %v2140_v53 = vrot.slane %v2128_v50, %v2706_v5  ;;  %v2144_v57 = vrot.slane %v2129_v59, %v2706_v5  ;;  %v2150_v8 = vpop.permute.xlu0 %2149  ;;  %v2152_v51 = vpop.permute.xlu1 %2151 }
 0x288   : > { %v2153_v52 = vsel %vm397_vm3, %v2150_v8, %v2152_v51  ;;  %v2154_v26 = vsel %vm397_vm3, %v2152_v51, %v2150_v8 }
 0x289   : > { %v2145_v3 = vmul.f32 %v2140_v53, %v2135_v7  ;;  %v2146_v27 = vmul.f32 %v2144_v57, %v2135_v7  ;;  %v2155_v41 = vmul.f32 %v2154_v26, %v3032_v36  ;;  %v2156_v0 = vmul.f32 %v2153_v52, %v3035_v37 }
 0x28b   : > { %v2162_v46 = vpop.permute.xlu0 %2161  ;;  %v2167_v24 = vrot.slane %v2155_v41, %v2706_v5  ;;  %v2171_v29 = vrot.slane %v2156_v0, %v2706_v5  ;;  %v2181_v62 = vpop.permute.xlu1 %2180  ;;  %v2147_v22 = vadd.f32 %v2145_v3, %v2120_v2  ;;  %v2148_v43 = vadd.f32 %v2146_v27, %v2121_v38 }
 0x28c   : > { %v2191_v14 = vmul.f32 %v2186_v18, %v2181_v62  ;;  %v2192_v44 = vmul.f32 %v2190_v23, %v2181_v62  ;;  %v2538_v23 = vld [vmem:[%s2711_s17] sm:$0xff]  ;;  %s2323_s17 = scalar_lea.sflag [#allocation3], %s242_s18 }
 0x28d   : > { %v2172_v12 = vmul.f32 %v2167_v24, %v2162_v46  ;;  %v2173_v36 = vmul.f32 %v2171_v29, %v2162_v46 }
 0x28f   : > { %v2174_v13 = vadd.f32 %v2172_v12, %v2147_v22  ;;  %v2175_v37 = vadd.f32 %v2173_v36, %v2148_v43  ;;  %v2196_v9 = vpop.permute.xlu0 %2195  ;;  %v2198_v54 = vpop.permute.xlu1 %2197  ;;  %v2311_v22 = vcombine.high %v2538_v23, %v2538_v23 }
 0x290   : > { %v2199_v15 = vsel %vm455_vm4, %v2196_v9, %v2198_v54  ;;  %v2200_v56 = vsel %vm455_vm4, %v2198_v54, %v2196_v9 }
 0x291   : > { %v2193_v31 = vadd.f32 %v2191_v14, %v2174_v13  ;;  %v2194_v17 = vadd.f32 %v2192_v44, %v2175_v37  ;;  %v2201_v61 = vmul.f32 %v2199_v15, %v3076_v1  ;;  %v2202_v35 = vmul.f32 %v2200_v56, %v3086_v21 }
 0x293   : > { %v2208_v11 = vpop.permute.xlu0 %2207  ;;  %v2223_v4 = vpop.permute.xlu1 %2222  ;;  %v2213_v6 = vrot.slane %v2201_v61, %v2706_v5  ;;  %v2217_v25 = vrot.slane %v2202_v35, %v2706_v5 }
 0x295   : > { %v2218_v39 = vmul.f32 %v2213_v6, %v2208_v11  ;;  %v2219_v42 = vmul.f32 %v2217_v25, %v2208_v11 }
 0x297   : > { %v2225_v45 = vpop.permute.xlu0 %2224  ;;  %v2235_v30 = vpop.permute.xlu1 %2234  ;;  %v2220_v55 = vadd.f32 %v2218_v39, %v2193_v31 }
 0x298   : > { %v2226_v49 = vsel %vm494_vm5, %v2223_v4, %v2225_v45  ;;  %v2227_v16 = vsel %vm494_vm5, %v2225_v45, %v2223_v4 }
 0x299   : > { %v2228_v48 = vmul.f32 %v2226_v49, %v3105_v33  ;;  %v2229_v7 = vmul.f32 %v2227_v16, %v3108_v40 }
 0x29b   : > { %v2250_v20 = vpop.permute.xlu0 %2249  ;;  %v2252_v10 = vpop.permute.xlu1 %2251  ;;  %v2240_v33 = vrot.slane %v2228_v48, %v2706_v5  ;;  %v2244_v40 = vrot.slane %v2229_v7, %v2706_v5 }
 0x29c   : > { %v2253_v1 = vsel %vm533_vm6, %v2250_v20, %v2252_v10  ;;  %v2254_v21 = vsel %vm533_vm6, %v2252_v10, %v2250_v20 }
 0x29d   : > { %v2255_v50 = vmul.f32 %v2253_v1, %v3120_v47  ;;  %v2256_v59 = vmul.f32 %v2254_v21, %v3144_v58  ;;  %v2245_v8 = vmul.f32 %v2240_v33, %v2235_v30  ;;  %v2246_v51 = vmul.f32 %v2244_v40, %v2235_v30 }
 0x29e   : > { %v2221_v47 = vadd.f32 %v2219_v42, %v2194_v17 }
 0x29f   : > { %v2262_v34 = vpop.permute.xlu0 %2261  ;;  %v2267_v60 = vrot.slane %v2255_v50, %v2706_v5  ;;  %v2271_v53 = vrot.slane %v2256_v59, %v2706_v5  ;;  %v2277_v57 = vpop.permute.xlu1 %2276  ;;  %v2247_v0 = vadd.f32 %v2245_v8, %v2220_v55 }
 0x2a0   : > { %v2248_v2 = vadd.f32 %v2246_v51, %v2221_v47 }
 0x2a1   : > { %v2272_v26 = vmul.f32 %v2267_v60, %v2262_v34  ;;  %v2273_v3 = vmul.f32 %v2271_v53, %v2262_v34 }
 0x2a3   : > { %v2279_v19 = vpop.permute.xlu0 %2278  ;;  %v2289_v24 = vpop.permute.xlu1 %2288  ;;  %v2274_v29 = vadd.f32 %v2272_v26, %v2247_v0  ;;  %v2275_v62 = vadd.f32 %v2273_v3, %v2248_v2 }
 0x2a4   : > { %v2280_v58 = vsel %vm572_vm7, %v2277_v57, %v2279_v19  ;;  %v2281_v52 = vsel %vm572_vm7, %v2279_v19, %v2277_v57 }
 0x2a5   : > { %v2282_v27 = vmul.f32 %v2280_v58, %v3158_v28  ;;  %v2283_v41 = vmul.f32 %v2281_v52, %v3161_v32 }
 0x2a7   : > { %v2294_v38 = vrot.slane %v2282_v27, %v2706_v5  ;;  %v2298_v46 = vrot.slane %v2283_v41, %v2706_v5  ;;  %v2307_v12 = vpop.permute.xlu0 %2306 }
 0x2a9   : > { %v2299_v63 = vmul.f32 %v2294_v38, %v2289_v24  ;;  %v2300_v18 = vmul.f32 %v2298_v46, %v2289_v24 }
 0x2ab   : > { %v2301_v43 = vadd.f32 %v2299_v63, %v2274_v29  ;;  %v2302_v28 = vadd.f32 %v2300_v18, %v2275_v62 }
 0x2ad   : > { %v2309_v32 = vadd.f32 %v2307_v12, %v2301_v43  ;;  %v2310_v36 = vadd.f32 %v2307_v12, %v2302_v28 }
 0x2af   : > { %v2313_v13 = vadd.f32 %v2538_v23, %v2309_v32  ;;  %v2314_v37 = vadd.f32 %v2311_v22, %v2310_v36 }
 0x2b1   : > { %v2315_v5 = vmax.f32 %v2313_v13, 0.0  ;;  %v2316_v14 = vmax.f32 %v2314_v37, 0.0 }
 0x2b3   : > { %v2319_v44 = vcombine.low %v2315_v5, %v2316_v14 }
 0x2b5   : > { %2321 = vst [vmem:[%s244_s26] sm:$0xff] %v2319_v44 }
 0x2b6   : > { %2552 = shalt.err (!%p2549_p3)
}
 0x2b7   : > { %s2553_s15 = scalar_lea.hbm %s2335_s20, 128  ;;  %s2557_s18 = scalar_lea.hbm %s3985_s6, 256 }
 0x2b8   : > { %p2554_p4 = scmp.ne.s32.totalorder %s2335_s20, %s2553_s15  ;;  %p2558_p9 = scmp.lt.s32.totalorder %s2335_s20, %s3985_s6 }
 0x2b9   : > { %p2559_p10 = scmp.lt.s32.totalorder %s2557_s18, %s2553_s15 }
 0x2ba   : > { %p2555_p7 = pnand %p2554_p4, %p2684_p5 }
 0x2bb   : > { %p2560_p11 = por %p2559_p10, %p2558_p9 }
 0x2bc   : > { %p2556_p8 = pneg %p2555_p7 }
 0x2be   : > { %p2561_p12 = pnand %p2560_p11, %p2556_p8 }
 0x2c0   : > { %2564 = shalt.err (!%p2561_p12)
}
 0x2c1   : > { %2487 = dma.vmem_to_hbm [thread:$0]  (%p2684_p5), %s2338_s12, 128, %s2335_s20, %s2323_s17  }
 0x2c2 PF: > { %p2493_p13 = scmp.ge.s32.totalorder %s2599_s24, 2  ;;  %s2349_s26 = sand.u32 1, %s2587_s21  }
 0x2c3   : > { %s2350_s19 = scalar_lea.sflag [#allocation3], %s2349_s26 }
 0x2c4   : > { %p2490_p0 = pnand %p2493_p13, %p2688_p6 }
 0x2c6   : > { %p2491_p1 = pneg %p2490_p0 }
 0x2c8   : > { %2582 = dma.done.wait (%p2491_p1), %s2350_s19, 128  }
 0x2c9   : > { %2584 = vsyncadd (%p2491_p1), %s2350_s19, 4294967168  ;;  %p16_p2 = scmp.ge.s32.totalorder %s2671_s27, 4   ;;  %s4003_s21 = smov %s2591_s22 }
 0x2ca   : > { %s4004_s22 = smov %s2595_s23  ;;  %s4005_s23 = smov %s2682_s30 }
 0x2cb   : > { %s4006_s24 = smov %s2671_s27  ;;  %18 = sbr.rel (!%p16_p2) target bundleno = 3 (0x3), region = 156 }
 0x2d0   :  { %2355 = vsyncpa [#allocation3], 1 }
 0x2d1   :  { %2357 = vsyncpa [#allocation3 + $0x1], 1 }

</bundles_post_ra>
